<compile_context>
chip_gen: v6e
topology: v6e:2x2x1
jax: 0.10.0
libtpu: 0.0.40
codegen_flags: <defaults>
</compile_context>

<pallas_src>
import jax
import jax.numpy as jnp
from jax import lax
from jax.experimental import pallas as pl
from jax.experimental.pallas import tpu as pltpu


def _i32(v: int) -> int:
    """Wrap a Python int into signed-int32 range (bit-pattern preserving)."""
    v &= 0xFFFFFFFF
    return v - (1 << 32) if v >= (1 << 31) else v


def _count(mask):
    """Number of True elements of a 2D boolean array, as a (1, 1) int32."""
    s = jnp.sum(mask.astype(jnp.int32), axis=-1, keepdims=True)
    return jnp.sum(s, axis=0, keepdims=True)


def _radix_select_kth(keys, in_bucket, kk, num_pairs, lo_bit=0):
    """Exact kk-th smallest (0-indexed) of `keys` restricted to `in_bucket`.

    keys: [R, C] non-negative int32 bit patterns; 2 bits resolved per round.
    Returns (threshold, kk_rem, bucket):
      threshold : (1, 1) int32, the selected value,
      kk_rem    : (1, 1) int32, the target's rank among keys == threshold,
      bucket    : boolean mask of (in_bucket & keys == threshold).
    """
    threshold = jnp.zeros((1, 1), jnp.int32)
    for p in range(num_pairs - 1, -1, -1):
        b = lo_bit + 2 * p
        two = keys & _i32(3 << b)                     # 2-bit field (bits b+1, b)
        s0 = jnp.logical_and(in_bucket, two == 0)
        s1 = jnp.logical_and(in_bucket, two == _i32(1 << b))
        s2 = jnp.logical_and(in_bucket, two == _i32(2 << b))
        c0 = _count(s0)                               # three independent reduces
        c1 = c0 + _count(s1)
        c2 = c1 + _count(s2)
        ge0 = kk >= c0
        ge1 = kk >= c1
        ge2 = kk >= c2
        digit = (ge0.astype(jnp.int32) + ge1.astype(jnp.int32)
                 + ge2.astype(jnp.int32))             # (1,1), in 0..3
        threshold = threshold | (digit << b)
        kk = kk - jnp.where(ge2, c2,
                            jnp.where(ge1, c1,
                                      jnp.where(ge0, c0, jnp.zeros_like(c0))))
        # Incremental bucket update (no high-mask / prefix recompute).
        in_bucket = jnp.logical_and(in_bucket, two == (digit << b))
    return threshold, kk, in_bucket


def make_prefix_subnet_kernel(j, value_pairs, value_lo_bit, idx_pairs):
    """j = number of smallest-|score| elements that get zeroed out."""

    def kernel(lidx_ref, scores_ref, out_ref):
        del lidx_ref  # consumed only by the BlockSpec index_map
        scores = jnp.abs(scores_ref[...].astype(jnp.float32))       # [R, C]
        # Bit pattern of a non-negative f32 is order-preserving as int32.
        u = pltpu.bitcast(scores, jnp.int32)

        kk0 = jnp.full((1, 1), j, jnp.int32)
        all_true = jnp.ones(u.shape, jnp.bool_)
        thr, kk, eq = _radix_select_kth(u, all_true, kk0,
                                        value_pairs, value_lo_bit)
        # thr = bit pattern of the j-th smallest |score|; eq = {u == thr};
        # kk  = how many of the tied elements must also be pruned so exactly
        #       j elements are zeroed (matching torch's sort-based count).

        rows = lax.broadcasted_iota(jnp.int32, u.shape, 0)
        cols = lax.broadcasted_iota(jnp.int32, u.shape, 1)
        flat_idx = rows * u.shape[1] + cols
        # Stable tie-break: prune the kk tied elements with the smallest flat
        # index (short select over indices, restricted to the `eq` bucket).
        idx_thr, _, _ = _radix_select_kth(flat_idx, eq, kk, idx_pairs, 0)

        pruned_tie = jnp.logical_and(eq, flat_idx < idx_thr)
        keep = jnp.logical_and(u >= thr, jnp.logical_not(pruned_tie))
        out_ref[...] = keep.astype(out_ref.dtype)

    return kernel


def _reference_forward(adapters_mask, layer_idx, sparsity):
    """Plain-JAX port of PrefixSubnet.forward / GetSubnet.forward (stable ties).

    Also serves as the small-layer fast path.
    """
    scores = jnp.abs(adapters_mask[layer_idx])
    flat = scores.reshape(-1)
    n = flat.shape[0]
    j = int((1.0 - float(sparsity)) * n)
    j = max(0, min(j, n))
    order = jnp.argsort(flat, stable=True)
    out = jnp.zeros((n,), adapters_mask.dtype).at[order[j:]].set(1)
    return out.reshape(scores.shape)


def prefix_subnet_forward(adapters_mask, layer_idx, sparsity, *,
                          use_pallas=None, small_size_threshold=16384):
    """adapters_mask: [n_layers, prefix_length, 2*input_size].

    Returns the binary subnet mask [prefix_length, 2*input_size] (same dtype).
    """
    n_layers, P, C = adapters_mask.shape
    n = P * C
    j = int((1.0 - float(sparsity)) * n)   # matches the PyTorch int() truncation
    j = max(0, min(j, n))
    if j >= n:                              # sparsity numerically 0 -> all pruned
        return jnp.zeros((P, C), adapters_mask.dtype)

    if use_pallas is None:
        # Tiny layers are pure launch overhead for a kernel; plain JAX wins.
        use_pallas = n >= small_size_threshold
    if not use_pallas:
        return _reference_forward(adapters_mask, layer_idx, sparsity)

    # Lane-dense layout: present the layer as (n//128, 128) when possible so no
    # vreg is lane-masked and the output store is unmasked.
    if n % 128 == 0:
        R, Cb = n // 128, 128
        src = adapters_mask.reshape(n_layers, R, Cb)
    else:
        R, Cb = P, C
        src = adapters_mask

    itemsize = jnp.dtype(adapters_mask.dtype).itemsize
    is_bf16 = jnp.dtype(adapters_mask.dtype) == jnp.bfloat16
    value_lo_bit = 16 if is_bf16 else 0      # bf16 upcast: low 16 bits are zero
    value_pairs = (32 - value_lo_bit) // 2   # 16 rounds f32, 8 rounds bf16
    idx_pairs = max(1, ((n - 1).bit_length() + 1) // 2)

    # Clamp the prefetched index so the data-dependent DMA is always in bounds.
    lidx = jnp.clip(jnp.asarray(layer_idx, jnp.int32), 0, n_layers - 1).reshape(1)

    rounds = value_pairs + idx_pairs
    cost = pl.CostEstimate(
        flops=(rounds * 12 + 8) * n,
        transcendentals=0,
        bytes_accessed=2 * n * itemsize + 4,
    )

    out = pl.pallas_call(
        make_prefix_subnet_kernel(j, value_pairs, value_lo_bit, idx_pairs),
        out_shape=jax.ShapeDtypeStruct((R, Cb), adapters_mask.dtype),
        grid_spec=pltpu.PrefetchScalarGridSpec(
            num_scalar_prefetch=1,
            grid=(1,),
            in_specs=[
                # Only the selected layer is DMA'd from HBM: the prefetched
                # layer index drives the block index of the squeezed layer dim.
                # grid=(1,) -> single-buffer (no useless double buffering).
                pl.BlockSpec((pl.Squeezed(), R, Cb),
                             lambda i, lidx_ref: (lidx_ref[0], 0, 0),
                             pipeline_mode=pl.Buffered(1)),
            ],
            out_specs=pl.BlockSpec((R, Cb), lambda i, lidx_ref: (0, 0),
                                   pipeline_mode=pl.Buffered(1)),
        ),
        compiler_params=pltpu.CompilerParams(
            dimension_semantics=("arbitrary",),
            # Above v5e's 16 MiB scoped default; capped below v7x's 64 MiB.
            vmem_limit_bytes=int(min(max(8 * n * 4 + (1 << 20), 32 << 20),
                                     56 << 20)),
        ),
        cost_estimate=cost,
    )(lidx, src)
    return out.reshape(P, C)


if __name__ == "__main__":
    # Small shapes consistent with the module:
    # n_layers=4, prefix_length=8, input_size=32 -> adapters_mask [4, 8, 64].
    n_layers, prefix_length, input_size = 4, 8, 32
    sparsity = 0.25
    layer_idx = 2

    key = jax.random.PRNGKey(0)
    bound = 1.0 / (2 * input_size) ** 0.5    # stand-in for kaiming_uniform_
    adapters_mask = jax.random.uniform(
        key, (n_layers, prefix_length, 2 * input_size),
        dtype=jnp.float32, minval=-bound, maxval=bound)

    n = prefix_length * 2 * input_size
    j = int((1.0 - sparsity) * n)

    # 1) Pallas kernel (forced: the auto dispatch would take the small-size
    #    fast path at this tiny demo shape).
    out = prefix_subnet_forward(adapters_mask, layer_idx, sparsity,
                                use_pallas=True)
    jax.block_until_ready(out)
    ref = _reference_forward(adapters_mask, layer_idx, sparsity)
    assert out.shape == (prefix_length, 2 * input_size)
    assert out.dtype == adapters_mask.dtype
    assert int(jnp.sum(out)) == n - j, "wrong number of surviving weights"
    assert bool(jnp.all(out == ref)), "mask mismatch vs reference"

    # 2) Heavily tied scores (quantized weights): exactly j elements must still
    #    be pruned, with stable-sort tie-breaking.
    tied = jnp.round(adapters_mask * 8.0) / 8.0
    out_t = prefix_subnet_forward(tied, layer_idx, sparsity, use_pallas=True)
    jax.block_until_ready(out_t)
    ref_t = _reference_forward(tied, layer_idx, sparsity)
    assert int(jnp.sum(out_t)) == n - j, "tie handling: wrong survivor count"
    assert bool(jnp.all(out_t == ref_t)), "tie handling: mask mismatch"

    # 3) Auto dispatch (small layer -> plain-JAX fast path) agrees with kernel.
    out_auto = prefix_subnet_forward(adapters_mask, layer_idx, sparsity)
    assert bool(jnp.all(out_auto == out)), "fast path mismatch vs kernel"

    print("KERNEL_OK")
</pallas_src>

<mosaic_0001>
module attributes {stable_mosaic.version = 11 : i64} {
  func.func @kernel(%arg0: i32, %arg1: memref<1xi32, #tpu.memory_space<smem>>, %arg2: memref<1x4x128xf32, #tpu.memory_space<vmem>>, %arg3: memref<4x128xf32, #tpu.memory_space<vmem>>) attributes {dimension_semantics = [#tpu.dimension_semantics<arbitrary>], iteration_bounds = array<i64: 1>, scalar_prefetch = 1 : i64, scratch_operands = 0 : i64, tpu.core_type = #tpu.core_type<tc>, window_params = [{pipeline_mode = #tpu.pipeline_mode<synchronous>, transform_indices = @transform_0, window_bounds = array<i64: 1, 4, 128>}, {pipeline_mode = #tpu.pipeline_mode<synchronous>, transform_indices = @transform_1, window_bounds = array<i64: 4, 128>}]} {
    %c0 = arith.constant 0 : index
    %c0_0 = arith.constant 0 : index
    %c0_1 = arith.constant 0 : index
    %0 = vector.load %arg2[%c0, %c0_0, %c0_1] : memref<1x4x128xf32, #tpu.memory_space<vmem>>, vector<1x4x128xf32>
    %1 = vector.shape_cast %0 : vector<1x4x128xf32> to vector<4x128xf32>
    %2 = math.absf %1 : vector<4x128xf32>
    %3 = tpu.bitcast %2 : vector<4x128xf32> -> vector<4x128xi32>
    %c384_i32 = arith.constant 384 : i32
    %4 = vector.broadcast %c384_i32 : i32 to vector<1x1xi32>
    %true = arith.constant true
    %5 = vector.broadcast %true : i1 to vector<4x128xi1>
    %c0_i32 = arith.constant 0 : i32
    %6 = vector.broadcast %c0_i32 : i32 to vector<1x1xi32>
    %c-1073741824_i32 = arith.constant -1073741824 : i32
    %7 = vector.broadcast %c-1073741824_i32 : i32 to vector<4x128xi32>
    %8 = arith.andi %3, %7 : vector<4x128xi32>
    %c0_i32_2 = arith.constant 0 : i32
    %9 = vector.broadcast %c0_i32_2 : i32 to vector<4x128xi32>
    %10 = arith.cmpi eq, %8, %9 : vector<4x128xi32>
    %11 = arith.andi %5, %10 : vector<4x128xi1>
    %c1073741824_i32 = arith.constant 1073741824 : i32
    %12 = vector.broadcast %c1073741824_i32 : i32 to vector<4x128xi32>
    %13 = arith.cmpi eq, %8, %12 : vector<4x128xi32>
    %14 = arith.andi %5, %13 : vector<4x128xi1>
    %c-2147483648_i32 = arith.constant -2147483648 : i32
    %15 = vector.broadcast %c-2147483648_i32 : i32 to vector<4x128xi32>
    %16 = arith.cmpi eq, %8, %15 : vector<4x128xi32>
    %17 = arith.andi %5, %16 : vector<4x128xi1>
    %18 = arith.extui %11 : vector<4x128xi1> to vector<4x128xi32>
    %cst = arith.constant dense<0> : vector<4xi32>
    %19 = vector.multi_reduction <add>, %18, %cst [1] : vector<4x128xi32> to vector<4xi32>
    %20 = vector.shape_cast %19 : vector<4xi32> to vector<4x1xi32>
    %cst_3 = arith.constant dense<0> : vector<1xi32>
    %21 = vector.multi_reduction <add>, %20, %cst_3 [0] : vector<4x1xi32> to vector<1xi32>
    %22 = vector.shape_cast %21 : vector<1xi32> to vector<1x1xi32>
    %23 = arith.extui %14 : vector<4x128xi1> to vector<4x128xi32>
    %cst_4 = arith.constant dense<0> : vector<4xi32>
    %24 = vector.multi_reduction <add>, %23, %cst_4 [1] : vector<4x128xi32> to vector<4xi32>
    %25 = vector.shape_cast %24 : vector<4xi32> to vector<4x1xi32>
    %cst_5 = arith.constant dense<0> : vector<1xi32>
    %26 = vector.multi_reduction <add>, %25, %cst_5 [0] : vector<4x1xi32> to vector<1xi32>
    %27 = vector.shape_cast %26 : vector<1xi32> to vector<1x1xi32>
    %28 = arith.addi %22, %27 : vector<1x1xi32>
    %29 = arith.extui %17 : vector<4x128xi1> to vector<4x128xi32>
    %cst_6 = arith.constant dense<0> : vector<4xi32>
    %30 = vector.multi_reduction <add>, %29, %cst_6 [1] : vector<4x128xi32> to vector<4xi32>
    %31 = vector.shape_cast %30 : vector<4xi32> to vector<4x1xi32>
    %cst_7 = arith.constant dense<0> : vector<1xi32>
    %32 = vector.multi_reduction <add>, %31, %cst_7 [0] : vector<4x1xi32> to vector<1xi32>
    %33 = vector.shape_cast %32 : vector<1xi32> to vector<1x1xi32>
    %34 = arith.addi %28, %33 : vector<1x1xi32>
    %35 = arith.cmpi sge, %4, %22 : vector<1x1xi32>
    %36 = arith.cmpi sge, %4, %28 : vector<1x1xi32>
    %37 = arith.cmpi sge, %4, %34 : vector<1x1xi32>
    %38 = arith.extui %35 : vector<1x1xi1> to vector<1x1xi32>
    %39 = arith.extui %36 : vector<1x1xi1> to vector<1x1xi32>
    %40 = arith.addi %38, %39 : vector<1x1xi32>
    %41 = arith.extui %37 : vector<1x1xi1> to vector<1x1xi32>
    %42 = arith.addi %40, %41 : vector<1x1xi32>
    %c30_i32 = arith.constant 30 : i32
    %43 = vector.broadcast %c30_i32 : i32 to vector<1x1xi32>
    %44 = arith.shli %42, %43 : vector<1x1xi32>
    %45 = arith.ori %6, %44 : vector<1x1xi32>
    %c0_i32_8 = arith.constant 0 : i32
    %46 = vector.broadcast %c0_i32_8 : i32 to vector<1x1xi32>
    %47 = arith.select %35, %22, %46 : vector<1x1xi1>, vector<1x1xi32>
    %48 = arith.select %36, %28, %47 : vector<1x1xi1>, vector<1x1xi32>
    %49 = arith.select %37, %34, %48 : vector<1x1xi1>, vector<1x1xi32>
    %50 = arith.subi %4, %49 : vector<1x1xi32>
    %c30_i32_9 = arith.constant 30 : i32
    %51 = vector.broadcast %c30_i32_9 : i32 to vector<1x1xi32>
    %52 = arith.shli %42, %51 : vector<1x1xi32>
    %53 = vector.broadcast %52 : vector<1x1xi32> to vector<4x128xi32>
    %54 = arith.cmpi eq, %8, %53 : vector<4x128xi32>
    %55 = arith.andi %5, %54 : vector<4x128xi1>
    %c805306368_i32 = arith.constant 805306368 : i32
    %56 = vector.broadcast %c805306368_i32 : i32 to vector<4x128xi32>
    %57 = arith.andi %3, %56 : vector<4x128xi32>
    %c0_i32_10 = arith.constant 0 : i32
    %58 = vector.broadcast %c0_i32_10 : i32 to vector<4x128xi32>
    %59 = arith.cmpi eq, %57, %58 : vector<4x128xi32>
    %60 = arith.andi %55, %59 : vector<4x128xi1>
    %c268435456_i32 = arith.constant 268435456 : i32
    %61 = vector.broadcast %c268435456_i32 : i32 to vector<4x128xi32>
    %62 = arith.cmpi eq, %57, %61 : vector<4x128xi32>
    %63 = arith.andi %55, %62 : vector<4x128xi1>
    %c536870912_i32 = arith.constant 536870912 : i32
    %64 = vector.broadcast %c536870912_i32 : i32 to vector<4x128xi32>
    %65 = arith.cmpi eq, %57, %64 : vector<4x128xi32>
    %66 = arith.andi %55, %65 : vector<4x128xi1>
    %67 = arith.extui %60 : vector<4x128xi1> to vector<4x128xi32>
    %cst_11 = arith.constant dense<0> : vector<4xi32>
    %68 = vector.multi_reduction <add>, %67, %cst_11 [1] : vector<4x128xi32> to vector<4xi32>
    %69 = vector.shape_cast %68 : vector<4xi32> to vector<4x1xi32>
    %cst_12 = arith.constant dense<0> : vector<1xi32>
    %70 = vector.multi_reduction <add>, %69, %cst_12 [0] : vector<4x1xi32> to vector<1xi32>
    %71 = vector.shape_cast %70 : vector<1xi32> to vector<1x1xi32>
    %72 = arith.extui %63 : vector<4x128xi1> to vector<4x128xi32>
    %cst_13 = arith.constant dense<0> : vector<4xi32>
    %73 = vector.multi_reduction <add>, %72, %cst_13 [1] : vector<4x128xi32> to vector<4xi32>
    %74 = vector.shape_cast %73 : vector<4xi32> to vector<4x1xi32>
    %cst_14 = arith.constant dense<0> : vector<1xi32>
    %75 = vector.multi_reduction <add>, %74, %cst_14 [0] : vector<4x1xi32> to vector<1xi32>
    %76 = vector.shape_cast %75 : vector<1xi32> to vector<1x1xi32>
    %77 = arith.addi %71, %76 : vector<1x1xi32>
    %78 = arith.extui %66 : vector<4x128xi1> to vector<4x128xi32>
    %cst_15 = arith.constant dense<0> : vector<4xi32>
    %79 = vector.multi_reduction <add>, %78, %cst_15 [1] : vector<4x128xi32> to vector<4xi32>
    %80 = vector.shape_cast %79 : vector<4xi32> to vector<4x1xi32>
    %cst_16 = arith.constant dense<0> : vector<1xi32>
    %81 = vector.multi_reduction <add>, %80, %cst_16 [0] : vector<4x1xi32> to vector<1xi32>
    %82 = vector.shape_cast %81 : vector<1xi32> to vector<1x1xi32>
    %83 = arith.addi %77, %82 : vector<1x1xi32>
    %84 = arith.cmpi sge, %50, %71 : vector<1x1xi32>
    %85 = arith.cmpi sge, %50, %77 : vector<1x1xi32>
    %86 = arith.cmpi sge, %50, %83 : vector<1x1xi32>
    %87 = arith.extui %84 : vector<1x1xi1> to vector<1x1xi32>
    %88 = arith.extui %85 : vector<1x1xi1> to vector<1x1xi32>
    %89 = arith.addi %87, %88 : vector<1x1xi32>
    %90 = arith.extui %86 : vector<1x1xi1> to vector<1x1xi32>
    %91 = arith.addi %89, %90 : vector<1x1xi32>
    %c28_i32 = arith.constant 28 : i32
    %92 = vector.broadcast %c28_i32 : i32 to vector<1x1xi32>
    %93 = arith.shli %91, %92 : vector<1x1xi32>
    %94 = arith.ori %45, %93 : vector<1x1xi32>
    %c0_i32_17 = arith.constant 0 : i32
    %95 = vector.broadcast %c0_i32_17 : i32 to vector<1x1xi32>
    %96 = arith.select %84, %71, %95 : vector<1x1xi1>, vector<1x1xi32>
    %97 = arith.select %85, %77, %96 : vector<1x1xi1>, vector<1x1xi32>
    %98 = arith.select %86, %83, %97 : vector<1x1xi1>, vector<1x1xi32>
    %99 = arith.subi %50, %98 : vector<1x1xi32>
    %c28_i32_18 = arith.constant 28 : i32
    %100 = vector.broadcast %c28_i32_18 : i32 to vector<1x1xi32>
    %101 = arith.shli %91, %100 : vector<1x1xi32>
    %102 = vector.broadcast %101 : vector<1x1xi32> to vector<4x128xi32>
    %103 = arith.cmpi eq, %57, %102 : vector<4x128xi32>
    %104 = arith.andi %55, %103 : vector<4x128xi1>
    %c201326592_i32 = arith.constant 201326592 : i32
    %105 = vector.broadcast %c201326592_i32 : i32 to vector<4x128xi32>
    %106 = arith.andi %3, %105 : vector<4x128xi32>
    %c0_i32_19 = arith.constant 0 : i32
    %107 = vector.broadcast %c0_i32_19 : i32 to vector<4x128xi32>
    %108 = arith.cmpi eq, %106, %107 : vector<4x128xi32>
    %109 = arith.andi %104, %108 : vector<4x128xi1>
    %c67108864_i32 = arith.constant 67108864 : i32
    %110 = vector.broadcast %c67108864_i32 : i32 to vector<4x128xi32>
    %111 = arith.cmpi eq, %106, %110 : vector<4x128xi32>
    %112 = arith.andi %104, %111 : vector<4x128xi1>
    %c134217728_i32 = arith.constant 134217728 : i32
    %113 = vector.broadcast %c134217728_i32 : i32 to vector<4x128xi32>
    %114 = arith.cmpi eq, %106, %113 : vector<4x128xi32>
    %115 = arith.andi %104, %114 : vector<4x128xi1>
    %116 = arith.extui %109 : vector<4x128xi1> to vector<4x128xi32>
    %cst_20 = arith.constant dense<0> : vector<4xi32>
    %117 = vector.multi_reduction <add>, %116, %cst_20 [1] : vector<4x128xi32> to vector<4xi32>
    %118 = vector.shape_cast %117 : vector<4xi32> to vector<4x1xi32>
    %cst_21 = arith.constant dense<0> : vector<1xi32>
    %119 = vector.multi_reduction <add>, %118, %cst_21 [0] : vector<4x1xi32> to vector<1xi32>
    %120 = vector.shape_cast %119 : vector<1xi32> to vector<1x1xi32>
    %121 = arith.extui %112 : vector<4x128xi1> to vector<4x128xi32>
    %cst_22 = arith.constant dense<0> : vector<4xi32>
    %122 = vector.multi_reduction <add>, %121, %cst_22 [1] : vector<4x128xi32> to vector<4xi32>
    %123 = vector.shape_cast %122 : vector<4xi32> to vector<4x1xi32>
    %cst_23 = arith.constant dense<0> : vector<1xi32>
    %124 = vector.multi_reduction <add>, %123, %cst_23 [0] : vector<4x1xi32> to vector<1xi32>
    %125 = vector.shape_cast %124 : vector<1xi32> to vector<1x1xi32>
    %126 = arith.addi %120, %125 : vector<1x1xi32>
    %127 = arith.extui %115 : vector<4x128xi1> to vector<4x128xi32>
    %cst_24 = arith.constant dense<0> : vector<4xi32>
    %128 = vector.multi_reduction <add>, %127, %cst_24 [1] : vector<4x128xi32> to vector<4xi32>
    %129 = vector.shape_cast %128 : vector<4xi32> to vector<4x1xi32>
    %cst_25 = arith.constant dense<0> : vector<1xi32>
    %130 = vector.multi_reduction <add>, %129, %cst_25 [0] : vector<4x1xi32> to vector<1xi32>
    %131 = vector.shape_cast %130 : vector<1xi32> to vector<1x1xi32>
    %132 = arith.addi %126, %131 : vector<1x1xi32>
    %133 = arith.cmpi sge, %99, %120 : vector<1x1xi32>
    %134 = arith.cmpi sge, %99, %126 : vector<1x1xi32>
    %135 = arith.cmpi sge, %99, %132 : vector<1x1xi32>
    %136 = arith.extui %133 : vector<1x1xi1> to vector<1x1xi32>
    %137 = arith.extui %134 : vector<1x1xi1> to vector<1x1xi32>
    %138 = arith.addi %136, %137 : vector<1x1xi32>
    %139 = arith.extui %135 : vector<1x1xi1> to vector<1x1xi32>
    %140 = arith.addi %138, %139 : vector<1x1xi32>
    %c26_i32 = arith.constant 26 : i32
    %141 = vector.broadcast %c26_i32 : i32 to vector<1x1xi32>
    %142 = arith.shli %140, %141 : vector<1x1xi32>
    %143 = arith.ori %94, %142 : vector<1x1xi32>
    %c0_i32_26 = arith.constant 0 : i32
    %144 = vector.broadcast %c0_i32_26 : i32 to vector<1x1xi32>
    %145 = arith.select %133, %120, %144 : vector<1x1xi1>, vector<1x1xi32>
    %146 = arith.select %134, %126, %145 : vector<1x1xi1>, vector<1x1xi32>
    %147 = arith.select %135, %132, %146 : vector<1x1xi1>, vector<1x1xi32>
    %148 = arith.subi %99, %147 : vector<1x1xi32>
    %c26_i32_27 = arith.constant 26 : i32
    %149 = vector.broadcast %c26_i32_27 : i32 to vector<1x1xi32>
    %150 = arith.shli %140, %149 : vector<1x1xi32>
    %151 = vector.broadcast %150 : vector<1x1xi32> to vector<4x128xi32>
    %152 = arith.cmpi eq, %106, %151 : vector<4x128xi32>
    %153 = arith.andi %104, %152 : vector<4x128xi1>
    %c50331648_i32 = arith.constant 50331648 : i32
    %154 = vector.broadcast %c50331648_i32 : i32 to vector<4x128xi32>
    %155 = arith.andi %3, %154 : vector<4x128xi32>
    %c0_i32_28 = arith.constant 0 : i32
    %156 = vector.broadcast %c0_i32_28 : i32 to vector<4x128xi32>
    %157 = arith.cmpi eq, %155, %156 : vector<4x128xi32>
    %158 = arith.andi %153, %157 : vector<4x128xi1>
    %c16777216_i32 = arith.constant 16777216 : i32
    %159 = vector.broadcast %c16777216_i32 : i32 to vector<4x128xi32>
    %160 = arith.cmpi eq, %155, %159 : vector<4x128xi32>
    %161 = arith.andi %153, %160 : vector<4x128xi1>
    %c33554432_i32 = arith.constant 33554432 : i32
    %162 = vector.broadcast %c33554432_i32 : i32 to vector<4x128xi32>
    %163 = arith.cmpi eq, %155, %162 : vector<4x128xi32>
    %164 = arith.andi %153, %163 : vector<4x128xi1>
    %165 = arith.extui %158 : vector<4x128xi1> to vector<4x128xi32>
    %cst_29 = arith.constant dense<0> : vector<4xi32>
    %166 = vector.multi_reduction <add>, %165, %cst_29 [1] : vector<4x128xi32> to vector<4xi32>
    %167 = vector.shape_cast %166 : vector<4xi32> to vector<4x1xi32>
    %cst_30 = arith.constant dense<0> : vector<1xi32>
    %168 = vector.multi_reduction <add>, %167, %cst_30 [0] : vector<4x1xi32> to vector<1xi32>
    %169 = vector.shape_cast %168 : vector<1xi32> to vector<1x1xi32>
    %170 = arith.extui %161 : vector<4x128xi1> to vector<4x128xi32>
    %cst_31 = arith.constant dense<0> : vector<4xi32>
    %171 = vector.multi_reduction <add>, %170, %cst_31 [1] : vector<4x128xi32> to vector<4xi32>
    %172 = vector.shape_cast %171 : vector<4xi32> to vector<4x1xi32>
    %cst_32 = arith.constant dense<0> : vector<1xi32>
    %173 = vector.multi_reduction <add>, %172, %cst_32 [0] : vector<4x1xi32> to vector<1xi32>
    %174 = vector.shape_cast %173 : vector<1xi32> to vector<1x1xi32>
    %175 = arith.addi %169, %174 : vector<1x1xi32>
    %176 = arith.extui %164 : vector<4x128xi1> to vector<4x128xi32>
    %cst_33 = arith.constant dense<0> : vector<4xi32>
    %177 = vector.multi_reduction <add>, %176, %cst_33 [1] : vector<4x128xi32> to vector<4xi32>
    %178 = vector.shape_cast %177 : vector<4xi32> to vector<4x1xi32>
    %cst_34 = arith.constant dense<0> : vector<1xi32>
    %179 = vector.multi_reduction <add>, %178, %cst_34 [0] : vector<4x1xi32> to vector<1xi32>
    %180 = vector.shape_cast %179 : vector<1xi32> to vector<1x1xi32>
    %181 = arith.addi %175, %180 : vector<1x1xi32>
    %182 = arith.cmpi sge, %148, %169 : vector<1x1xi32>
    %183 = arith.cmpi sge, %148, %175 : vector<1x1xi32>
    %184 = arith.cmpi sge, %148, %181 : vector<1x1xi32>
    %185 = arith.extui %182 : vector<1x1xi1> to vector<1x1xi32>
    %186 = arith.extui %183 : vector<1x1xi1> to vector<1x1xi32>
    %187 = arith.addi %185, %186 : vector<1x1xi32>
    %188 = arith.extui %184 : vector<1x1xi1> to vector<1x1xi32>
    %189 = arith.addi %187, %188 : vector<1x1xi32>
    %c24_i32 = arith.constant 24 : i32
    %190 = vector.broadcast %c24_i32 : i32 to vector<1x1xi32>
    %191 = arith.shli %189, %190 : vector<1x1xi32>
    %192 = arith.ori %143, %191 : vector<1x1xi32>
    %c0_i32_35 = arith.constant 0 : i32
    %193 = vector.broadcast %c0_i32_35 : i32 to vector<1x1xi32>
    %194 = arith.select %182, %169, %193 : vector<1x1xi1>, vector<1x1xi32>
    %195 = arith.select %183, %175, %194 : vector<1x1xi1>, vector<1x1xi32>
    %196 = arith.select %184, %181, %195 : vector<1x1xi1>, vector<1x1xi32>
    %197 = arith.subi %148, %196 : vector<1x1xi32>
    %c24_i32_36 = arith.constant 24 : i32
    %198 = vector.broadcast %c24_i32_36 : i32 to vector<1x1xi32>
    %199 = arith.shli %189, %198 : vector<1x1xi32>
    %200 = vector.broadcast %199 : vector<1x1xi32> to vector<4x128xi32>
    %201 = arith.cmpi eq, %155, %200 : vector<4x128xi32>
    %202 = arith.andi %153, %201 : vector<4x128xi1>
    %c12582912_i32 = arith.constant 12582912 : i32
    %203 = vector.broadcast %c12582912_i32 : i32 to vector<4x128xi32>
    %204 = arith.andi %3, %203 : vector<4x128xi32>
    %c0_i32_37 = arith.constant 0 : i32
    %205 = vector.broadcast %c0_i32_37 : i32 to vector<4x128xi32>
    %206 = arith.cmpi eq, %204, %205 : vector<4x128xi32>
    %207 = arith.andi %202, %206 : vector<4x128xi1>
    %c4194304_i32 = arith.constant 4194304 : i32
    %208 = vector.broadcast %c4194304_i32 : i32 to vector<4x128xi32>
    %209 = arith.cmpi eq, %204, %208 : vector<4x128xi32>
    %210 = arith.andi %202, %209 : vector<4x128xi1>
    %c8388608_i32 = arith.constant 8388608 : i32
    %211 = vector.broadcast %c8388608_i32 : i32 to vector<4x128xi32>
    %212 = arith.cmpi eq, %204, %211 : vector<4x128xi32>
    %213 = arith.andi %202, %212 : vector<4x128xi1>
    %214 = arith.extui %207 : vector<4x128xi1> to vector<4x128xi32>
    %cst_38 = arith.constant dense<0> : vector<4xi32>
    %215 = vector.multi_reduction <add>, %214, %cst_38 [1] : vector<4x128xi32> to vector<4xi32>
    %216 = vector.shape_cast %215 : vector<4xi32> to vector<4x1xi32>
    %cst_39 = arith.constant dense<0> : vector<1xi32>
    %217 = vector.multi_reduction <add>, %216, %cst_39 [0] : vector<4x1xi32> to vector<1xi32>
    %218 = vector.shape_cast %217 : vector<1xi32> to vector<1x1xi32>
    %219 = arith.extui %210 : vector<4x128xi1> to vector<4x128xi32>
    %cst_40 = arith.constant dense<0> : vector<4xi32>
    %220 = vector.multi_reduction <add>, %219, %cst_40 [1] : vector<4x128xi32> to vector<4xi32>
    %221 = vector.shape_cast %220 : vector<4xi32> to vector<4x1xi32>
    %cst_41 = arith.constant dense<0> : vector<1xi32>
    %222 = vector.multi_reduction <add>, %221, %cst_41 [0] : vector<4x1xi32> to vector<1xi32>
    %223 = vector.shape_cast %222 : vector<1xi32> to vector<1x1xi32>
    %224 = arith.addi %218, %223 : vector<1x1xi32>
    %225 = arith.extui %213 : vector<4x128xi1> to vector<4x128xi32>
    %cst_42 = arith.constant dense<0> : vector<4xi32>
    %226 = vector.multi_reduction <add>, %225, %cst_42 [1] : vector<4x128xi32> to vector<4xi32>
    %227 = vector.shape_cast %226 : vector<4xi32> to vector<4x1xi32>
    %cst_43 = arith.constant dense<0> : vector<1xi32>
    %228 = vector.multi_reduction <add>, %227, %cst_43 [0] : vector<4x1xi32> to vector<1xi32>
    %229 = vector.shape_cast %228 : vector<1xi32> to vector<1x1xi32>
    %230 = arith.addi %224, %229 : vector<1x1xi32>
    %231 = arith.cmpi sge, %197, %218 : vector<1x1xi32>
    %232 = arith.cmpi sge, %197, %224 : vector<1x1xi32>
    %233 = arith.cmpi sge, %197, %230 : vector<1x1xi32>
    %234 = arith.extui %231 : vector<1x1xi1> to vector<1x1xi32>
    %235 = arith.extui %232 : vector<1x1xi1> to vector<1x1xi32>
    %236 = arith.addi %234, %235 : vector<1x1xi32>
    %237 = arith.extui %233 : vector<1x1xi1> to vector<1x1xi32>
    %238 = arith.addi %236, %237 : vector<1x1xi32>
    %c22_i32 = arith.constant 22 : i32
    %239 = vector.broadcast %c22_i32 : i32 to vector<1x1xi32>
    %240 = arith.shli %238, %239 : vector<1x1xi32>
    %241 = arith.ori %192, %240 : vector<1x1xi32>
    %c0_i32_44 = arith.constant 0 : i32
    %242 = vector.broadcast %c0_i32_44 : i32 to vector<1x1xi32>
    %243 = arith.select %231, %218, %242 : vector<1x1xi1>, vector<1x1xi32>
    %244 = arith.select %232, %224, %243 : vector<1x1xi1>, vector<1x1xi32>
    %245 = arith.select %233, %230, %244 : vector<1x1xi1>, vector<1x1xi32>
    %246 = arith.subi %197, %245 : vector<1x1xi32>
    %c22_i32_45 = arith.constant 22 : i32
    %247 = vector.broadcast %c22_i32_45 : i32 to vector<1x1xi32>
    %248 = arith.shli %238, %247 : vector<1x1xi32>
    %249 = vector.broadcast %248 : vector<1x1xi32> to vector<4x128xi32>
    %250 = arith.cmpi eq, %204, %249 : vector<4x128xi32>
    %251 = arith.andi %202, %250 : vector<4x128xi1>
    %c3145728_i32 = arith.constant 3145728 : i32
    %252 = vector.broadcast %c3145728_i32 : i32 to vector<4x128xi32>
    %253 = arith.andi %3, %252 : vector<4x128xi32>
    %c0_i32_46 = arith.constant 0 : i32
    %254 = vector.broadcast %c0_i32_46 : i32 to vector<4x128xi32>
    %255 = arith.cmpi eq, %253, %254 : vector<4x128xi32>
    %256 = arith.andi %251, %255 : vector<4x128xi1>
    %c1048576_i32 = arith.constant 1048576 : i32
    %257 = vector.broadcast %c1048576_i32 : i32 to vector<4x128xi32>
    %258 = arith.cmpi eq, %253, %257 : vector<4x128xi32>
    %259 = arith.andi %251, %258 : vector<4x128xi1>
    %c2097152_i32 = arith.constant 2097152 : i32
    %260 = vector.broadcast %c2097152_i32 : i32 to vector<4x128xi32>
    %261 = arith.cmpi eq, %253, %260 : vector<4x128xi32>
    %262 = arith.andi %251, %261 : vector<4x128xi1>
    %263 = arith.extui %256 : vector<4x128xi1> to vector<4x128xi32>
    %cst_47 = arith.constant dense<0> : vector<4xi32>
    %264 = vector.multi_reduction <add>, %263, %cst_47 [1] : vector<4x128xi32> to vector<4xi32>
    %265 = vector.shape_cast %264 : vector<4xi32> to vector<4x1xi32>
    %cst_48 = arith.constant dense<0> : vector<1xi32>
    %266 = vector.multi_reduction <add>, %265, %cst_48 [0] : vector<4x1xi32> to vector<1xi32>
    %267 = vector.shape_cast %266 : vector<1xi32> to vector<1x1xi32>
    %268 = arith.extui %259 : vector<4x128xi1> to vector<4x128xi32>
    %cst_49 = arith.constant dense<0> : vector<4xi32>
    %269 = vector.multi_reduction <add>, %268, %cst_49 [1] : vector<4x128xi32> to vector<4xi32>
    %270 = vector.shape_cast %269 : vector<4xi32> to vector<4x1xi32>
    %cst_50 = arith.constant dense<0> : vector<1xi32>
    %271 = vector.multi_reduction <add>, %270, %cst_50 [0] : vector<4x1xi32> to vector<1xi32>
    %272 = vector.shape_cast %271 : vector<1xi32> to vector<1x1xi32>
    %273 = arith.addi %267, %272 : vector<1x1xi32>
    %274 = arith.extui %262 : vector<4x128xi1> to vector<4x128xi32>
    %cst_51 = arith.constant dense<0> : vector<4xi32>
    %275 = vector.multi_reduction <add>, %274, %cst_51 [1] : vector<4x128xi32> to vector<4xi32>
    %276 = vector.shape_cast %275 : vector<4xi32> to vector<4x1xi32>
    %cst_52 = arith.constant dense<0> : vector<1xi32>
    %277 = vector.multi_reduction <add>, %276, %cst_52 [0] : vector<4x1xi32> to vector<1xi32>
    %278 = vector.shape_cast %277 : vector<1xi32> to vector<1x1xi32>
    %279 = arith.addi %273, %278 : vector<1x1xi32>
    %280 = arith.cmpi sge, %246, %267 : vector<1x1xi32>
    %281 = arith.cmpi sge, %246, %273 : vector<1x1xi32>
    %282 = arith.cmpi sge, %246, %279 : vector<1x1xi32>
    %283 = arith.extui %280 : vector<1x1xi1> to vector<1x1xi32>
    %284 = arith.extui %281 : vector<1x1xi1> to vector<1x1xi32>
    %285 = arith.addi %283, %284 : vector<1x1xi32>
    %286 = arith.extui %282 : vector<1x1xi1> to vector<1x1xi32>
    %287 = arith.addi %285, %286 : vector<1x1xi32>
    %c20_i32 = arith.constant 20 : i32
    %288 = vector.broadcast %c20_i32 : i32 to vector<1x1xi32>
    %289 = arith.shli %287, %288 : vector<1x1xi32>
    %290 = arith.ori %241, %289 : vector<1x1xi32>
    %c0_i32_53 = arith.constant 0 : i32
    %291 = vector.broadcast %c0_i32_53 : i32 to vector<1x1xi32>
    %292 = arith.select %280, %267, %291 : vector<1x1xi1>, vector<1x1xi32>
    %293 = arith.select %281, %273, %292 : vector<1x1xi1>, vector<1x1xi32>
    %294 = arith.select %282, %279, %293 : vector<1x1xi1>, vector<1x1xi32>
    %295 = arith.subi %246, %294 : vector<1x1xi32>
    %c20_i32_54 = arith.constant 20 : i32
    %296 = vector.broadcast %c20_i32_54 : i32 to vector<1x1xi32>
    %297 = arith.shli %287, %296 : vector<1x1xi32>
    %298 = vector.broadcast %297 : vector<1x1xi32> to vector<4x128xi32>
    %299 = arith.cmpi eq, %253, %298 : vector<4x128xi32>
    %300 = arith.andi %251, %299 : vector<4x128xi1>
    %c786432_i32 = arith.constant 786432 : i32
    %301 = vector.broadcast %c786432_i32 : i32 to vector<4x128xi32>
    %302 = arith.andi %3, %301 : vector<4x128xi32>
    %c0_i32_55 = arith.constant 0 : i32
    %303 = vector.broadcast %c0_i32_55 : i32 to vector<4x128xi32>
    %304 = arith.cmpi eq, %302, %303 : vector<4x128xi32>
    %305 = arith.andi %300, %304 : vector<4x128xi1>
    %c262144_i32 = arith.constant 262144 : i32
    %306 = vector.broadcast %c262144_i32 : i32 to vector<4x128xi32>
    %307 = arith.cmpi eq, %302, %306 : vector<4x128xi32>
    %308 = arith.andi %300, %307 : vector<4x128xi1>
    %c524288_i32 = arith.constant 524288 : i32
    %309 = vector.broadcast %c524288_i32 : i32 to vector<4x128xi32>
    %310 = arith.cmpi eq, %302, %309 : vector<4x128xi32>
    %311 = arith.andi %300, %310 : vector<4x128xi1>
    %312 = arith.extui %305 : vector<4x128xi1> to vector<4x128xi32>
    %cst_56 = arith.constant dense<0> : vector<4xi32>
    %313 = vector.multi_reduction <add>, %312, %cst_56 [1] : vector<4x128xi32> to vector<4xi32>
    %314 = vector.shape_cast %313 : vector<4xi32> to vector<4x1xi32>
    %cst_57 = arith.constant dense<0> : vector<1xi32>
    %315 = vector.multi_reduction <add>, %314, %cst_57 [0] : vector<4x1xi32> to vector<1xi32>
    %316 = vector.shape_cast %315 : vector<1xi32> to vector<1x1xi32>
    %317 = arith.extui %308 : vector<4x128xi1> to vector<4x128xi32>
    %cst_58 = arith.constant dense<0> : vector<4xi32>
    %318 = vector.multi_reduction <add>, %317, %cst_58 [1] : vector<4x128xi32> to vector<4xi32>
    %319 = vector.shape_cast %318 : vector<4xi32> to vector<4x1xi32>
    %cst_59 = arith.constant dense<0> : vector<1xi32>
    %320 = vector.multi_reduction <add>, %319, %cst_59 [0] : vector<4x1xi32> to vector<1xi32>
    %321 = vector.shape_cast %320 : vector<1xi32> to vector<1x1xi32>
    %322 = arith.addi %316, %321 : vector<1x1xi32>
    %323 = arith.extui %311 : vector<4x128xi1> to vector<4x128xi32>
    %cst_60 = arith.constant dense<0> : vector<4xi32>
    %324 = vector.multi_reduction <add>, %323, %cst_60 [1] : vector<4x128xi32> to vector<4xi32>
    %325 = vector.shape_cast %324 : vector<4xi32> to vector<4x1xi32>
    %cst_61 = arith.constant dense<0> : vector<1xi32>
    %326 = vector.multi_reduction <add>, %325, %cst_61 [0] : vector<4x1xi32> to vector<1xi32>
    %327 = vector.shape_cast %326 : vector<1xi32> to vector<1x1xi32>
    %328 = arith.addi %322, %327 : vector<1x1xi32>
    %329 = arith.cmpi sge, %295, %316 : vector<1x1xi32>
    %330 = arith.cmpi sge, %295, %322 : vector<1x1xi32>
    %331 = arith.cmpi sge, %295, %328 : vector<1x1xi32>
    %332 = arith.extui %329 : vector<1x1xi1> to vector<1x1xi32>
    %333 = arith.extui %330 : vector<1x1xi1> to vector<1x1xi32>
    %334 = arith.addi %332, %333 : vector<1x1xi32>
    %335 = arith.extui %331 : vector<1x1xi1> to vector<1x1xi32>
    %336 = arith.addi %334, %335 : vector<1x1xi32>
    %c18_i32 = arith.constant 18 : i32
    %337 = vector.broadcast %c18_i32 : i32 to vector<1x1xi32>
    %338 = arith.shli %336, %337 : vector<1x1xi32>
    %339 = arith.ori %290, %338 : vector<1x1xi32>
    %c0_i32_62 = arith.constant 0 : i32
    %340 = vector.broadcast %c0_i32_62 : i32 to vector<1x1xi32>
    %341 = arith.select %329, %316, %340 : vector<1x1xi1>, vector<1x1xi32>
    %342 = arith.select %330, %322, %341 : vector<1x1xi1>, vector<1x1xi32>
    %343 = arith.select %331, %328, %342 : vector<1x1xi1>, vector<1x1xi32>
    %344 = arith.subi %295, %343 : vector<1x1xi32>
    %c18_i32_63 = arith.constant 18 : i32
    %345 = vector.broadcast %c18_i32_63 : i32 to vector<1x1xi32>
    %346 = arith.shli %336, %345 : vector<1x1xi32>
    %347 = vector.broadcast %346 : vector<1x1xi32> to vector<4x128xi32>
    %348 = arith.cmpi eq, %302, %347 : vector<4x128xi32>
    %349 = arith.andi %300, %348 : vector<4x128xi1>
    %c196608_i32 = arith.constant 196608 : i32
    %350 = vector.broadcast %c196608_i32 : i32 to vector<4x128xi32>
    %351 = arith.andi %3, %350 : vector<4x128xi32>
    %c0_i32_64 = arith.constant 0 : i32
    %352 = vector.broadcast %c0_i32_64 : i32 to vector<4x128xi32>
    %353 = arith.cmpi eq, %351, %352 : vector<4x128xi32>
    %354 = arith.andi %349, %353 : vector<4x128xi1>
    %c65536_i32 = arith.constant 65536 : i32
    %355 = vector.broadcast %c65536_i32 : i32 to vector<4x128xi32>
    %356 = arith.cmpi eq, %351, %355 : vector<4x128xi32>
    %357 = arith.andi %349, %356 : vector<4x128xi1>
    %c131072_i32 = arith.constant 131072 : i32
    %358 = vector.broadcast %c131072_i32 : i32 to vector<4x128xi32>
    %359 = arith.cmpi eq, %351, %358 : vector<4x128xi32>
    %360 = arith.andi %349, %359 : vector<4x128xi1>
    %361 = arith.extui %354 : vector<4x128xi1> to vector<4x128xi32>
    %cst_65 = arith.constant dense<0> : vector<4xi32>
    %362 = vector.multi_reduction <add>, %361, %cst_65 [1] : vector<4x128xi32> to vector<4xi32>
    %363 = vector.shape_cast %362 : vector<4xi32> to vector<4x1xi32>
    %cst_66 = arith.constant dense<0> : vector<1xi32>
    %364 = vector.multi_reduction <add>, %363, %cst_66 [0] : vector<4x1xi32> to vector<1xi32>
    %365 = vector.shape_cast %364 : vector<1xi32> to vector<1x1xi32>
    %366 = arith.extui %357 : vector<4x128xi1> to vector<4x128xi32>
    %cst_67 = arith.constant dense<0> : vector<4xi32>
    %367 = vector.multi_reduction <add>, %366, %cst_67 [1] : vector<4x128xi32> to vector<4xi32>
    %368 = vector.shape_cast %367 : vector<4xi32> to vector<4x1xi32>
    %cst_68 = arith.constant dense<0> : vector<1xi32>
    %369 = vector.multi_reduction <add>, %368, %cst_68 [0] : vector<4x1xi32> to vector<1xi32>
    %370 = vector.shape_cast %369 : vector<1xi32> to vector<1x1xi32>
    %371 = arith.addi %365, %370 : vector<1x1xi32>
    %372 = arith.extui %360 : vector<4x128xi1> to vector<4x128xi32>
    %cst_69 = arith.constant dense<0> : vector<4xi32>
    %373 = vector.multi_reduction <add>, %372, %cst_69 [1] : vector<4x128xi32> to vector<4xi32>
    %374 = vector.shape_cast %373 : vector<4xi32> to vector<4x1xi32>
    %cst_70 = arith.constant dense<0> : vector<1xi32>
    %375 = vector.multi_reduction <add>, %374, %cst_70 [0] : vector<4x1xi32> to vector<1xi32>
    %376 = vector.shape_cast %375 : vector<1xi32> to vector<1x1xi32>
    %377 = arith.addi %371, %376 : vector<1x1xi32>
    %378 = arith.cmpi sge, %344, %365 : vector<1x1xi32>
    %379 = arith.cmpi sge, %344, %371 : vector<1x1xi32>
    %380 = arith.cmpi sge, %344, %377 : vector<1x1xi32>
    %381 = arith.extui %378 : vector<1x1xi1> to vector<1x1xi32>
    %382 = arith.extui %379 : vector<1x1xi1> to vector<1x1xi32>
    %383 = arith.addi %381, %382 : vector<1x1xi32>
    %384 = arith.extui %380 : vector<1x1xi1> to vector<1x1xi32>
    %385 = arith.addi %383, %384 : vector<1x1xi32>
    %c16_i32 = arith.constant 16 : i32
    %386 = vector.broadcast %c16_i32 : i32 to vector<1x1xi32>
    %387 = arith.shli %385, %386 : vector<1x1xi32>
    %388 = arith.ori %339, %387 : vector<1x1xi32>
    %c0_i32_71 = arith.constant 0 : i32
    %389 = vector.broadcast %c0_i32_71 : i32 to vector<1x1xi32>
    %390 = arith.select %378, %365, %389 : vector<1x1xi1>, vector<1x1xi32>
    %391 = arith.select %379, %371, %390 : vector<1x1xi1>, vector<1x1xi32>
    %392 = arith.select %380, %377, %391 : vector<1x1xi1>, vector<1x1xi32>
    %393 = arith.subi %344, %392 : vector<1x1xi32>
    %c16_i32_72 = arith.constant 16 : i32
    %394 = vector.broadcast %c16_i32_72 : i32 to vector<1x1xi32>
    %395 = arith.shli %385, %394 : vector<1x1xi32>
    %396 = vector.broadcast %395 : vector<1x1xi32> to vector<4x128xi32>
    %397 = arith.cmpi eq, %351, %396 : vector<4x128xi32>
    %398 = arith.andi %349, %397 : vector<4x128xi1>
    %c49152_i32 = arith.constant 49152 : i32
    %399 = vector.broadcast %c49152_i32 : i32 to vector<4x128xi32>
    %400 = arith.andi %3, %399 : vector<4x128xi32>
    %c0_i32_73 = arith.constant 0 : i32
    %401 = vector.broadcast %c0_i32_73 : i32 to vector<4x128xi32>
    %402 = arith.cmpi eq, %400, %401 : vector<4x128xi32>
    %403 = arith.andi %398, %402 : vector<4x128xi1>
    %c16384_i32 = arith.constant 16384 : i32
    %404 = vector.broadcast %c16384_i32 : i32 to vector<4x128xi32>
    %405 = arith.cmpi eq, %400, %404 : vector<4x128xi32>
    %406 = arith.andi %398, %405 : vector<4x128xi1>
    %c32768_i32 = arith.constant 32768 : i32
    %407 = vector.broadcast %c32768_i32 : i32 to vector<4x128xi32>
    %408 = arith.cmpi eq, %400, %407 : vector<4x128xi32>
    %409 = arith.andi %398, %408 : vector<4x128xi1>
    %410 = arith.extui %403 : vector<4x128xi1> to vector<4x128xi32>
    %cst_74 = arith.constant dense<0> : vector<4xi32>
    %411 = vector.multi_reduction <add>, %410, %cst_74 [1] : vector<4x128xi32> to vector<4xi32>
    %412 = vector.shape_cast %411 : vector<4xi32> to vector<4x1xi32>
    %cst_75 = arith.constant dense<0> : vector<1xi32>
    %413 = vector.multi_reduction <add>, %412, %cst_75 [0] : vector<4x1xi32> to vector<1xi32>
    %414 = vector.shape_cast %413 : vector<1xi32> to vector<1x1xi32>
    %415 = arith.extui %406 : vector<4x128xi1> to vector<4x128xi32>
    %cst_76 = arith.constant dense<0> : vector<4xi32>
    %416 = vector.multi_reduction <add>, %415, %cst_76 [1] : vector<4x128xi32> to vector<4xi32>
    %417 = vector.shape_cast %416 : vector<4xi32> to vector<4x1xi32>
    %cst_77 = arith.constant dense<0> : vector<1xi32>
    %418 = vector.multi_reduction <add>, %417, %cst_77 [0] : vector<4x1xi32> to vector<1xi32>
    %419 = vector.shape_cast %418 : vector<1xi32> to vector<1x1xi32>
    %420 = arith.addi %414, %419 : vector<1x1xi32>
    %421 = arith.extui %409 : vector<4x128xi1> to vector<4x128xi32>
    %cst_78 = arith.constant dense<0> : vector<4xi32>
    %422 = vector.multi_reduction <add>, %421, %cst_78 [1] : vector<4x128xi32> to vector<4xi32>
    %423 = vector.shape_cast %422 : vector<4xi32> to vector<4x1xi32>
    %cst_79 = arith.constant dense<0> : vector<1xi32>
    %424 = vector.multi_reduction <add>, %423, %cst_79 [0] : vector<4x1xi32> to vector<1xi32>
    %425 = vector.shape_cast %424 : vector<1xi32> to vector<1x1xi32>
    %426 = arith.addi %420, %425 : vector<1x1xi32>
    %427 = arith.cmpi sge, %393, %414 : vector<1x1xi32>
    %428 = arith.cmpi sge, %393, %420 : vector<1x1xi32>
    %429 = arith.cmpi sge, %393, %426 : vector<1x1xi32>
    %430 = arith.extui %427 : vector<1x1xi1> to vector<1x1xi32>
    %431 = arith.extui %428 : vector<1x1xi1> to vector<1x1xi32>
    %432 = arith.addi %430, %431 : vector<1x1xi32>
    %433 = arith.extui %429 : vector<1x1xi1> to vector<1x1xi32>
    %434 = arith.addi %432, %433 : vector<1x1xi32>
    %c14_i32 = arith.constant 14 : i32
    %435 = vector.broadcast %c14_i32 : i32 to vector<1x1xi32>
    %436 = arith.shli %434, %435 : vector<1x1xi32>
    %437 = arith.ori %388, %436 : vector<1x1xi32>
    %c0_i32_80 = arith.constant 0 : i32
    %438 = vector.broadcast %c0_i32_80 : i32 to vector<1x1xi32>
    %439 = arith.select %427, %414, %438 : vector<1x1xi1>, vector<1x1xi32>
    %440 = arith.select %428, %420, %439 : vector<1x1xi1>, vector<1x1xi32>
    %441 = arith.select %429, %426, %440 : vector<1x1xi1>, vector<1x1xi32>
    %442 = arith.subi %393, %441 : vector<1x1xi32>
    %c14_i32_81 = arith.constant 14 : i32
    %443 = vector.broadcast %c14_i32_81 : i32 to vector<1x1xi32>
    %444 = arith.shli %434, %443 : vector<1x1xi32>
    %445 = vector.broadcast %444 : vector<1x1xi32> to vector<4x128xi32>
    %446 = arith.cmpi eq, %400, %445 : vector<4x128xi32>
    %447 = arith.andi %398, %446 : vector<4x128xi1>
    %c12288_i32 = arith.constant 12288 : i32
    %448 = vector.broadcast %c12288_i32 : i32 to vector<4x128xi32>
    %449 = arith.andi %3, %448 : vector<4x128xi32>
    %c0_i32_82 = arith.constant 0 : i32
    %450 = vector.broadcast %c0_i32_82 : i32 to vector<4x128xi32>
    %451 = arith.cmpi eq, %449, %450 : vector<4x128xi32>
    %452 = arith.andi %447, %451 : vector<4x128xi1>
    %c4096_i32 = arith.constant 4096 : i32
    %453 = vector.broadcast %c4096_i32 : i32 to vector<4x128xi32>
    %454 = arith.cmpi eq, %449, %453 : vector<4x128xi32>
    %455 = arith.andi %447, %454 : vector<4x128xi1>
    %c8192_i32 = arith.constant 8192 : i32
    %456 = vector.broadcast %c8192_i32 : i32 to vector<4x128xi32>
    %457 = arith.cmpi eq, %449, %456 : vector<4x128xi32>
    %458 = arith.andi %447, %457 : vector<4x128xi1>
    %459 = arith.extui %452 : vector<4x128xi1> to vector<4x128xi32>
    %cst_83 = arith.constant dense<0> : vector<4xi32>
    %460 = vector.multi_reduction <add>, %459, %cst_83 [1] : vector<4x128xi32> to vector<4xi32>
    %461 = vector.shape_cast %460 : vector<4xi32> to vector<4x1xi32>
    %cst_84 = arith.constant dense<0> : vector<1xi32>
    %462 = vector.multi_reduction <add>, %461, %cst_84 [0] : vector<4x1xi32> to vector<1xi32>
    %463 = vector.shape_cast %462 : vector<1xi32> to vector<1x1xi32>
    %464 = arith.extui %455 : vector<4x128xi1> to vector<4x128xi32>
    %cst_85 = arith.constant dense<0> : vector<4xi32>
    %465 = vector.multi_reduction <add>, %464, %cst_85 [1] : vector<4x128xi32> to vector<4xi32>
    %466 = vector.shape_cast %465 : vector<4xi32> to vector<4x1xi32>
    %cst_86 = arith.constant dense<0> : vector<1xi32>
    %467 = vector.multi_reduction <add>, %466, %cst_86 [0] : vector<4x1xi32> to vector<1xi32>
    %468 = vector.shape_cast %467 : vector<1xi32> to vector<1x1xi32>
    %469 = arith.addi %463, %468 : vector<1x1xi32>
    %470 = arith.extui %458 : vector<4x128xi1> to vector<4x128xi32>
    %cst_87 = arith.constant dense<0> : vector<4xi32>
    %471 = vector.multi_reduction <add>, %470, %cst_87 [1] : vector<4x128xi32> to vector<4xi32>
    %472 = vector.shape_cast %471 : vector<4xi32> to vector<4x1xi32>
    %cst_88 = arith.constant dense<0> : vector<1xi32>
    %473 = vector.multi_reduction <add>, %472, %cst_88 [0] : vector<4x1xi32> to vector<1xi32>
    %474 = vector.shape_cast %473 : vector<1xi32> to vector<1x1xi32>
    %475 = arith.addi %469, %474 : vector<1x1xi32>
    %476 = arith.cmpi sge, %442, %463 : vector<1x1xi32>
    %477 = arith.cmpi sge, %442, %469 : vector<1x1xi32>
    %478 = arith.cmpi sge, %442, %475 : vector<1x1xi32>
    %479 = arith.extui %476 : vector<1x1xi1> to vector<1x1xi32>
    %480 = arith.extui %477 : vector<1x1xi1> to vector<1x1xi32>
    %481 = arith.addi %479, %480 : vector<1x1xi32>
    %482 = arith.extui %478 : vector<1x1xi1> to vector<1x1xi32>
    %483 = arith.addi %481, %482 : vector<1x1xi32>
    %c12_i32 = arith.constant 12 : i32
    %484 = vector.broadcast %c12_i32 : i32 to vector<1x1xi32>
    %485 = arith.shli %483, %484 : vector<1x1xi32>
    %486 = arith.ori %437, %485 : vector<1x1xi32>
    %c0_i32_89 = arith.constant 0 : i32
    %487 = vector.broadcast %c0_i32_89 : i32 to vector<1x1xi32>
    %488 = arith.select %476, %463, %487 : vector<1x1xi1>, vector<1x1xi32>
    %489 = arith.select %477, %469, %488 : vector<1x1xi1>, vector<1x1xi32>
    %490 = arith.select %478, %475, %489 : vector<1x1xi1>, vector<1x1xi32>
    %491 = arith.subi %442, %490 : vector<1x1xi32>
    %c12_i32_90 = arith.constant 12 : i32
    %492 = vector.broadcast %c12_i32_90 : i32 to vector<1x1xi32>
    %493 = arith.shli %483, %492 : vector<1x1xi32>
    %494 = vector.broadcast %493 : vector<1x1xi32> to vector<4x128xi32>
    %495 = arith.cmpi eq, %449, %494 : vector<4x128xi32>
    %496 = arith.andi %447, %495 : vector<4x128xi1>
    %c3072_i32 = arith.constant 3072 : i32
    %497 = vector.broadcast %c3072_i32 : i32 to vector<4x128xi32>
    %498 = arith.andi %3, %497 : vector<4x128xi32>
    %c0_i32_91 = arith.constant 0 : i32
    %499 = vector.broadcast %c0_i32_91 : i32 to vector<4x128xi32>
    %500 = arith.cmpi eq, %498, %499 : vector<4x128xi32>
    %501 = arith.andi %496, %500 : vector<4x128xi1>
    %c1024_i32 = arith.constant 1024 : i32
    %502 = vector.broadcast %c1024_i32 : i32 to vector<4x128xi32>
    %503 = arith.cmpi eq, %498, %502 : vector<4x128xi32>
    %504 = arith.andi %496, %503 : vector<4x128xi1>
    %c2048_i32 = arith.constant 2048 : i32
    %505 = vector.broadcast %c2048_i32 : i32 to vector<4x128xi32>
    %506 = arith.cmpi eq, %498, %505 : vector<4x128xi32>
    %507 = arith.andi %496, %506 : vector<4x128xi1>
    %508 = arith.extui %501 : vector<4x128xi1> to vector<4x128xi32>
    %cst_92 = arith.constant dense<0> : vector<4xi32>
    %509 = vector.multi_reduction <add>, %508, %cst_92 [1] : vector<4x128xi32> to vector<4xi32>
    %510 = vector.shape_cast %509 : vector<4xi32> to vector<4x1xi32>
    %cst_93 = arith.constant dense<0> : vector<1xi32>
    %511 = vector.multi_reduction <add>, %510, %cst_93 [0] : vector<4x1xi32> to vector<1xi32>
    %512 = vector.shape_cast %511 : vector<1xi32> to vector<1x1xi32>
    %513 = arith.extui %504 : vector<4x128xi1> to vector<4x128xi32>
    %cst_94 = arith.constant dense<0> : vector<4xi32>
    %514 = vector.multi_reduction <add>, %513, %cst_94 [1] : vector<4x128xi32> to vector<4xi32>
    %515 = vector.shape_cast %514 : vector<4xi32> to vector<4x1xi32>
    %cst_95 = arith.constant dense<0> : vector<1xi32>
    %516 = vector.multi_reduction <add>, %515, %cst_95 [0] : vector<4x1xi32> to vector<1xi32>
    %517 = vector.shape_cast %516 : vector<1xi32> to vector<1x1xi32>
    %518 = arith.addi %512, %517 : vector<1x1xi32>
    %519 = arith.extui %507 : vector<4x128xi1> to vector<4x128xi32>
    %cst_96 = arith.constant dense<0> : vector<4xi32>
    %520 = vector.multi_reduction <add>, %519, %cst_96 [1] : vector<4x128xi32> to vector<4xi32>
    %521 = vector.shape_cast %520 : vector<4xi32> to vector<4x1xi32>
    %cst_97 = arith.constant dense<0> : vector<1xi32>
    %522 = vector.multi_reduction <add>, %521, %cst_97 [0] : vector<4x1xi32> to vector<1xi32>
    %523 = vector.shape_cast %522 : vector<1xi32> to vector<1x1xi32>
    %524 = arith.addi %518, %523 : vector<1x1xi32>
    %525 = arith.cmpi sge, %491, %512 : vector<1x1xi32>
    %526 = arith.cmpi sge, %491, %518 : vector<1x1xi32>
    %527 = arith.cmpi sge, %491, %524 : vector<1x1xi32>
    %528 = arith.extui %525 : vector<1x1xi1> to vector<1x1xi32>
    %529 = arith.extui %526 : vector<1x1xi1> to vector<1x1xi32>
    %530 = arith.addi %528, %529 : vector<1x1xi32>
    %531 = arith.extui %527 : vector<1x1xi1> to vector<1x1xi32>
    %532 = arith.addi %530, %531 : vector<1x1xi32>
    %c10_i32 = arith.constant 10 : i32
    %533 = vector.broadcast %c10_i32 : i32 to vector<1x1xi32>
    %534 = arith.shli %532, %533 : vector<1x1xi32>
    %535 = arith.ori %486, %534 : vector<1x1xi32>
    %c0_i32_98 = arith.constant 0 : i32
    %536 = vector.broadcast %c0_i32_98 : i32 to vector<1x1xi32>
    %537 = arith.select %525, %512, %536 : vector<1x1xi1>, vector<1x1xi32>
    %538 = arith.select %526, %518, %537 : vector<1x1xi1>, vector<1x1xi32>
    %539 = arith.select %527, %524, %538 : vector<1x1xi1>, vector<1x1xi32>
    %540 = arith.subi %491, %539 : vector<1x1xi32>
    %c10_i32_99 = arith.constant 10 : i32
    %541 = vector.broadcast %c10_i32_99 : i32 to vector<1x1xi32>
    %542 = arith.shli %532, %541 : vector<1x1xi32>
    %543 = vector.broadcast %542 : vector<1x1xi32> to vector<4x128xi32>
    %544 = arith.cmpi eq, %498, %543 : vector<4x128xi32>
    %545 = arith.andi %496, %544 : vector<4x128xi1>
    %c768_i32 = arith.constant 768 : i32
    %546 = vector.broadcast %c768_i32 : i32 to vector<4x128xi32>
    %547 = arith.andi %3, %546 : vector<4x128xi32>
    %c0_i32_100 = arith.constant 0 : i32
    %548 = vector.broadcast %c0_i32_100 : i32 to vector<4x128xi32>
    %549 = arith.cmpi eq, %547, %548 : vector<4x128xi32>
    %550 = arith.andi %545, %549 : vector<4x128xi1>
    %c256_i32 = arith.constant 256 : i32
    %551 = vector.broadcast %c256_i32 : i32 to vector<4x128xi32>
    %552 = arith.cmpi eq, %547, %551 : vector<4x128xi32>
    %553 = arith.andi %545, %552 : vector<4x128xi1>
    %c512_i32 = arith.constant 512 : i32
    %554 = vector.broadcast %c512_i32 : i32 to vector<4x128xi32>
    %555 = arith.cmpi eq, %547, %554 : vector<4x128xi32>
    %556 = arith.andi %545, %555 : vector<4x128xi1>
    %557 = arith.extui %550 : vector<4x128xi1> to vector<4x128xi32>
    %cst_101 = arith.constant dense<0> : vector<4xi32>
    %558 = vector.multi_reduction <add>, %557, %cst_101 [1] : vector<4x128xi32> to vector<4xi32>
    %559 = vector.shape_cast %558 : vector<4xi32> to vector<4x1xi32>
    %cst_102 = arith.constant dense<0> : vector<1xi32>
    %560 = vector.multi_reduction <add>, %559, %cst_102 [0] : vector<4x1xi32> to vector<1xi32>
    %561 = vector.shape_cast %560 : vector<1xi32> to vector<1x1xi32>
    %562 = arith.extui %553 : vector<4x128xi1> to vector<4x128xi32>
    %cst_103 = arith.constant dense<0> : vector<4xi32>
    %563 = vector.multi_reduction <add>, %562, %cst_103 [1] : vector<4x128xi32> to vector<4xi32>
    %564 = vector.shape_cast %563 : vector<4xi32> to vector<4x1xi32>
    %cst_104 = arith.constant dense<0> : vector<1xi32>
    %565 = vector.multi_reduction <add>, %564, %cst_104 [0] : vector<4x1xi32> to vector<1xi32>
    %566 = vector.shape_cast %565 : vector<1xi32> to vector<1x1xi32>
    %567 = arith.addi %561, %566 : vector<1x1xi32>
    %568 = arith.extui %556 : vector<4x128xi1> to vector<4x128xi32>
    %cst_105 = arith.constant dense<0> : vector<4xi32>
    %569 = vector.multi_reduction <add>, %568, %cst_105 [1] : vector<4x128xi32> to vector<4xi32>
    %570 = vector.shape_cast %569 : vector<4xi32> to vector<4x1xi32>
    %cst_106 = arith.constant dense<0> : vector<1xi32>
    %571 = vector.multi_reduction <add>, %570, %cst_106 [0] : vector<4x1xi32> to vector<1xi32>
    %572 = vector.shape_cast %571 : vector<1xi32> to vector<1x1xi32>
    %573 = arith.addi %567, %572 : vector<1x1xi32>
    %574 = arith.cmpi sge, %540, %561 : vector<1x1xi32>
    %575 = arith.cmpi sge, %540, %567 : vector<1x1xi32>
    %576 = arith.cmpi sge, %540, %573 : vector<1x1xi32>
    %577 = arith.extui %574 : vector<1x1xi1> to vector<1x1xi32>
    %578 = arith.extui %575 : vector<1x1xi1> to vector<1x1xi32>
    %579 = arith.addi %577, %578 : vector<1x1xi32>
    %580 = arith.extui %576 : vector<1x1xi1> to vector<1x1xi32>
    %581 = arith.addi %579, %580 : vector<1x1xi32>
    %c8_i32 = arith.constant 8 : i32
    %582 = vector.broadcast %c8_i32 : i32 to vector<1x1xi32>
    %583 = arith.shli %581, %582 : vector<1x1xi32>
    %584 = arith.ori %535, %583 : vector<1x1xi32>
    %c0_i32_107 = arith.constant 0 : i32
    %585 = vector.broadcast %c0_i32_107 : i32 to vector<1x1xi32>
    %586 = arith.select %574, %561, %585 : vector<1x1xi1>, vector<1x1xi32>
    %587 = arith.select %575, %567, %586 : vector<1x1xi1>, vector<1x1xi32>
    %588 = arith.select %576, %573, %587 : vector<1x1xi1>, vector<1x1xi32>
    %589 = arith.subi %540, %588 : vector<1x1xi32>
    %c8_i32_108 = arith.constant 8 : i32
    %590 = vector.broadcast %c8_i32_108 : i32 to vector<1x1xi32>
    %591 = arith.shli %581, %590 : vector<1x1xi32>
    %592 = vector.broadcast %591 : vector<1x1xi32> to vector<4x128xi32>
    %593 = arith.cmpi eq, %547, %592 : vector<4x128xi32>
    %594 = arith.andi %545, %593 : vector<4x128xi1>
    %c192_i32 = arith.constant 192 : i32
    %595 = vector.broadcast %c192_i32 : i32 to vector<4x128xi32>
    %596 = arith.andi %3, %595 : vector<4x128xi32>
    %c0_i32_109 = arith.constant 0 : i32
    %597 = vector.broadcast %c0_i32_109 : i32 to vector<4x128xi32>
    %598 = arith.cmpi eq, %596, %597 : vector<4x128xi32>
    %599 = arith.andi %594, %598 : vector<4x128xi1>
    %c64_i32 = arith.constant 64 : i32
    %600 = vector.broadcast %c64_i32 : i32 to vector<4x128xi32>
    %601 = arith.cmpi eq, %596, %600 : vector<4x128xi32>
    %602 = arith.andi %594, %601 : vector<4x128xi1>
    %c128_i32 = arith.constant 128 : i32
    %603 = vector.broadcast %c128_i32 : i32 to vector<4x128xi32>
    %604 = arith.cmpi eq, %596, %603 : vector<4x128xi32>
    %605 = arith.andi %594, %604 : vector<4x128xi1>
    %606 = arith.extui %599 : vector<4x128xi1> to vector<4x128xi32>
    %cst_110 = arith.constant dense<0> : vector<4xi32>
    %607 = vector.multi_reduction <add>, %606, %cst_110 [1] : vector<4x128xi32> to vector<4xi32>
    %608 = vector.shape_cast %607 : vector<4xi32> to vector<4x1xi32>
    %cst_111 = arith.constant dense<0> : vector<1xi32>
    %609 = vector.multi_reduction <add>, %608, %cst_111 [0] : vector<4x1xi32> to vector<1xi32>
    %610 = vector.shape_cast %609 : vector<1xi32> to vector<1x1xi32>
    %611 = arith.extui %602 : vector<4x128xi1> to vector<4x128xi32>
    %cst_112 = arith.constant dense<0> : vector<4xi32>
    %612 = vector.multi_reduction <add>, %611, %cst_112 [1] : vector<4x128xi32> to vector<4xi32>
    %613 = vector.shape_cast %612 : vector<4xi32> to vector<4x1xi32>
    %cst_113 = arith.constant dense<0> : vector<1xi32>
    %614 = vector.multi_reduction <add>, %613, %cst_113 [0] : vector<4x1xi32> to vector<1xi32>
    %615 = vector.shape_cast %614 : vector<1xi32> to vector<1x1xi32>
    %616 = arith.addi %610, %615 : vector<1x1xi32>
    %617 = arith.extui %605 : vector<4x128xi1> to vector<4x128xi32>
    %cst_114 = arith.constant dense<0> : vector<4xi32>
    %618 = vector.multi_reduction <add>, %617, %cst_114 [1] : vector<4x128xi32> to vector<4xi32>
    %619 = vector.shape_cast %618 : vector<4xi32> to vector<4x1xi32>
    %cst_115 = arith.constant dense<0> : vector<1xi32>
    %620 = vector.multi_reduction <add>, %619, %cst_115 [0] : vector<4x1xi32> to vector<1xi32>
    %621 = vector.shape_cast %620 : vector<1xi32> to vector<1x1xi32>
    %622 = arith.addi %616, %621 : vector<1x1xi32>
    %623 = arith.cmpi sge, %589, %610 : vector<1x1xi32>
    %624 = arith.cmpi sge, %589, %616 : vector<1x1xi32>
    %625 = arith.cmpi sge, %589, %622 : vector<1x1xi32>
    %626 = arith.extui %623 : vector<1x1xi1> to vector<1x1xi32>
    %627 = arith.extui %624 : vector<1x1xi1> to vector<1x1xi32>
    %628 = arith.addi %626, %627 : vector<1x1xi32>
    %629 = arith.extui %625 : vector<1x1xi1> to vector<1x1xi32>
    %630 = arith.addi %628, %629 : vector<1x1xi32>
    %c6_i32 = arith.constant 6 : i32
    %631 = vector.broadcast %c6_i32 : i32 to vector<1x1xi32>
    %632 = arith.shli %630, %631 : vector<1x1xi32>
    %633 = arith.ori %584, %632 : vector<1x1xi32>
    %c0_i32_116 = arith.constant 0 : i32
    %634 = vector.broadcast %c0_i32_116 : i32 to vector<1x1xi32>
    %635 = arith.select %623, %610, %634 : vector<1x1xi1>, vector<1x1xi32>
    %636 = arith.select %624, %616, %635 : vector<1x1xi1>, vector<1x1xi32>
    %637 = arith.select %625, %622, %636 : vector<1x1xi1>, vector<1x1xi32>
    %638 = arith.subi %589, %637 : vector<1x1xi32>
    %c6_i32_117 = arith.constant 6 : i32
    %639 = vector.broadcast %c6_i32_117 : i32 to vector<1x1xi32>
    %640 = arith.shli %630, %639 : vector<1x1xi32>
    %641 = vector.broadcast %640 : vector<1x1xi32> to vector<4x128xi32>
    %642 = arith.cmpi eq, %596, %641 : vector<4x128xi32>
    %643 = arith.andi %594, %642 : vector<4x128xi1>
    %c48_i32 = arith.constant 48 : i32
    %644 = vector.broadcast %c48_i32 : i32 to vector<4x128xi32>
    %645 = arith.andi %3, %644 : vector<4x128xi32>
    %c0_i32_118 = arith.constant 0 : i32
    %646 = vector.broadcast %c0_i32_118 : i32 to vector<4x128xi32>
    %647 = arith.cmpi eq, %645, %646 : vector<4x128xi32>
    %648 = arith.andi %643, %647 : vector<4x128xi1>
    %c16_i32_119 = arith.constant 16 : i32
    %649 = vector.broadcast %c16_i32_119 : i32 to vector<4x128xi32>
    %650 = arith.cmpi eq, %645, %649 : vector<4x128xi32>
    %651 = arith.andi %643, %650 : vector<4x128xi1>
    %c32_i32 = arith.constant 32 : i32
    %652 = vector.broadcast %c32_i32 : i32 to vector<4x128xi32>
    %653 = arith.cmpi eq, %645, %652 : vector<4x128xi32>
    %654 = arith.andi %643, %653 : vector<4x128xi1>
    %655 = arith.extui %648 : vector<4x128xi1> to vector<4x128xi32>
    %cst_120 = arith.constant dense<0> : vector<4xi32>
    %656 = vector.multi_reduction <add>, %655, %cst_120 [1] : vector<4x128xi32> to vector<4xi32>
    %657 = vector.shape_cast %656 : vector<4xi32> to vector<4x1xi32>
    %cst_121 = arith.constant dense<0> : vector<1xi32>
    %658 = vector.multi_reduction <add>, %657, %cst_121 [0] : vector<4x1xi32> to vector<1xi32>
    %659 = vector.shape_cast %658 : vector<1xi32> to vector<1x1xi32>
    %660 = arith.extui %651 : vector<4x128xi1> to vector<4x128xi32>
    %cst_122 = arith.constant dense<0> : vector<4xi32>
    %661 = vector.multi_reduction <add>, %660, %cst_122 [1] : vector<4x128xi32> to vector<4xi32>
    %662 = vector.shape_cast %661 : vector<4xi32> to vector<4x1xi32>
    %cst_123 = arith.constant dense<0> : vector<1xi32>
    %663 = vector.multi_reduction <add>, %662, %cst_123 [0] : vector<4x1xi32> to vector<1xi32>
    %664 = vector.shape_cast %663 : vector<1xi32> to vector<1x1xi32>
    %665 = arith.addi %659, %664 : vector<1x1xi32>
    %666 = arith.extui %654 : vector<4x128xi1> to vector<4x128xi32>
    %cst_124 = arith.constant dense<0> : vector<4xi32>
    %667 = vector.multi_reduction <add>, %666, %cst_124 [1] : vector<4x128xi32> to vector<4xi32>
    %668 = vector.shape_cast %667 : vector<4xi32> to vector<4x1xi32>
    %cst_125 = arith.constant dense<0> : vector<1xi32>
    %669 = vector.multi_reduction <add>, %668, %cst_125 [0] : vector<4x1xi32> to vector<1xi32>
    %670 = vector.shape_cast %669 : vector<1xi32> to vector<1x1xi32>
    %671 = arith.addi %665, %670 : vector<1x1xi32>
    %672 = arith.cmpi sge, %638, %659 : vector<1x1xi32>
    %673 = arith.cmpi sge, %638, %665 : vector<1x1xi32>
    %674 = arith.cmpi sge, %638, %671 : vector<1x1xi32>
    %675 = arith.extui %672 : vector<1x1xi1> to vector<1x1xi32>
    %676 = arith.extui %673 : vector<1x1xi1> to vector<1x1xi32>
    %677 = arith.addi %675, %676 : vector<1x1xi32>
    %678 = arith.extui %674 : vector<1x1xi1> to vector<1x1xi32>
    %679 = arith.addi %677, %678 : vector<1x1xi32>
    %c4_i32 = arith.constant 4 : i32
    %680 = vector.broadcast %c4_i32 : i32 to vector<1x1xi32>
    %681 = arith.shli %679, %680 : vector<1x1xi32>
    %682 = arith.ori %633, %681 : vector<1x1xi32>
    %c0_i32_126 = arith.constant 0 : i32
    %683 = vector.broadcast %c0_i32_126 : i32 to vector<1x1xi32>
    %684 = arith.select %672, %659, %683 : vector<1x1xi1>, vector<1x1xi32>
    %685 = arith.select %673, %665, %684 : vector<1x1xi1>, vector<1x1xi32>
    %686 = arith.select %674, %671, %685 : vector<1x1xi1>, vector<1x1xi32>
    %687 = arith.subi %638, %686 : vector<1x1xi32>
    %c4_i32_127 = arith.constant 4 : i32
    %688 = vector.broadcast %c4_i32_127 : i32 to vector<1x1xi32>
    %689 = arith.shli %679, %688 : vector<1x1xi32>
    %690 = vector.broadcast %689 : vector<1x1xi32> to vector<4x128xi32>
    %691 = arith.cmpi eq, %645, %690 : vector<4x128xi32>
    %692 = arith.andi %643, %691 : vector<4x128xi1>
    %c12_i32_128 = arith.constant 12 : i32
    %693 = vector.broadcast %c12_i32_128 : i32 to vector<4x128xi32>
    %694 = arith.andi %3, %693 : vector<4x128xi32>
    %c0_i32_129 = arith.constant 0 : i32
    %695 = vector.broadcast %c0_i32_129 : i32 to vector<4x128xi32>
    %696 = arith.cmpi eq, %694, %695 : vector<4x128xi32>
    %697 = arith.andi %692, %696 : vector<4x128xi1>
    %c4_i32_130 = arith.constant 4 : i32
    %698 = vector.broadcast %c4_i32_130 : i32 to vector<4x128xi32>
    %699 = arith.cmpi eq, %694, %698 : vector<4x128xi32>
    %700 = arith.andi %692, %699 : vector<4x128xi1>
    %c8_i32_131 = arith.constant 8 : i32
    %701 = vector.broadcast %c8_i32_131 : i32 to vector<4x128xi32>
    %702 = arith.cmpi eq, %694, %701 : vector<4x128xi32>
    %703 = arith.andi %692, %702 : vector<4x128xi1>
    %704 = arith.extui %697 : vector<4x128xi1> to vector<4x128xi32>
    %cst_132 = arith.constant dense<0> : vector<4xi32>
    %705 = vector.multi_reduction <add>, %704, %cst_132 [1] : vector<4x128xi32> to vector<4xi32>
    %706 = vector.shape_cast %705 : vector<4xi32> to vector<4x1xi32>
    %cst_133 = arith.constant dense<0> : vector<1xi32>
    %707 = vector.multi_reduction <add>, %706, %cst_133 [0] : vector<4x1xi32> to vector<1xi32>
    %708 = vector.shape_cast %707 : vector<1xi32> to vector<1x1xi32>
    %709 = arith.extui %700 : vector<4x128xi1> to vector<4x128xi32>
    %cst_134 = arith.constant dense<0> : vector<4xi32>
    %710 = vector.multi_reduction <add>, %709, %cst_134 [1] : vector<4x128xi32> to vector<4xi32>
    %711 = vector.shape_cast %710 : vector<4xi32> to vector<4x1xi32>
    %cst_135 = arith.constant dense<0> : vector<1xi32>
    %712 = vector.multi_reduction <add>, %711, %cst_135 [0] : vector<4x1xi32> to vector<1xi32>
    %713 = vector.shape_cast %712 : vector<1xi32> to vector<1x1xi32>
    %714 = arith.addi %708, %713 : vector<1x1xi32>
    %715 = arith.extui %703 : vector<4x128xi1> to vector<4x128xi32>
    %cst_136 = arith.constant dense<0> : vector<4xi32>
    %716 = vector.multi_reduction <add>, %715, %cst_136 [1] : vector<4x128xi32> to vector<4xi32>
    %717 = vector.shape_cast %716 : vector<4xi32> to vector<4x1xi32>
    %cst_137 = arith.constant dense<0> : vector<1xi32>
    %718 = vector.multi_reduction <add>, %717, %cst_137 [0] : vector<4x1xi32> to vector<1xi32>
    %719 = vector.shape_cast %718 : vector<1xi32> to vector<1x1xi32>
    %720 = arith.addi %714, %719 : vector<1x1xi32>
    %721 = arith.cmpi sge, %687, %708 : vector<1x1xi32>
    %722 = arith.cmpi sge, %687, %714 : vector<1x1xi32>
    %723 = arith.cmpi sge, %687, %720 : vector<1x1xi32>
    %724 = arith.extui %721 : vector<1x1xi1> to vector<1x1xi32>
    %725 = arith.extui %722 : vector<1x1xi1> to vector<1x1xi32>
    %726 = arith.addi %724, %725 : vector<1x1xi32>
    %727 = arith.extui %723 : vector<1x1xi1> to vector<1x1xi32>
    %728 = arith.addi %726, %727 : vector<1x1xi32>
    %c2_i32 = arith.constant 2 : i32
    %729 = vector.broadcast %c2_i32 : i32 to vector<1x1xi32>
    %730 = arith.shli %728, %729 : vector<1x1xi32>
    %731 = arith.ori %682, %730 : vector<1x1xi32>
    %c0_i32_138 = arith.constant 0 : i32
    %732 = vector.broadcast %c0_i32_138 : i32 to vector<1x1xi32>
    %733 = arith.select %721, %708, %732 : vector<1x1xi1>, vector<1x1xi32>
    %734 = arith.select %722, %714, %733 : vector<1x1xi1>, vector<1x1xi32>
    %735 = arith.select %723, %720, %734 : vector<1x1xi1>, vector<1x1xi32>
    %736 = arith.subi %687, %735 : vector<1x1xi32>
    %c2_i32_139 = arith.constant 2 : i32
    %737 = vector.broadcast %c2_i32_139 : i32 to vector<1x1xi32>
    %738 = arith.shli %728, %737 : vector<1x1xi32>
    %739 = vector.broadcast %738 : vector<1x1xi32> to vector<4x128xi32>
    %740 = arith.cmpi eq, %694, %739 : vector<4x128xi32>
    %741 = arith.andi %692, %740 : vector<4x128xi1>
    %c3_i32 = arith.constant 3 : i32
    %742 = vector.broadcast %c3_i32 : i32 to vector<4x128xi32>
    %743 = arith.andi %3, %742 : vector<4x128xi32>
    %c0_i32_140 = arith.constant 0 : i32
    %744 = vector.broadcast %c0_i32_140 : i32 to vector<4x128xi32>
    %745 = arith.cmpi eq, %743, %744 : vector<4x128xi32>
    %746 = arith.andi %741, %745 : vector<4x128xi1>
    %c1_i32 = arith.constant 1 : i32
    %747 = vector.broadcast %c1_i32 : i32 to vector<4x128xi32>
    %748 = arith.cmpi eq, %743, %747 : vector<4x128xi32>
    %749 = arith.andi %741, %748 : vector<4x128xi1>
    %c2_i32_141 = arith.constant 2 : i32
    %750 = vector.broadcast %c2_i32_141 : i32 to vector<4x128xi32>
    %751 = arith.cmpi eq, %743, %750 : vector<4x128xi32>
    %752 = arith.andi %741, %751 : vector<4x128xi1>
    %753 = arith.extui %746 : vector<4x128xi1> to vector<4x128xi32>
    %cst_142 = arith.constant dense<0> : vector<4xi32>
    %754 = vector.multi_reduction <add>, %753, %cst_142 [1] : vector<4x128xi32> to vector<4xi32>
    %755 = vector.shape_cast %754 : vector<4xi32> to vector<4x1xi32>
    %cst_143 = arith.constant dense<0> : vector<1xi32>
    %756 = vector.multi_reduction <add>, %755, %cst_143 [0] : vector<4x1xi32> to vector<1xi32>
    %757 = vector.shape_cast %756 : vector<1xi32> to vector<1x1xi32>
    %758 = arith.extui %749 : vector<4x128xi1> to vector<4x128xi32>
    %cst_144 = arith.constant dense<0> : vector<4xi32>
    %759 = vector.multi_reduction <add>, %758, %cst_144 [1] : vector<4x128xi32> to vector<4xi32>
    %760 = vector.shape_cast %759 : vector<4xi32> to vector<4x1xi32>
    %cst_145 = arith.constant dense<0> : vector<1xi32>
    %761 = vector.multi_reduction <add>, %760, %cst_145 [0] : vector<4x1xi32> to vector<1xi32>
    %762 = vector.shape_cast %761 : vector<1xi32> to vector<1x1xi32>
    %763 = arith.addi %757, %762 : vector<1x1xi32>
    %764 = arith.extui %752 : vector<4x128xi1> to vector<4x128xi32>
    %cst_146 = arith.constant dense<0> : vector<4xi32>
    %765 = vector.multi_reduction <add>, %764, %cst_146 [1] : vector<4x128xi32> to vector<4xi32>
    %766 = vector.shape_cast %765 : vector<4xi32> to vector<4x1xi32>
    %cst_147 = arith.constant dense<0> : vector<1xi32>
    %767 = vector.multi_reduction <add>, %766, %cst_147 [0] : vector<4x1xi32> to vector<1xi32>
    %768 = vector.shape_cast %767 : vector<1xi32> to vector<1x1xi32>
    %769 = arith.addi %763, %768 : vector<1x1xi32>
    %770 = arith.cmpi sge, %736, %757 : vector<1x1xi32>
    %771 = arith.cmpi sge, %736, %763 : vector<1x1xi32>
    %772 = arith.cmpi sge, %736, %769 : vector<1x1xi32>
    %773 = arith.extui %770 : vector<1x1xi1> to vector<1x1xi32>
    %774 = arith.extui %771 : vector<1x1xi1> to vector<1x1xi32>
    %775 = arith.addi %773, %774 : vector<1x1xi32>
    %776 = arith.extui %772 : vector<1x1xi1> to vector<1x1xi32>
    %777 = arith.addi %775, %776 : vector<1x1xi32>
    %c0_i32_148 = arith.constant 0 : i32
    %778 = vector.broadcast %c0_i32_148 : i32 to vector<1x1xi32>
    %779 = arith.shli %777, %778 : vector<1x1xi32>
    %780 = arith.ori %731, %779 : vector<1x1xi32>
    %c0_i32_149 = arith.constant 0 : i32
    %781 = vector.broadcast %c0_i32_149 : i32 to vector<1x1xi32>
    %782 = arith.select %770, %757, %781 : vector<1x1xi1>, vector<1x1xi32>
    %783 = arith.select %771, %763, %782 : vector<1x1xi1>, vector<1x1xi32>
    %784 = arith.select %772, %769, %783 : vector<1x1xi1>, vector<1x1xi32>
    %785 = arith.subi %736, %784 : vector<1x1xi32>
    %c0_i32_150 = arith.constant 0 : i32
    %786 = vector.broadcast %c0_i32_150 : i32 to vector<1x1xi32>
    %787 = arith.shli %777, %786 : vector<1x1xi32>
    %788 = vector.broadcast %787 : vector<1x1xi32> to vector<4x128xi32>
    %789 = arith.cmpi eq, %743, %788 : vector<4x128xi32>
    %790 = arith.andi %741, %789 : vector<4x128xi1>
    %791 = tpu.iota {dimensions = array<i32: 0>} : vector<4x128xi32>
    %792 = tpu.iota {dimensions = array<i32: 1>} : vector<4x128xi32>
    %c128_i32_151 = arith.constant 128 : i32
    %793 = vector.broadcast %c128_i32_151 : i32 to vector<4x128xi32>
    %794 = arith.muli %791, %793 : vector<4x128xi32>
    %795 = arith.addi %794, %792 : vector<4x128xi32>
    %c0_i32_152 = arith.constant 0 : i32
    %796 = vector.broadcast %c0_i32_152 : i32 to vector<1x1xi32>
    %c768_i32_153 = arith.constant 768 : i32
    %797 = vector.broadcast %c768_i32_153 : i32 to vector<4x128xi32>
    %798 = arith.andi %795, %797 : vector<4x128xi32>
    %c0_i32_154 = arith.constant 0 : i32
    %799 = vector.broadcast %c0_i32_154 : i32 to vector<4x128xi32>
    %800 = arith.cmpi eq, %798, %799 : vector<4x128xi32>
    %801 = arith.andi %790, %800 : vector<4x128xi1>
    %c256_i32_155 = arith.constant 256 : i32
    %802 = vector.broadcast %c256_i32_155 : i32 to vector<4x128xi32>
    %803 = arith.cmpi eq, %798, %802 : vector<4x128xi32>
    %804 = arith.andi %790, %803 : vector<4x128xi1>
    %c512_i32_156 = arith.constant 512 : i32
    %805 = vector.broadcast %c512_i32_156 : i32 to vector<4x128xi32>
    %806 = arith.cmpi eq, %798, %805 : vector<4x128xi32>
    %807 = arith.andi %790, %806 : vector<4x128xi1>
    %808 = arith.extui %801 : vector<4x128xi1> to vector<4x128xi32>
    %cst_157 = arith.constant dense<0> : vector<4xi32>
    %809 = vector.multi_reduction <add>, %808, %cst_157 [1] : vector<4x128xi32> to vector<4xi32>
    %810 = vector.shape_cast %809 : vector<4xi32> to vector<4x1xi32>
    %cst_158 = arith.constant dense<0> : vector<1xi32>
    %811 = vector.multi_reduction <add>, %810, %cst_158 [0] : vector<4x1xi32> to vector<1xi32>
    %812 = vector.shape_cast %811 : vector<1xi32> to vector<1x1xi32>
    %813 = arith.extui %804 : vector<4x128xi1> to vector<4x128xi32>
    %cst_159 = arith.constant dense<0> : vector<4xi32>
    %814 = vector.multi_reduction <add>, %813, %cst_159 [1] : vector<4x128xi32> to vector<4xi32>
    %815 = vector.shape_cast %814 : vector<4xi32> to vector<4x1xi32>
    %cst_160 = arith.constant dense<0> : vector<1xi32>
    %816 = vector.multi_reduction <add>, %815, %cst_160 [0] : vector<4x1xi32> to vector<1xi32>
    %817 = vector.shape_cast %816 : vector<1xi32> to vector<1x1xi32>
    %818 = arith.addi %812, %817 : vector<1x1xi32>
    %819 = arith.extui %807 : vector<4x128xi1> to vector<4x128xi32>
    %cst_161 = arith.constant dense<0> : vector<4xi32>
    %820 = vector.multi_reduction <add>, %819, %cst_161 [1] : vector<4x128xi32> to vector<4xi32>
    %821 = vector.shape_cast %820 : vector<4xi32> to vector<4x1xi32>
    %cst_162 = arith.constant dense<0> : vector<1xi32>
    %822 = vector.multi_reduction <add>, %821, %cst_162 [0] : vector<4x1xi32> to vector<1xi32>
    %823 = vector.shape_cast %822 : vector<1xi32> to vector<1x1xi32>
    %824 = arith.addi %818, %823 : vector<1x1xi32>
    %825 = arith.cmpi sge, %785, %812 : vector<1x1xi32>
    %826 = arith.cmpi sge, %785, %818 : vector<1x1xi32>
    %827 = arith.cmpi sge, %785, %824 : vector<1x1xi32>
    %828 = arith.extui %825 : vector<1x1xi1> to vector<1x1xi32>
    %829 = arith.extui %826 : vector<1x1xi1> to vector<1x1xi32>
    %830 = arith.addi %828, %829 : vector<1x1xi32>
    %831 = arith.extui %827 : vector<1x1xi1> to vector<1x1xi32>
    %832 = arith.addi %830, %831 : vector<1x1xi32>
    %c8_i32_163 = arith.constant 8 : i32
    %833 = vector.broadcast %c8_i32_163 : i32 to vector<1x1xi32>
    %834 = arith.shli %832, %833 : vector<1x1xi32>
    %835 = arith.ori %796, %834 : vector<1x1xi32>
    %c0_i32_164 = arith.constant 0 : i32
    %836 = vector.broadcast %c0_i32_164 : i32 to vector<1x1xi32>
    %837 = arith.select %825, %812, %836 : vector<1x1xi1>, vector<1x1xi32>
    %838 = arith.select %826, %818, %837 : vector<1x1xi1>, vector<1x1xi32>
    %839 = arith.select %827, %824, %838 : vector<1x1xi1>, vector<1x1xi32>
    %840 = arith.subi %785, %839 : vector<1x1xi32>
    %c8_i32_165 = arith.constant 8 : i32
    %841 = vector.broadcast %c8_i32_165 : i32 to vector<1x1xi32>
    %842 = arith.shli %832, %841 : vector<1x1xi32>
    %843 = vector.broadcast %842 : vector<1x1xi32> to vector<4x128xi32>
    %844 = arith.cmpi eq, %798, %843 : vector<4x128xi32>
    %845 = arith.andi %790, %844 : vector<4x128xi1>
    %c192_i32_166 = arith.constant 192 : i32
    %846 = vector.broadcast %c192_i32_166 : i32 to vector<4x128xi32>
    %847 = arith.andi %795, %846 : vector<4x128xi32>
    %c0_i32_167 = arith.constant 0 : i32
    %848 = vector.broadcast %c0_i32_167 : i32 to vector<4x128xi32>
    %849 = arith.cmpi eq, %847, %848 : vector<4x128xi32>
    %850 = arith.andi %845, %849 : vector<4x128xi1>
    %c64_i32_168 = arith.constant 64 : i32
    %851 = vector.broadcast %c64_i32_168 : i32 to vector<4x128xi32>
    %852 = arith.cmpi eq, %847, %851 : vector<4x128xi32>
    %853 = arith.andi %845, %852 : vector<4x128xi1>
    %c128_i32_169 = arith.constant 128 : i32
    %854 = vector.broadcast %c128_i32_169 : i32 to vector<4x128xi32>
    %855 = arith.cmpi eq, %847, %854 : vector<4x128xi32>
    %856 = arith.andi %845, %855 : vector<4x128xi1>
    %857 = arith.extui %850 : vector<4x128xi1> to vector<4x128xi32>
    %cst_170 = arith.constant dense<0> : vector<4xi32>
    %858 = vector.multi_reduction <add>, %857, %cst_170 [1] : vector<4x128xi32> to vector<4xi32>
    %859 = vector.shape_cast %858 : vector<4xi32> to vector<4x1xi32>
    %cst_171 = arith.constant dense<0> : vector<1xi32>
    %860 = vector.multi_reduction <add>, %859, %cst_171 [0] : vector<4x1xi32> to vector<1xi32>
    %861 = vector.shape_cast %860 : vector<1xi32> to vector<1x1xi32>
    %862 = arith.extui %853 : vector<4x128xi1> to vector<4x128xi32>
    %cst_172 = arith.constant dense<0> : vector<4xi32>
    %863 = vector.multi_reduction <add>, %862, %cst_172 [1] : vector<4x128xi32> to vector<4xi32>
    %864 = vector.shape_cast %863 : vector<4xi32> to vector<4x1xi32>
    %cst_173 = arith.constant dense<0> : vector<1xi32>
    %865 = vector.multi_reduction <add>, %864, %cst_173 [0] : vector<4x1xi32> to vector<1xi32>
    %866 = vector.shape_cast %865 : vector<1xi32> to vector<1x1xi32>
    %867 = arith.addi %861, %866 : vector<1x1xi32>
    %868 = arith.extui %856 : vector<4x128xi1> to vector<4x128xi32>
    %cst_174 = arith.constant dense<0> : vector<4xi32>
    %869 = vector.multi_reduction <add>, %868, %cst_174 [1] : vector<4x128xi32> to vector<4xi32>
    %870 = vector.shape_cast %869 : vector<4xi32> to vector<4x1xi32>
    %cst_175 = arith.constant dense<0> : vector<1xi32>
    %871 = vector.multi_reduction <add>, %870, %cst_175 [0] : vector<4x1xi32> to vector<1xi32>
    %872 = vector.shape_cast %871 : vector<1xi32> to vector<1x1xi32>
    %873 = arith.addi %867, %872 : vector<1x1xi32>
    %874 = arith.cmpi sge, %840, %861 : vector<1x1xi32>
    %875 = arith.cmpi sge, %840, %867 : vector<1x1xi32>
    %876 = arith.cmpi sge, %840, %873 : vector<1x1xi32>
    %877 = arith.extui %874 : vector<1x1xi1> to vector<1x1xi32>
    %878 = arith.extui %875 : vector<1x1xi1> to vector<1x1xi32>
    %879 = arith.addi %877, %878 : vector<1x1xi32>
    %880 = arith.extui %876 : vector<1x1xi1> to vector<1x1xi32>
    %881 = arith.addi %879, %880 : vector<1x1xi32>
    %c6_i32_176 = arith.constant 6 : i32
    %882 = vector.broadcast %c6_i32_176 : i32 to vector<1x1xi32>
    %883 = arith.shli %881, %882 : vector<1x1xi32>
    %884 = arith.ori %835, %883 : vector<1x1xi32>
    %c0_i32_177 = arith.constant 0 : i32
    %885 = vector.broadcast %c0_i32_177 : i32 to vector<1x1xi32>
    %886 = arith.select %874, %861, %885 : vector<1x1xi1>, vector<1x1xi32>
    %887 = arith.select %875, %867, %886 : vector<1x1xi1>, vector<1x1xi32>
    %888 = arith.select %876, %873, %887 : vector<1x1xi1>, vector<1x1xi32>
    %889 = arith.subi %840, %888 : vector<1x1xi32>
    %c6_i32_178 = arith.constant 6 : i32
    %890 = vector.broadcast %c6_i32_178 : i32 to vector<1x1xi32>
    %891 = arith.shli %881, %890 : vector<1x1xi32>
    %892 = vector.broadcast %891 : vector<1x1xi32> to vector<4x128xi32>
    %893 = arith.cmpi eq, %847, %892 : vector<4x128xi32>
    %894 = arith.andi %845, %893 : vector<4x128xi1>
    %c48_i32_179 = arith.constant 48 : i32
    %895 = vector.broadcast %c48_i32_179 : i32 to vector<4x128xi32>
    %896 = arith.andi %795, %895 : vector<4x128xi32>
    %c0_i32_180 = arith.constant 0 : i32
    %897 = vector.broadcast %c0_i32_180 : i32 to vector<4x128xi32>
    %898 = arith.cmpi eq, %896, %897 : vector<4x128xi32>
    %899 = arith.andi %894, %898 : vector<4x128xi1>
    %c16_i32_181 = arith.constant 16 : i32
    %900 = vector.broadcast %c16_i32_181 : i32 to vector<4x128xi32>
    %901 = arith.cmpi eq, %896, %900 : vector<4x128xi32>
    %902 = arith.andi %894, %901 : vector<4x128xi1>
    %c32_i32_182 = arith.constant 32 : i32
    %903 = vector.broadcast %c32_i32_182 : i32 to vector<4x128xi32>
    %904 = arith.cmpi eq, %896, %903 : vector<4x128xi32>
    %905 = arith.andi %894, %904 : vector<4x128xi1>
    %906 = arith.extui %899 : vector<4x128xi1> to vector<4x128xi32>
    %cst_183 = arith.constant dense<0> : vector<4xi32>
    %907 = vector.multi_reduction <add>, %906, %cst_183 [1] : vector<4x128xi32> to vector<4xi32>
    %908 = vector.shape_cast %907 : vector<4xi32> to vector<4x1xi32>
    %cst_184 = arith.constant dense<0> : vector<1xi32>
    %909 = vector.multi_reduction <add>, %908, %cst_184 [0] : vector<4x1xi32> to vector<1xi32>
    %910 = vector.shape_cast %909 : vector<1xi32> to vector<1x1xi32>
    %911 = arith.extui %902 : vector<4x128xi1> to vector<4x128xi32>
    %cst_185 = arith.constant dense<0> : vector<4xi32>
    %912 = vector.multi_reduction <add>, %911, %cst_185 [1] : vector<4x128xi32> to vector<4xi32>
    %913 = vector.shape_cast %912 : vector<4xi32> to vector<4x1xi32>
    %cst_186 = arith.constant dense<0> : vector<1xi32>
    %914 = vector.multi_reduction <add>, %913, %cst_186 [0] : vector<4x1xi32> to vector<1xi32>
    %915 = vector.shape_cast %914 : vector<1xi32> to vector<1x1xi32>
    %916 = arith.addi %910, %915 : vector<1x1xi32>
    %917 = arith.extui %905 : vector<4x128xi1> to vector<4x128xi32>
    %cst_187 = arith.constant dense<0> : vector<4xi32>
    %918 = vector.multi_reduction <add>, %917, %cst_187 [1] : vector<4x128xi32> to vector<4xi32>
    %919 = vector.shape_cast %918 : vector<4xi32> to vector<4x1xi32>
    %cst_188 = arith.constant dense<0> : vector<1xi32>
    %920 = vector.multi_reduction <add>, %919, %cst_188 [0] : vector<4x1xi32> to vector<1xi32>
    %921 = vector.shape_cast %920 : vector<1xi32> to vector<1x1xi32>
    %922 = arith.addi %916, %921 : vector<1x1xi32>
    %923 = arith.cmpi sge, %889, %910 : vector<1x1xi32>
    %924 = arith.cmpi sge, %889, %916 : vector<1x1xi32>
    %925 = arith.cmpi sge, %889, %922 : vector<1x1xi32>
    %926 = arith.extui %923 : vector<1x1xi1> to vector<1x1xi32>
    %927 = arith.extui %924 : vector<1x1xi1> to vector<1x1xi32>
    %928 = arith.addi %926, %927 : vector<1x1xi32>
    %929 = arith.extui %925 : vector<1x1xi1> to vector<1x1xi32>
    %930 = arith.addi %928, %929 : vector<1x1xi32>
    %c4_i32_189 = arith.constant 4 : i32
    %931 = vector.broadcast %c4_i32_189 : i32 to vector<1x1xi32>
    %932 = arith.shli %930, %931 : vector<1x1xi32>
    %933 = arith.ori %884, %932 : vector<1x1xi32>
    %c0_i32_190 = arith.constant 0 : i32
    %934 = vector.broadcast %c0_i32_190 : i32 to vector<1x1xi32>
    %935 = arith.select %923, %910, %934 : vector<1x1xi1>, vector<1x1xi32>
    %936 = arith.select %924, %916, %935 : vector<1x1xi1>, vector<1x1xi32>
    %937 = arith.select %925, %922, %936 : vector<1x1xi1>, vector<1x1xi32>
    %938 = arith.subi %889, %937 : vector<1x1xi32>
    %c4_i32_191 = arith.constant 4 : i32
    %939 = vector.broadcast %c4_i32_191 : i32 to vector<1x1xi32>
    %940 = arith.shli %930, %939 : vector<1x1xi32>
    %941 = vector.broadcast %940 : vector<1x1xi32> to vector<4x128xi32>
    %942 = arith.cmpi eq, %896, %941 : vector<4x128xi32>
    %943 = arith.andi %894, %942 : vector<4x128xi1>
    %c12_i32_192 = arith.constant 12 : i32
    %944 = vector.broadcast %c12_i32_192 : i32 to vector<4x128xi32>
    %945 = arith.andi %795, %944 : vector<4x128xi32>
    %c0_i32_193 = arith.constant 0 : i32
    %946 = vector.broadcast %c0_i32_193 : i32 to vector<4x128xi32>
    %947 = arith.cmpi eq, %945, %946 : vector<4x128xi32>
    %948 = arith.andi %943, %947 : vector<4x128xi1>
    %c4_i32_194 = arith.constant 4 : i32
    %949 = vector.broadcast %c4_i32_194 : i32 to vector<4x128xi32>
    %950 = arith.cmpi eq, %945, %949 : vector<4x128xi32>
    %951 = arith.andi %943, %950 : vector<4x128xi1>
    %c8_i32_195 = arith.constant 8 : i32
    %952 = vector.broadcast %c8_i32_195 : i32 to vector<4x128xi32>
    %953 = arith.cmpi eq, %945, %952 : vector<4x128xi32>
    %954 = arith.andi %943, %953 : vector<4x128xi1>
    %955 = arith.extui %948 : vector<4x128xi1> to vector<4x128xi32>
    %cst_196 = arith.constant dense<0> : vector<4xi32>
    %956 = vector.multi_reduction <add>, %955, %cst_196 [1] : vector<4x128xi32> to vector<4xi32>
    %957 = vector.shape_cast %956 : vector<4xi32> to vector<4x1xi32>
    %cst_197 = arith.constant dense<0> : vector<1xi32>
    %958 = vector.multi_reduction <add>, %957, %cst_197 [0] : vector<4x1xi32> to vector<1xi32>
    %959 = vector.shape_cast %958 : vector<1xi32> to vector<1x1xi32>
    %960 = arith.extui %951 : vector<4x128xi1> to vector<4x128xi32>
    %cst_198 = arith.constant dense<0> : vector<4xi32>
    %961 = vector.multi_reduction <add>, %960, %cst_198 [1] : vector<4x128xi32> to vector<4xi32>
    %962 = vector.shape_cast %961 : vector<4xi32> to vector<4x1xi32>
    %cst_199 = arith.constant dense<0> : vector<1xi32>
    %963 = vector.multi_reduction <add>, %962, %cst_199 [0] : vector<4x1xi32> to vector<1xi32>
    %964 = vector.shape_cast %963 : vector<1xi32> to vector<1x1xi32>
    %965 = arith.addi %959, %964 : vector<1x1xi32>
    %966 = arith.extui %954 : vector<4x128xi1> to vector<4x128xi32>
    %cst_200 = arith.constant dense<0> : vector<4xi32>
    %967 = vector.multi_reduction <add>, %966, %cst_200 [1] : vector<4x128xi32> to vector<4xi32>
    %968 = vector.shape_cast %967 : vector<4xi32> to vector<4x1xi32>
    %cst_201 = arith.constant dense<0> : vector<1xi32>
    %969 = vector.multi_reduction <add>, %968, %cst_201 [0] : vector<4x1xi32> to vector<1xi32>
    %970 = vector.shape_cast %969 : vector<1xi32> to vector<1x1xi32>
    %971 = arith.addi %965, %970 : vector<1x1xi32>
    %972 = arith.cmpi sge, %938, %959 : vector<1x1xi32>
    %973 = arith.cmpi sge, %938, %965 : vector<1x1xi32>
    %974 = arith.cmpi sge, %938, %971 : vector<1x1xi32>
    %975 = arith.extui %972 : vector<1x1xi1> to vector<1x1xi32>
    %976 = arith.extui %973 : vector<1x1xi1> to vector<1x1xi32>
    %977 = arith.addi %975, %976 : vector<1x1xi32>
    %978 = arith.extui %974 : vector<1x1xi1> to vector<1x1xi32>
    %979 = arith.addi %977, %978 : vector<1x1xi32>
    %c2_i32_202 = arith.constant 2 : i32
    %980 = vector.broadcast %c2_i32_202 : i32 to vector<1x1xi32>
    %981 = arith.shli %979, %980 : vector<1x1xi32>
    %982 = arith.ori %933, %981 : vector<1x1xi32>
    %c0_i32_203 = arith.constant 0 : i32
    %983 = vector.broadcast %c0_i32_203 : i32 to vector<1x1xi32>
    %984 = arith.select %972, %959, %983 : vector<1x1xi1>, vector<1x1xi32>
    %985 = arith.select %973, %965, %984 : vector<1x1xi1>, vector<1x1xi32>
    %986 = arith.select %974, %971, %985 : vector<1x1xi1>, vector<1x1xi32>
    %987 = arith.subi %938, %986 : vector<1x1xi32>
    %c2_i32_204 = arith.constant 2 : i32
    %988 = vector.broadcast %c2_i32_204 : i32 to vector<1x1xi32>
    %989 = arith.shli %979, %988 : vector<1x1xi32>
    %990 = vector.broadcast %989 : vector<1x1xi32> to vector<4x128xi32>
    %991 = arith.cmpi eq, %945, %990 : vector<4x128xi32>
    %992 = arith.andi %943, %991 : vector<4x128xi1>
    %c3_i32_205 = arith.constant 3 : i32
    %993 = vector.broadcast %c3_i32_205 : i32 to vector<4x128xi32>
    %994 = arith.andi %795, %993 : vector<4x128xi32>
    %c0_i32_206 = arith.constant 0 : i32
    %995 = vector.broadcast %c0_i32_206 : i32 to vector<4x128xi32>
    %996 = arith.cmpi eq, %994, %995 : vector<4x128xi32>
    %997 = arith.andi %992, %996 : vector<4x128xi1>
    %c1_i32_207 = arith.constant 1 : i32
    %998 = vector.broadcast %c1_i32_207 : i32 to vector<4x128xi32>
    %999 = arith.cmpi eq, %994, %998 : vector<4x128xi32>
    %1000 = arith.andi %992, %999 : vector<4x128xi1>
    %c2_i32_208 = arith.constant 2 : i32
    %1001 = vector.broadcast %c2_i32_208 : i32 to vector<4x128xi32>
    %1002 = arith.cmpi eq, %994, %1001 : vector<4x128xi32>
    %1003 = arith.andi %992, %1002 : vector<4x128xi1>
    %1004 = arith.extui %997 : vector<4x128xi1> to vector<4x128xi32>
    %cst_209 = arith.constant dense<0> : vector<4xi32>
    %1005 = vector.multi_reduction <add>, %1004, %cst_209 [1] : vector<4x128xi32> to vector<4xi32>
    %1006 = vector.shape_cast %1005 : vector<4xi32> to vector<4x1xi32>
    %cst_210 = arith.constant dense<0> : vector<1xi32>
    %1007 = vector.multi_reduction <add>, %1006, %cst_210 [0] : vector<4x1xi32> to vector<1xi32>
    %1008 = vector.shape_cast %1007 : vector<1xi32> to vector<1x1xi32>
    %1009 = arith.extui %1000 : vector<4x128xi1> to vector<4x128xi32>
    %cst_211 = arith.constant dense<0> : vector<4xi32>
    %1010 = vector.multi_reduction <add>, %1009, %cst_211 [1] : vector<4x128xi32> to vector<4xi32>
    %1011 = vector.shape_cast %1010 : vector<4xi32> to vector<4x1xi32>
    %cst_212 = arith.constant dense<0> : vector<1xi32>
    %1012 = vector.multi_reduction <add>, %1011, %cst_212 [0] : vector<4x1xi32> to vector<1xi32>
    %1013 = vector.shape_cast %1012 : vector<1xi32> to vector<1x1xi32>
    %1014 = arith.addi %1008, %1013 : vector<1x1xi32>
    %1015 = arith.extui %1003 : vector<4x128xi1> to vector<4x128xi32>
    %cst_213 = arith.constant dense<0> : vector<4xi32>
    %1016 = vector.multi_reduction <add>, %1015, %cst_213 [1] : vector<4x128xi32> to vector<4xi32>
    %1017 = vector.shape_cast %1016 : vector<4xi32> to vector<4x1xi32>
    %cst_214 = arith.constant dense<0> : vector<1xi32>
    %1018 = vector.multi_reduction <add>, %1017, %cst_214 [0] : vector<4x1xi32> to vector<1xi32>
    %1019 = vector.shape_cast %1018 : vector<1xi32> to vector<1x1xi32>
    %1020 = arith.addi %1014, %1019 : vector<1x1xi32>
    %1021 = arith.cmpi sge, %987, %1008 : vector<1x1xi32>
    %1022 = arith.cmpi sge, %987, %1014 : vector<1x1xi32>
    %1023 = arith.cmpi sge, %987, %1020 : vector<1x1xi32>
    %1024 = arith.extui %1021 : vector<1x1xi1> to vector<1x1xi32>
    %1025 = arith.extui %1022 : vector<1x1xi1> to vector<1x1xi32>
    %1026 = arith.addi %1024, %1025 : vector<1x1xi32>
    %1027 = arith.extui %1023 : vector<1x1xi1> to vector<1x1xi32>
    %1028 = arith.addi %1026, %1027 : vector<1x1xi32>
    %c0_i32_215 = arith.constant 0 : i32
    %1029 = vector.broadcast %c0_i32_215 : i32 to vector<1x1xi32>
    %1030 = arith.shli %1028, %1029 : vector<1x1xi32>
    %1031 = arith.ori %982, %1030 : vector<1x1xi32>
    %1032 = vector.broadcast %1031 : vector<1x1xi32> to vector<4x128xi32>
    %1033 = arith.cmpi slt, %795, %1032 : vector<4x128xi32>
    %1034 = arith.andi %790, %1033 : vector<4x128xi1>
    %1035 = vector.broadcast %780 : vector<1x1xi32> to vector<4x128xi32>
    %1036 = arith.cmpi sge, %3, %1035 : vector<4x128xi32>
    %cst_216 = arith.constant dense<true> : vector<4x128xi1>
    %1037 = arith.xori %1034, %cst_216 : vector<4x128xi1>
    %1038 = arith.andi %1036, %1037 : vector<4x128xi1>
    %1039 = arith.extui %1038 : vector<4x128xi1> to vector<4x128xi32>
    %1040 = arith.sitofp %1039 : vector<4x128xi32> to vector<4x128xf32>
    %c0_217 = arith.constant 0 : index
    %c0_218 = arith.constant 0 : index
    %1041 = vector.load %arg3[%c0_217, %c0_218] : memref<4x128xf32, #tpu.memory_space<vmem>>, vector<4x128xf32>
    tpu.vector_store %arg3[%c0_217, %c0_218], %1040 {strides = array<i32>} : memref<4x128xf32, #tpu.memory_space<vmem>>, vector<4x128xf32>,
    return
  }
  func.func @transform_0(%arg0: i32, %arg1: memref<1xi32, #tpu.memory_space<smem>>) -> (i32, i32, i32) {
    %c0 = arith.constant 0 : index
    %0 = memref.load %arg1[%c0] : memref<1xi32, #tpu.memory_space<smem>>
    %c0_i32 = arith.constant 0 : i32
    %c0_i32_0 = arith.constant 0 : i32
    %c0_i32_1 = arith.constant 0 : i32
    return %0, %c0_i32, %c0_i32_0 : i32, i32, i32
  }
  func.func @transform_1(%arg0: i32, %arg1: memref<1xi32, #tpu.memory_space<smem>>) -> (i32, i32) {
    %c0_i32 = arith.constant 0 : i32
    %c0_i32_0 = arith.constant 0 : i32
    %c0_i32_1 = arith.constant 0 : i32
    return %c0_i32, %c0_i32_0 : i32, i32
  }
}

</mosaic_0001>

<bundles_post_ra>
// kernel: tpu_custom_call.1
= control target key start
LH: loop header
LB: loop body
LE: loop exit
PB: predicated region body
PF: predicated region fallthrough
CT: control target
= control target key end

     0   :  { %8 = vsyncpa [#allocation5], 0  ;;  %s2809_s0 = inlined_call_operand.<no memory space> [shape: s32[1], index: 0, kind: input, shape index: {}]   ;;  %s2810_s1 = inlined_call_operand.hbm [shape: f32[4,4,128], index: 1, kind: input, shape index: {}]   ;;  %s2811_s2 = inlined_call_operand.hbm [shape: f32[4,128], index: 2, kind: output, shape index: {}]  }
   0x1   :  { %9 = vsyncpa [#allocation6], 0  ;;  %s1896_s11 = sshll.u32 %s2809_s0, 6  ;;  %s1949_s15 = smov [#allocation4]  }
   0x2   :  { %s17_s14 = scalar_lea.hbm %s2810_s1, %s1896_s11  ;;  %s19_s16 = sshll.u32 %s1949_s15, 4  ;;  %s20_s16 = int_to_ptr.vmem [resolvable:$true] %s19_s16 }
   0x3   :  { %s1903_s17 = scalar_lea.hbm %s17_s14, 64  ;;  %s1905_s20 = scalar_lea.hbm %s2810_s1, 256 }
   0x4   :  { %p1904_p0 = scmp.ne.s32.totalorder %s17_s14, %s1903_s17  ;;  %p1906_p1 = scmp.lt.s32.totalorder %s17_s14, %s2810_s1 }
   0x5   :  { %p1907_p2 = scmp.lt.s32.totalorder %s1905_s20, %s1903_s17 }
   0x7   :  { %p1908_p3 = por %p1907_p2, %p1906_p1 }
   0x9   :  { %p1909_p4 = pnand %p1908_p3, %p1904_p0 }
   0xb   :  { %1912 = shalt.err (!%p1909_p4)
}
   0xc   :  { %s1913_s0 = scalar_lea.vmem %s20_s16, 64  ;;  %p1918_p6 = scmp.lt.s32.totalorder %s20_s16, %s20_s16 }
   0xd   :  { %p1914_p5 = scmp.ne.s32.totalorder %s20_s16, %s1913_s0  ;;  %p1919_p7 = scmp.lt.s32.totalorder %s1913_s0, %s1913_s0 }
   0xf   :  { %p1920_p8 = por %p1919_p7, %p1918_p6 }
  0x11   :  { %p1921_p9 = pnand %p1920_p8, %p1914_p5 }
  0x13   :  { %1924 = shalt.err (!%p1921_p9)
}
  0x14   :  { %22 = dma.hbm_to_vmem [thread:$0]  %s17_s14, 64, %s20_s16, [#allocation5]  }
  0x15   :  { %1945 = dma.done.wait [#allocation5], 64  }
  0x16   :  { %1946 = vsyncadd [#allocation5], 4294967232  ;;  %v27_v0 = vld [vmem:[#allocation4] sm:$0xf]  ;;  %vm35_vm0 = vcmask 1043456   ;;  %v1950_v3 = vmov 0  }
  0x17   :  { %v1981_v1 = vand.u32 2147483647, %v27_v0  ;;  %s1951_s1 = smov [#allocation7]  }
  0x18   :  { %s1885_s23 = sshll.u32 %s1951_s1, 4  ;;  %s1886_s23 = int_to_ptr.vmem [resolvable:$true] %s1885_s23 }
  0x19   :  { %v1984_v2 = vand.u32 3221225472, %v1981_v1  ;;  %s1925_s24 = scalar_lea.vmem %s1886_s23, 64  ;;  %p1930_p11 = scmp.lt.s32.totalorder %s1886_s23, %s1886_s23 }
  0x1a   :  { %p1926_p10 = scmp.ne.s32.totalorder %s1886_s23, %s1925_s24  ;;  %p1931_p12 = scmp.lt.s32.totalorder %s1925_s24, %s1925_s24 }
  0x1b   :  { %vm31_vm1 = vcmp.eq.s32.totalorder %v1984_v2, 0  ;;  %vm32_vm2 = vcmp.eq.s32.totalorder %v1984_v2, 1073741824  ;;  %vm33_vm3 = vcmp.eq.s32.totalorder %v1984_v2, 2147483648 }
  0x1c   :  { %v34_v4 = vsel %vm31_vm1, 1, %v1950_v3  ;;  %v56_v5 = vsel %vm32_vm2, 1, %v1950_v3  ;;  %v78_v6 = vsel %vm33_vm3, 1, %v1950_v3  ;;  %p1932_p13 = por %p1931_p12, %p1930_p11 }
  0x1d   :  { %v36_v7 = vsel %vm35_vm0, %v34_v4, 0  ;;  %v57_v8 = vsel %vm35_vm0, %v56_v5, 0  ;;  %v79_v13 = vsel %vm35_vm0, %v78_v6, 0 }
  0x1e   :  { %v38_v9 = vshrl.u32 %v36_v7, 16  ;;  %v37_v10 = vand.u32 65535, %v36_v7  ;;  %v59_v11 = vshrl.u32 %v57_v8, 16  ;;  %v58_v12 = vand.u32 65535, %v57_v8  ;;  %p1933_p0 = pnand %p1932_p13, %p1926_p10 }
  0x1f   :  { %v81_v18 = vshrl.u32 %v79_v13, 16  ;;  %v80_v19 = vand.u32 65535, %v79_v13  ;;  %v2001_v7 = vand.u32 805306368, %v1981_v1 }
  0x20   :  { %v40_v14 = vcvt.s32.f32 %v38_v9  ;;  %v39_v15 = vcvt.s32.f32 %v37_v10  ;;  %v61_v16 = vcvt.s32.f32 %v59_v11  ;;  %v60_v17 = vcvt.s32.f32 %v58_v12 }
  0x21   :  { %v83_v20 = vcvt.s32.f32 %v81_v18  ;;  %v82_v21 = vcvt.s32.f32 %v80_v19  ;;  %vm117_vm7 = vcmp.eq.s32.totalorder %v2001_v7, 268435456  ;;  %vm115_vm8 = vcmp.eq.s32.totalorder %v2001_v7, 0 }
  0x22   :  { %43 = vadd.xlane.f32.xlu0 %v40_v14  ;;  %41 = vadd.xlane.f32.xlu1 %v39_v15  ;;  %vm119_vm10 = vcmp.eq.s32.totalorder %v2001_v7, 536870912 }
  0x26   :  { %64 = vadd.xlane.f32.xlu0 %v61_v16  ;;  %62 = vadd.xlane.f32.xlu1 %v60_v17 }
  0x2a   :  { %86 = vadd.xlane.f32.xlu0 %v83_v20  ;;  %84 = vadd.xlane.f32.xlu1 %v82_v21 }
  0xab   :  { %v44_v22 = vpop.xlane.xlu0 %43  ;;  %v42_v23 = vpop.xlane.xlu1 %41 }
  0xac   :  { %v46_v24 = vcvt.f32.s32 %v44_v22  ;;  %v45_v25 = vcvt.f32.s32 %v42_v23 }
  0xae   :  { %v47_v26 = vshll.u32 %v46_v24, 16 }
  0xaf   :  { %v65_v27 = vpop.xlane.xlu0 %64  ;;  %v63_v28 = vpop.xlane.xlu1 %62 }
  0xb0   :  { %v48_v29 = vadd.s32 %v47_v26, %v45_v25  ;;  %v67_v30 = vcvt.f32.s32 %v65_v27  ;;  %v66_v31 = vcvt.f32.s32 %v63_v28 }
  0xb2   :  { %v49_v32 = vsel %vm35_vm0, %v48_v29, 0  ;;  %v68_v33 = vshll.u32 %v67_v30, 16 }
  0xb3   :  { %v50_v34 = vrot.slane %v49_v32, 4  ;;  %v87_v35 = vpop.xlane.xlu0 %86  ;;  %v85_v36 = vpop.xlane.xlu1 %84 }
  0xb4   :  { %v69_v37 = vadd.s32 %v68_v33, %v66_v31  ;;  %v89_v38 = vcvt.f32.s32 %v87_v35  ;;  %v88_v39 = vcvt.f32.s32 %v85_v36 }
  0xb5   :  { %v51_v40 = vadd.s32 %v50_v34, %v49_v32 }
  0xb6   :  { %v70_v41 = vsel %vm35_vm0, %v69_v37, 0  ;;  %v90_v42 = vshll.u32 %v89_v38, 16 }
  0xb7   :  { %v52_v43 = vrot.slane %v51_v40, 2  ;;  %v71_v44 = vrot.slane %v70_v41, 4 }
  0xb8   :  { %v91_v45 = vadd.s32 %v90_v42, %v88_v39 }
  0xb9   :  { %v53_v46 = vadd.s32 %v52_v43, %v51_v40  ;;  %v72_v47 = vadd.s32 %v71_v44, %v70_v41 }
  0xba   :  { %v92_v48 = vsel %vm35_vm0, %v91_v45, 0 }
  0xbb   :  { %v54_v49 = vrot.slane %v53_v46, 1  ;;  %v73_v50 = vrot.slane %v72_v47, 2  ;;  %v93_v51 = vrot.slane %v92_v48, 4 }
  0xbd   :  { %v55_v52 = vadd.s32 %v54_v49, %v53_v46  ;;  %v74_v53 = vadd.s32 %v73_v50, %v72_v47  ;;  %v94_v54 = vadd.s32 %v93_v51, %v92_v48 }
  0xbf   :  { %vm100_vm4 = vcmp.le.s32.totalorder %v55_v52, 384  ;;  %v75_v55 = vrot.slane %v74_v53, 1  ;;  %v95_v56 = vrot.slane %v94_v54, 2 }
  0xc0   :  { %v109_v57 = vsel %vm100_vm4, %v55_v52, 0  ;;  %v103_v5 = vsel %vm100_vm4, 1, %v1950_v3 }
  0xc1   :  { %v76_v58 = vadd.s32 %v75_v55, %v74_v53  ;;  %v96_v59 = vadd.s32 %v95_v56, %v94_v54 }
  0xc3   :  { %v77_v60 = vadd.s32 %v76_v58, %v55_v52  ;;  %v97_v61 = vrot.slane %v96_v59, 1 }
  0xc5   :  { %v98_v62 = vadd.s32 %v97_v61, %v96_v59  ;;  %vm101_vm5 = vcmp.le.s32.totalorder %v77_v60, 384 }
  0xc6   :  { %v104_v63 = vsel %vm101_vm5, 1, %v1950_v3  ;;  %v110_v0 = vsel %vm101_vm5, %v77_v60, %v109_v57 }
  0xc7   :  { %v99_v4 = vadd.s32 %v98_v62, %v77_v60  ;;  %v105_v6 = vadd.s32 %v104_v63, %v103_v5 }
  0xc9   :  { %vm102_vm6 = vcmp.le.s32.totalorder %v99_v4, 384 }
  0xca   :  { %v106_v8 = vsel %vm102_vm6, 1, %v1950_v3  ;;  %v2004_v9 = vsel %vm102_vm6, %v99_v4, %v110_v0 }
  0xcb   :  { %v2006_v10 = vadd.s32 %v106_v8, %v105_v6  ;;  %v112_v0 = vsub.s32 384, %v2004_v9 }
  0xcd   :  { %v108_v11 = vshll.u32 %v2006_v10, 30 }
  0xcf   :  { %vm2014_vm9 = vcmp.eq.s32.totalorder %v1984_v2, %v108_v11 }
  0xd0   :  { %vm118_vm11 = vmand %vm2014_vm9, %vm117_vm7 }
  0xd1   :  { %v142_v13 = vsel %vm118_vm11, 1, %v1950_v3  ;;  %vm116_vm12 = vmand %vm2014_vm9, %vm115_vm8 }
  0xd2   :  { %v143_v14 = vsel %vm35_vm0, %v142_v13, 0  ;;  %v121_v15 = vsel %vm116_vm12, 1, %v1950_v3  ;;  %vm120_vm13 = vmand %vm2014_vm9, %vm119_vm10 }
  0xd3   :  { %v145_v2 = vshrl.u32 %v143_v14, 16  ;;  %v122_v16 = vsel %vm35_vm0, %v121_v15, 0  ;;  %v164_v17 = vsel %vm120_vm13, 1, %v1950_v3  ;;  %v144_v20 = vand.u32 65535, %v143_v14 }
  0xd4   :  { %v124_v18 = vshrl.u32 %v122_v16, 16  ;;  %v123_v22 = vand.u32 65535, %v122_v16  ;;  %v165_v23 = vsel %vm35_vm0, %v164_v17, 0 }
  0xd5   :  { %v147_v19 = vcvt.s32.f32 %v145_v2  ;;  %v146_v24 = vcvt.s32.f32 %v144_v20  ;;  %v166_v25 = vand.u32 65535, %v165_v23  ;;  %v167_v27 = vshrl.u32 %v165_v23, 16 }
  0xd6   :  { %v126_v21 = vcvt.s32.f32 %v124_v18  ;;  %v125_v26 = vcvt.s32.f32 %v123_v22 }
  0xd7   :  { %150 = vadd.xlane.f32.xlu1 %v147_v19  ;;  %v168_v28 = vcvt.s32.f32 %v166_v25  ;;  %v169_v29 = vcvt.s32.f32 %v167_v27 }
  0xd8   :  { %129 = vadd.xlane.f32.xlu0 %v126_v21  ;;  %v2039_v21 = vand.u32 201326592, %v1981_v1 }
  0xda   :  { %vm205_vm2 = vcmp.eq.s32.totalorder %v2039_v21, 67108864  ;;  %vm203_vm4 = vcmp.eq.s32.totalorder %v2039_v21, 0  ;;  %vm207_vm6 = vcmp.eq.s32.totalorder %v2039_v21, 134217728 }
  0xdb   :  { %148 = vadd.xlane.f32.xlu1 %v146_v24 }
  0xdc   :  { %127 = vadd.xlane.f32.xlu0 %v125_v26 }
  0xdf   :  { %170 = vadd.xlane.f32.xlu1 %v168_v28 }
  0xe0   :  { %172 = vadd.xlane.f32.xlu0 %v169_v29 }
 0x160   :  { %v151_v30 = vpop.xlane.xlu1 %150 }
 0x161   :  { %v153_v31 = vcvt.f32.s32 %v151_v30  ;;  %v130_v32 = vpop.xlane.xlu0 %129 }
 0x162   :  { %v132_v33 = vcvt.f32.s32 %v130_v32 }
 0x163   :  { %v154_v35 = vshll.u32 %v153_v31, 16 }
 0x164   :  { %v149_v34 = vpop.xlane.xlu1 %148  ;;  %v133_v38 = vshll.u32 %v132_v33, 16 }
 0x165   :  { %v152_v36 = vcvt.f32.s32 %v149_v34  ;;  %v128_v37 = vpop.xlane.xlu0 %127 }
 0x166   :  { %v131_v39 = vcvt.f32.s32 %v128_v37 }
 0x167   :  { %v155_v40 = vadd.s32 %v154_v35, %v152_v36 }
 0x168   :  { %v134_v41 = vadd.s32 %v133_v38, %v131_v39  ;;  %v171_v43 = vpop.xlane.xlu1 %170 }
 0x169   :  { %v156_v42 = vsel %vm35_vm0, %v155_v40, 0  ;;  %v173_v44 = vpop.xlane.xlu0 %172  ;;  %v174_v50 = vcvt.f32.s32 %v171_v43 }
 0x16a   :  { %v157_v45 = vrot.slane %v156_v42, 4  ;;  %v135_v46 = vsel %vm35_vm0, %v134_v41, 0  ;;  %v175_v47 = vcvt.f32.s32 %v173_v44 }
 0x16b   :  { %v136_v48 = vrot.slane %v135_v46, 4 }
 0x16c   :  { %v158_v49 = vadd.s32 %v157_v45, %v156_v42  ;;  %v176_v51 = vshll.u32 %v175_v47, 16 }
 0x16d   :  { %v137_v52 = vadd.s32 %v136_v48, %v135_v46 }
 0x16e   :  { %v159_v53 = vrot.slane %v158_v49, 2  ;;  %v177_v54 = vadd.s32 %v176_v51, %v174_v50 }
 0x16f   :  { %v138_v55 = vrot.slane %v137_v52, 2 }
 0x170   :  { %v160_v56 = vadd.s32 %v159_v53, %v158_v49  ;;  %v178_v57 = vsel %vm35_vm0, %v177_v54, 0 }
 0x171   :  { %v139_v58 = vadd.s32 %v138_v55, %v137_v52  ;;  %v179_v59 = vrot.slane %v178_v57, 4 }
 0x172   :  { %v161_v60 = vrot.slane %v160_v56, 1 }
 0x173   :  { %v140_v61 = vrot.slane %v139_v58, 1  ;;  %v180_v62 = vadd.s32 %v179_v59, %v178_v57 }
 0x174   :  { %v162_v63 = vadd.s32 %v161_v60, %v160_v56 }
 0x175   :  { %v141_v4 = vadd.s32 %v140_v61, %v139_v58  ;;  %v181_v5 = vrot.slane %v180_v62, 2 }
 0x177   :  { %v163_v6 = vadd.s32 %v162_v63, %v141_v4  ;;  %vm186_vm14 = vcmp.ge.s32.totalorder %v112_v0, %v141_v4  ;;  %v182_v8 = vadd.s32 %v181_v5, %v180_v62 }
 0x178   :  { %v196_v13 = vsel %vm186_vm14, %v141_v4, 0  ;;  %v189_v18 = vsel %vm186_vm14, 1, %v1950_v3 }
 0x179   :  { %v183_v14 = vrot.slane %v182_v8, 1  ;;  %vm187_vm15 = vcmp.ge.s32.totalorder %v112_v0, %v163_v6 }
 0x17a   :  { %v197_v15 = vsel %vm187_vm15, %v163_v6, %v196_v13  ;;  %v190_v16 = vsel %vm187_vm15, 1, %v1950_v3 }
 0x17b   :  { %v184_v2 = vadd.s32 %v183_v14, %v182_v8  ;;  %v191_v19 = vadd.s32 %v190_v16, %v189_v18 }
 0x17d   :  { %v185_v17 = vadd.s32 %v184_v2, %v163_v6 }
 0x17f   :  { %vm188_vm1 = vcmp.ge.s32.totalorder %v112_v0, %v185_v17 }
 0x180   :  { %v192_v20 = vsel %vm188_vm1, 1, %v1950_v3  ;;  %v198_v9 = vsel %vm188_vm1, %v185_v17, %v197_v15 }
 0x181   :  { %v2041_v22 = vadd.s32 %v192_v20, %v191_v19  ;;  %v2043_v23 = vsub.s32 %v112_v0, %v198_v9 }
 0x183   :  { %v194_v24 = vshll.u32 %v2041_v22, 28 }
 0x185   :  { %vm200_vm3 = vcmp.eq.s32.totalorder %v2001_v7, %v194_v24 }
 0x186   :  { %vm2053_vm5 = vmand %vm2014_vm9, %vm200_vm3 }
 0x187   :  { %vm206_vm7 = vmand %vm2053_vm5, %vm205_vm2 }
 0x188   :  { %v230_v26 = vsel %vm206_vm7, 1, %v1950_v3  ;;  %vm204_vm8 = vmand %vm2053_vm5, %vm203_vm4 }
 0x189   :  { %v231_v7 = vsel %vm35_vm0, %v230_v26, 0  ;;  %v209_v27 = vsel %vm204_vm8, 1, %v1950_v3  ;;  %vm208_vm9 = vmand %vm2053_vm5, %vm207_vm6 }
 0x18a   :  { %v233_v12 = vshrl.u32 %v231_v7, 16  ;;  %v210_v28 = vsel %vm35_vm0, %v209_v27, 0  ;;  %v252_v29 = vsel %vm208_vm9, 1, %v1950_v3  ;;  %v232_v32 = vand.u32 65535, %v231_v7 }
 0x18b   :  { %v212_v30 = vshrl.u32 %v210_v28, 16  ;;  %v211_v34 = vand.u32 65535, %v210_v28  ;;  %v253_v35 = vsel %vm35_vm0, %v252_v29, 0 }
 0x18c   :  { %v235_v31 = vcvt.s32.f32 %v233_v12  ;;  %v234_v36 = vcvt.s32.f32 %v232_v32  ;;  %v254_v37 = vand.u32 65535, %v253_v35  ;;  %v255_v39 = vshrl.u32 %v253_v35, 16 }
 0x18d   :  { %v214_v33 = vcvt.s32.f32 %v212_v30  ;;  %v213_v38 = vcvt.s32.f32 %v211_v34  ;;  %v2080_v35 = vand.u32 50331648, %v1981_v1 }
 0x18e   :  { %238 = vadd.xlane.f32.xlu1 %v235_v31  ;;  %v256_v40 = vcvt.s32.f32 %v254_v37  ;;  %v257_v41 = vcvt.s32.f32 %v255_v39 }
 0x18f   :  { %217 = vadd.xlane.f32.xlu0 %v214_v33  ;;  %vm293_vm13 = vcmp.eq.s32.totalorder %v2080_v35, 16777216  ;;  %vm291_vm15 = vcmp.eq.s32.totalorder %v2080_v35, 0  ;;  %vm295_vm2 = vcmp.eq.s32.totalorder %v2080_v35, 33554432 }
 0x192   :  { %236 = vadd.xlane.f32.xlu1 %v234_v36 }
 0x193   :  { %215 = vadd.xlane.f32.xlu0 %v213_v38  ;;  %v195_v38 = vor.u32 %v194_v24, %v108_v11 }
 0x196   :  { %258 = vadd.xlane.f32.xlu1 %v256_v40 }
 0x197   :  { %260 = vadd.xlane.f32.xlu0 %v257_v41 }
 0x217   :  { %v239_v42 = vpop.xlane.xlu1 %238 }
 0x218   :  { %v241_v43 = vcvt.f32.s32 %v239_v42  ;;  %v218_v44 = vpop.xlane.xlu0 %217 }
 0x219   :  { %v220_v45 = vcvt.f32.s32 %v218_v44 }
 0x21a   :  { %v242_v47 = vshll.u32 %v241_v43, 16 }
 0x21b   :  { %v237_v46 = vpop.xlane.xlu1 %236  ;;  %v221_v50 = vshll.u32 %v220_v45, 16 }
 0x21c   :  { %v240_v48 = vcvt.f32.s32 %v237_v46  ;;  %v216_v49 = vpop.xlane.xlu0 %215 }
 0x21d   :  { %v219_v51 = vcvt.f32.s32 %v216_v49 }
 0x21e   :  { %v243_v52 = vadd.s32 %v242_v47, %v240_v48 }
 0x21f   :  { %v222_v53 = vadd.s32 %v221_v50, %v219_v51  ;;  %v259_v55 = vpop.xlane.xlu1 %258 }
 0x220   :  { %v244_v54 = vsel %vm35_vm0, %v243_v52, 0  ;;  %v261_v56 = vpop.xlane.xlu0 %260  ;;  %v262_v62 = vcvt.f32.s32 %v259_v55 }
 0x221   :  { %v245_v57 = vrot.slane %v244_v54, 4  ;;  %v223_v58 = vsel %vm35_vm0, %v222_v53, 0  ;;  %v263_v59 = vcvt.f32.s32 %v261_v56 }
 0x222   :  { %v224_v60 = vrot.slane %v223_v58, 4 }
 0x223   :  { %v246_v61 = vadd.s32 %v245_v57, %v244_v54  ;;  %v264_v63 = vshll.u32 %v263_v59, 16 }
 0x224   :  { %v225_v0 = vadd.s32 %v224_v60, %v223_v58 }
 0x225   :  { %v247_v4 = vrot.slane %v246_v61, 2  ;;  %v265_v5 = vadd.s32 %v264_v63, %v262_v62 }
 0x226   :  { %v226_v6 = vrot.slane %v225_v0, 2 }
 0x227   :  { %v248_v8 = vadd.s32 %v247_v4, %v246_v61  ;;  %v266_v13 = vsel %vm35_vm0, %v265_v5, 0 }
 0x228   :  { %v227_v14 = vadd.s32 %v226_v6, %v225_v0  ;;  %v267_v15 = vrot.slane %v266_v13, 4 }
 0x229   :  { %v249_v2 = vrot.slane %v248_v8, 1 }
 0x22a   :  { %v228_v16 = vrot.slane %v227_v14, 1  ;;  %v268_v17 = vadd.s32 %v267_v15, %v266_v13 }
 0x22b   :  { %v250_v18 = vadd.s32 %v249_v2, %v248_v8 }
 0x22c   :  { %v229_v19 = vadd.s32 %v228_v16, %v227_v14  ;;  %v269_v20 = vrot.slane %v268_v17, 2 }
 0x22e   :  { %v251_v9 = vadd.s32 %v250_v18, %v229_v19  ;;  %vm274_vm10 = vcmp.ge.s32.totalorder %v2043_v23, %v229_v19  ;;  %v270_v26 = vadd.s32 %v269_v20, %v268_v17 }
 0x22f   :  { %v284_v7 = vsel %vm274_vm10, %v229_v19, 0  ;;  %v277_v31 = vsel %vm274_vm10, 1, %v1950_v3 }
 0x230   :  { %v271_v27 = vrot.slane %v270_v26, 1  ;;  %vm275_vm11 = vcmp.ge.s32.totalorder %v2043_v23, %v251_v9 }
 0x231   :  { %v285_v12 = vsel %vm275_vm11, %v251_v9, %v284_v7  ;;  %v278_v29 = vsel %vm275_vm11, 1, %v1950_v3 }
 0x232   :  { %v272_v28 = vadd.s32 %v271_v27, %v270_v26  ;;  %v279_v32 = vadd.s32 %v278_v29, %v277_v31 }
 0x234   :  { %v273_v30 = vadd.s32 %v272_v28, %v251_v9 }
 0x236   :  { %vm276_vm12 = vcmp.ge.s32.totalorder %v2043_v23, %v273_v30 }
 0x237   :  { %v280_v33 = vsel %vm276_vm12, 1, %v1950_v3  ;;  %v286_v34 = vsel %vm276_vm12, %v273_v30, %v285_v12 }
 0x238   :  { %v281_v36 = vadd.s32 %v280_v33, %v279_v32  ;;  %v2083_v37 = vsub.s32 %v2043_v23, %v286_v34 }
 0x23a   :  { %v282_v39 = vshll.u32 %v281_v36, 26 }
 0x23c   :  { %v2090_v40 = vor.u32 %v282_v39, %v195_v38  ;;  %vm288_vm14 = vcmp.eq.s32.totalorder %v2039_v21, %v282_v39 }
 0x23d   :  { %vm2096_vm1 = vmand %vm2053_vm5, %vm288_vm14 }
 0x23e   :  { %vm294_vm3 = vmand %vm2096_vm1, %vm293_vm13 }
 0x23f   :  { %v318_v10 = vsel %vm294_vm3, 1, %v1950_v3  ;;  %vm292_vm4 = vmand %vm2096_vm1, %vm291_vm15 }
 0x240   :  { %v319_v11 = vsel %vm35_vm0, %v318_v10, 0  ;;  %v297_v21 = vsel %vm292_vm4, 1, %v1950_v3  ;;  %vm296_vm5 = vmand %vm2096_vm1, %vm295_vm2 }
 0x241   :  { %v321_v22 = vshrl.u32 %v319_v11, 16  ;;  %v298_v23 = vsel %vm35_vm0, %v297_v21, 0  ;;  %v340_v24 = vsel %vm296_vm5, 1, %v1950_v3  ;;  %v320_v43 = vand.u32 65535, %v319_v11 }
 0x242   :  { %v300_v25 = vshrl.u32 %v298_v23, 16  ;;  %v299_v45 = vand.u32 65535, %v298_v23  ;;  %v341_v46 = vsel %vm35_vm0, %v340_v24, 0 }
 0x243   :  { %v323_v42 = vcvt.s32.f32 %v321_v22  ;;  %v322_v47 = vcvt.s32.f32 %v320_v43  ;;  %v342_v48 = vand.u32 65535, %v341_v46  ;;  %v343_v50 = vshrl.u32 %v341_v46, 16 }
 0x244   :  { %v302_v44 = vcvt.s32.f32 %v300_v25  ;;  %v301_v49 = vcvt.s32.f32 %v299_v45  ;;  %v2123_v43 = vand.u32 12582912, %v1981_v1 }
 0x245   :  { %326 = vadd.xlane.f32.xlu1 %v323_v42  ;;  %v344_v51 = vcvt.s32.f32 %v342_v48  ;;  %v345_v52 = vcvt.s32.f32 %v343_v50 }
 0x246   :  { %305 = vadd.xlane.f32.xlu0 %v302_v44  ;;  %vm381_vm9 = vcmp.eq.s32.totalorder %v2123_v43, 4194304  ;;  %vm379_vm11 = vcmp.eq.s32.totalorder %v2123_v43, 0  ;;  %vm383_vm13 = vcmp.eq.s32.totalorder %v2123_v43, 8388608 }
 0x249   :  { %324 = vadd.xlane.f32.xlu1 %v322_v47 }
 0x24a   :  { %303 = vadd.xlane.f32.xlu0 %v301_v49 }
 0x24d   :  { %346 = vadd.xlane.f32.xlu1 %v344_v51 }
 0x24e   :  { %348 = vadd.xlane.f32.xlu0 %v345_v52 }
 0x2ce   :  { %v327_v53 = vpop.xlane.xlu1 %326 }
 0x2cf   :  { %v329_v54 = vcvt.f32.s32 %v327_v53  ;;  %v306_v55 = vpop.xlane.xlu0 %305 }
 0x2d0   :  { %v308_v56 = vcvt.f32.s32 %v306_v55 }
 0x2d1   :  { %v330_v58 = vshll.u32 %v329_v54, 16 }
 0x2d2   :  { %v325_v57 = vpop.xlane.xlu1 %324  ;;  %v309_v61 = vshll.u32 %v308_v56, 16 }
 0x2d3   :  { %v328_v59 = vcvt.f32.s32 %v325_v57  ;;  %v304_v60 = vpop.xlane.xlu0 %303 }
 0x2d4   :  { %v307_v62 = vcvt.f32.s32 %v304_v60 }
 0x2d5   :  { %v331_v63 = vadd.s32 %v330_v58, %v328_v59 }
 0x2d6   :  { %v310_v0 = vadd.s32 %v309_v61, %v307_v62  ;;  %v347_v5 = vpop.xlane.xlu1 %346 }
 0x2d7   :  { %v332_v4 = vsel %vm35_vm0, %v331_v63, 0  ;;  %v349_v6 = vpop.xlane.xlu0 %348  ;;  %v350_v16 = vcvt.f32.s32 %v347_v5 }
 0x2d8   :  { %v333_v8 = vrot.slane %v332_v4, 4  ;;  %v311_v13 = vsel %vm35_vm0, %v310_v0, 0  ;;  %v351_v14 = vcvt.f32.s32 %v349_v6 }
 0x2d9   :  { %v312_v15 = vrot.slane %v311_v13, 4 }
 0x2da   :  { %v334_v2 = vadd.s32 %v333_v8, %v332_v4  ;;  %v352_v17 = vshll.u32 %v351_v14, 16 }
 0x2db   :  { %v313_v18 = vadd.s32 %v312_v15, %v311_v13 }
 0x2dc   :  { %v335_v19 = vrot.slane %v334_v2, 2  ;;  %v353_v20 = vadd.s32 %v352_v17, %v350_v16 }
 0x2dd   :  { %v314_v9 = vrot.slane %v313_v18, 2 }
 0x2de   :  { %v336_v26 = vadd.s32 %v335_v19, %v334_v2  ;;  %v354_v7 = vsel %vm35_vm0, %v353_v20, 0 }
 0x2df   :  { %v315_v27 = vadd.s32 %v314_v9, %v313_v18  ;;  %v355_v12 = vrot.slane %v354_v7, 4 }
 0x2e0   :  { %v337_v28 = vrot.slane %v336_v26, 1 }
 0x2e1   :  { %v316_v29 = vrot.slane %v315_v27, 1  ;;  %v356_v30 = vadd.s32 %v355_v12, %v354_v7 }
 0x2e2   :  { %v338_v31 = vadd.s32 %v337_v28, %v336_v26 }
 0x2e3   :  { %v317_v32 = vadd.s32 %v316_v29, %v315_v27  ;;  %v357_v33 = vrot.slane %v356_v30, 2 }
 0x2e5   :  { %v339_v34 = vadd.s32 %v338_v31, %v317_v32  ;;  %vm362_vm6 = vcmp.ge.s32.totalorder %v2083_v37, %v317_v32  ;;  %v358_v36 = vadd.s32 %v357_v33, %v356_v30 }
 0x2e6   :  { %v372_v38 = vsel %vm362_vm6, %v317_v32, 0  ;;  %v365_v23 = vsel %vm362_vm6, 1, %v1950_v3 }
 0x2e7   :  { %v359_v39 = vrot.slane %v358_v36, 1  ;;  %vm363_vm7 = vcmp.ge.s32.totalorder %v2083_v37, %v339_v34 }
 0x2e8   :  { %v373_v10 = vsel %vm363_vm7, %v339_v34, %v372_v38  ;;  %v366_v21 = vsel %vm363_vm7, 1, %v1950_v3 }
 0x2e9   :  { %v360_v11 = vadd.s32 %v359_v39, %v358_v36  ;;  %v367_v24 = vadd.s32 %v366_v21, %v365_v23 }
 0x2eb   :  { %v361_v22 = vadd.s32 %v360_v11, %v339_v34 }
 0x2ed   :  { %vm364_vm8 = vcmp.ge.s32.totalorder %v2083_v37, %v361_v22 }
 0x2ee   :  { %v368_v25 = vsel %vm364_vm8, 1, %v1950_v3  ;;  %v374_v42 = vsel %vm364_vm8, %v361_v22, %v373_v10 }
 0x2ef   :  { %v369_v44 = vadd.s32 %v368_v25, %v367_v24  ;;  %v2126_v45 = vsub.s32 %v2083_v37, %v374_v42 }
 0x2f1   :  { %v370_v46 = vshll.u32 %v369_v44, 24 }
 0x2f3   :  { %v2130_v47 = vor.u32 %v370_v46, %v2090_v40  ;;  %vm376_vm10 = vcmp.eq.s32.totalorder %v2080_v35, %v370_v46 }
 0x2f4   :  { %vm2136_vm12 = vmand %vm2096_vm1, %vm376_vm10 }
 0x2f5   :  { %vm382_vm14 = vmand %vm2136_vm12, %vm381_vm9 }
 0x2f6   :  { %v406_v37 = vsel %vm382_vm14, 1, %v1950_v3  ;;  %vm380_vm15 = vmand %vm2136_vm12, %vm379_vm11 }
 0x2f7   :  { %v407_v35 = vsel %vm35_vm0, %v406_v37, 0  ;;  %v385_v40 = vsel %vm380_vm15, 1, %v1950_v3  ;;  %vm384_vm1 = vmand %vm2136_vm12, %vm383_vm13 }
 0x2f8   :  { %v409_v41 = vshrl.u32 %v407_v35, 16  ;;  %v386_v49 = vsel %vm35_vm0, %v385_v40, 0  ;;  %v428_v50 = vsel %vm384_vm1, 1, %v1950_v3  ;;  %v408_v53 = vand.u32 65535, %v407_v35 }
 0x2f9   :  { %v388_v51 = vshrl.u32 %v386_v49, 16  ;;  %v387_v55 = vand.u32 65535, %v386_v49  ;;  %v429_v56 = vsel %vm35_vm0, %v428_v50, 0 }
 0x2fa   :  { %v411_v52 = vcvt.s32.f32 %v409_v41  ;;  %v410_v57 = vcvt.s32.f32 %v408_v53  ;;  %v430_v58 = vand.u32 65535, %v429_v56  ;;  %v431_v60 = vshrl.u32 %v429_v56, 16 }
 0x2fb   :  { %v390_v54 = vcvt.s32.f32 %v388_v51  ;;  %v389_v59 = vcvt.s32.f32 %v387_v55  ;;  %v2163_v53 = vand.u32 3145728, %v1981_v1 }
 0x2fc   :  { %414 = vadd.xlane.f32.xlu1 %v411_v52  ;;  %v432_v61 = vcvt.s32.f32 %v430_v58  ;;  %v433_v62 = vcvt.s32.f32 %v431_v60 }
 0x2fd   :  { %393 = vadd.xlane.f32.xlu0 %v390_v54  ;;  %vm469_vm5 = vcmp.eq.s32.totalorder %v2163_v53, 1048576  ;;  %vm467_vm7 = vcmp.eq.s32.totalorder %v2163_v53, 0  ;;  %vm471_vm9 = vcmp.eq.s32.totalorder %v2163_v53, 2097152 }
 0x300   :  { %412 = vadd.xlane.f32.xlu1 %v410_v57 }
 0x301   :  { %391 = vadd.xlane.f32.xlu0 %v389_v59 }
 0x304   :  { %434 = vadd.xlane.f32.xlu1 %v432_v61 }
 0x305   :  { %436 = vadd.xlane.f32.xlu0 %v433_v62 }
 0x385   :  { %v415_v63 = vpop.xlane.xlu1 %414 }
 0x386   :  { %v417_v0 = vcvt.f32.s32 %v415_v63  ;;  %v394_v4 = vpop.xlane.xlu0 %393 }
 0x387   :  { %v396_v5 = vcvt.f32.s32 %v394_v4 }
 0x388   :  { %v418_v8 = vshll.u32 %v417_v0, 16 }
 0x389   :  { %v413_v6 = vpop.xlane.xlu1 %412  ;;  %v397_v15 = vshll.u32 %v396_v5, 16 }
 0x38a   :  { %v416_v13 = vcvt.f32.s32 %v413_v6  ;;  %v392_v14 = vpop.xlane.xlu0 %391 }
 0x38b   :  { %v395_v2 = vcvt.f32.s32 %v392_v14 }
 0x38c   :  { %v419_v16 = vadd.s32 %v418_v8, %v416_v13 }
 0x38d   :  { %v398_v17 = vadd.s32 %v397_v15, %v395_v2  ;;  %v435_v19 = vpop.xlane.xlu1 %434 }
 0x38e   :  { %v420_v18 = vsel %vm35_vm0, %v419_v16, 0  ;;  %v437_v20 = vpop.xlane.xlu0 %436  ;;  %v438_v28 = vcvt.f32.s32 %v435_v19 }
 0x38f   :  { %v421_v9 = vrot.slane %v420_v18, 4  ;;  %v399_v26 = vsel %vm35_vm0, %v398_v17, 0  ;;  %v439_v7 = vcvt.f32.s32 %v437_v20 }
 0x390   :  { %v400_v27 = vrot.slane %v399_v26, 4 }
 0x391   :  { %v422_v12 = vadd.s32 %v421_v9, %v420_v18  ;;  %v440_v29 = vshll.u32 %v439_v7, 16 }
 0x392   :  { %v401_v30 = vadd.s32 %v400_v27, %v399_v26 }
 0x393   :  { %v423_v31 = vrot.slane %v422_v12, 2  ;;  %v441_v32 = vadd.s32 %v440_v29, %v438_v28 }
 0x394   :  { %v402_v33 = vrot.slane %v401_v30, 2 }
 0x395   :  { %v424_v34 = vadd.s32 %v423_v31, %v422_v12  ;;  %v442_v36 = vsel %vm35_vm0, %v441_v32, 0 }
 0x396   :  { %v403_v38 = vadd.s32 %v402_v33, %v401_v30  ;;  %v443_v39 = vrot.slane %v442_v36, 4 }
 0x397   :  { %v425_v10 = vrot.slane %v424_v34, 1 }
 0x398   :  { %v404_v11 = vrot.slane %v403_v38, 1  ;;  %v444_v21 = vadd.s32 %v443_v39, %v442_v36 }
 0x399   :  { %v426_v22 = vadd.s32 %v425_v10, %v424_v34 }
 0x39a   :  { %v405_v23 = vadd.s32 %v404_v11, %v403_v38  ;;  %v445_v24 = vrot.slane %v444_v21, 2 }
 0x39c   :  { %v427_v25 = vadd.s32 %v426_v22, %v405_v23  ;;  %vm450_vm2 = vcmp.ge.s32.totalorder %v2126_v45, %v405_v23  ;;  %v446_v42 = vadd.s32 %v445_v24, %v444_v21 }
 0x39d   :  { %v460_v44 = vsel %vm450_vm2, %v405_v23, 0  ;;  %v453_v49 = vsel %vm450_vm2, 1, %v1950_v3 }
 0x39e   :  { %vm451_vm3 = vcmp.ge.s32.totalorder %v2126_v45, %v427_v25  ;;  %v447_v46 = vrot.slane %v446_v42, 1 }
 0x39f   :  { %v461_v37 = vsel %vm451_vm3, %v427_v25, %v460_v44  ;;  %v454_v40 = vsel %vm451_vm3, 1, %v1950_v3 }
 0x3a0   :  { %v448_v35 = vadd.s32 %v447_v46, %v446_v42  ;;  %v455_v50 = vadd.s32 %v454_v40, %v453_v49 }
 0x3a2   :  { %v449_v41 = vadd.s32 %v448_v35, %v427_v25 }
 0x3a4   :  { %vm452_vm4 = vcmp.ge.s32.totalorder %v2126_v45, %v449_v41 }
 0x3a5   :  { %v462_v51 = vsel %vm452_vm4, %v449_v41, %v461_v37  ;;  %v456_v52 = vsel %vm452_vm4, 1, %v1950_v3 }
 0x3a6   :  { %v2166_v54 = vsub.s32 %v2126_v45, %v462_v51  ;;  %v457_v55 = vadd.s32 %v456_v52, %v455_v50 }
 0x3a8   :  { %v458_v56 = vshll.u32 %v457_v55, 22 }
 0x3aa   :  { %v2170_v57 = vor.u32 %v458_v56, %v2130_v47  ;;  %vm464_vm6 = vcmp.eq.s32.totalorder %v2123_v43, %v458_v56 }
 0x3ab   :  { %vm2176_vm8 = vmand %vm2136_vm12, %vm464_vm6 }
 0x3ac   :  { %vm470_vm10 = vmand %vm2176_vm8, %vm469_vm5 }
 0x3ad   :  { %v494_v45 = vsel %vm470_vm10, 1, %v1950_v3  ;;  %vm468_vm11 = vmand %vm2176_vm8, %vm467_vm7 }
 0x3ae   :  { %v495_v43 = vsel %vm35_vm0, %v494_v45, 0  ;;  %v473_v47 = vsel %vm468_vm11, 1, %v1950_v3  ;;  %vm472_vm12 = vmand %vm2176_vm8, %vm471_vm9 }
 0x3af   :  { %v497_v48 = vshrl.u32 %v495_v43, 16  ;;  %v474_v59 = vsel %vm35_vm0, %v473_v47, 0  ;;  %v516_v60 = vsel %vm472_vm12, 1, %v1950_v3  ;;  %v496_v63 = vand.u32 65535, %v495_v43 }
 0x3b0   :  { %v476_v61 = vshrl.u32 %v474_v59, 16  ;;  %v475_v4 = vand.u32 65535, %v474_v59  ;;  %v517_v5 = vsel %vm35_vm0, %v516_v60, 0 }
 0x3b1   :  { %v499_v62 = vcvt.s32.f32 %v497_v48  ;;  %v498_v6 = vcvt.s32.f32 %v496_v63  ;;  %v518_v8 = vand.u32 65535, %v517_v5  ;;  %v519_v14 = vshrl.u32 %v517_v5, 16 }
 0x3b2   :  { %v478_v0 = vcvt.s32.f32 %v476_v61  ;;  %v477_v13 = vcvt.s32.f32 %v475_v4  ;;  %v2203_v63 = vand.u32 786432, %v1981_v1 }
 0x3b3   :  { %502 = vadd.xlane.f32.xlu1 %v499_v62  ;;  %v520_v15 = vcvt.s32.f32 %v518_v8  ;;  %v521_v2 = vcvt.s32.f32 %v519_v14 }
 0x3b4   :  { %481 = vadd.xlane.f32.xlu0 %v478_v0  ;;  %vm557_vm1 = vcmp.eq.s32.totalorder %v2203_v63, 262144  ;;  %vm555_vm3 = vcmp.eq.s32.totalorder %v2203_v63, 0  ;;  %vm559_vm5 = vcmp.eq.s32.totalorder %v2203_v63, 524288 }
 0x3b7   :  { %500 = vadd.xlane.f32.xlu1 %v498_v6 }
 0x3b8   :  { %479 = vadd.xlane.f32.xlu0 %v477_v13 }
 0x3bb   :  { %522 = vadd.xlane.f32.xlu1 %v520_v15 }
 0x3bc   :  { %524 = vadd.xlane.f32.xlu0 %v521_v2 }
 0x43c   :  { %v503_v16 = vpop.xlane.xlu1 %502 }
 0x43d   :  { %v505_v17 = vcvt.f32.s32 %v503_v16  ;;  %v482_v18 = vpop.xlane.xlu0 %481 }
 0x43e   :  { %v484_v19 = vcvt.f32.s32 %v482_v18 }
 0x43f   :  { %v506_v9 = vshll.u32 %v505_v17, 16 }
 0x440   :  { %v501_v20 = vpop.xlane.xlu1 %500  ;;  %v485_v27 = vshll.u32 %v484_v19, 16 }
 0x441   :  { %v504_v26 = vcvt.f32.s32 %v501_v20  ;;  %v480_v7 = vpop.xlane.xlu0 %479 }
 0x442   :  { %v483_v12 = vcvt.f32.s32 %v480_v7 }
 0x443   :  { %v507_v28 = vadd.s32 %v506_v9, %v504_v26 }
 0x444   :  { %v486_v29 = vadd.s32 %v485_v27, %v483_v12  ;;  %v523_v31 = vpop.xlane.xlu1 %522 }
 0x445   :  { %v508_v30 = vsel %vm35_vm0, %v507_v28, 0  ;;  %v525_v32 = vpop.xlane.xlu0 %524  ;;  %v526_v10 = vcvt.f32.s32 %v523_v31 }
 0x446   :  { %v509_v33 = vrot.slane %v508_v30, 4  ;;  %v487_v34 = vsel %vm35_vm0, %v486_v29, 0  ;;  %v527_v36 = vcvt.f32.s32 %v525_v32 }
 0x447   :  { %v488_v38 = vrot.slane %v487_v34, 4 }
 0x448   :  { %v510_v39 = vadd.s32 %v509_v33, %v508_v30  ;;  %v528_v11 = vshll.u32 %v527_v36, 16 }
 0x449   :  { %v489_v21 = vadd.s32 %v488_v38, %v487_v34 }
 0x44a   :  { %v511_v22 = vrot.slane %v510_v39, 2  ;;  %v529_v23 = vadd.s32 %v528_v11, %v526_v10 }
 0x44b   :  { %v490_v24 = vrot.slane %v489_v21, 2 }
 0x44c   :  { %v512_v25 = vadd.s32 %v511_v22, %v510_v39  ;;  %v530_v42 = vsel %vm35_vm0, %v529_v23, 0 }
 0x44d   :  { %v491_v44 = vadd.s32 %v490_v24, %v489_v21  ;;  %v531_v46 = vrot.slane %v530_v42, 4 }
 0x44e   :  { %v513_v37 = vrot.slane %v512_v25, 1 }
 0x44f   :  { %v492_v35 = vrot.slane %v491_v44, 1  ;;  %v532_v40 = vadd.s32 %v531_v46, %v530_v42 }
 0x450   :  { %v514_v41 = vadd.s32 %v513_v37, %v512_v25 }
 0x451   :  { %v493_v49 = vadd.s32 %v492_v35, %v491_v44  ;;  %v533_v50 = vrot.slane %v532_v40, 2 }
 0x453   :  { %v515_v51 = vadd.s32 %v514_v41, %v493_v49  ;;  %vm538_vm13 = vcmp.ge.s32.totalorder %v2166_v54, %v493_v49  ;;  %v534_v52 = vadd.s32 %v533_v50, %v532_v40 }
 0x454   :  { %v548_v55 = vsel %vm538_vm13, %v493_v49, 0  ;;  %v541_v59 = vsel %vm538_vm13, 1, %v1950_v3 }
 0x455   :  { %vm539_vm14 = vcmp.ge.s32.totalorder %v2166_v54, %v515_v51  ;;  %v535_v56 = vrot.slane %v534_v52, 1 }
 0x456   :  { %v549_v45 = vsel %vm539_vm14, %v515_v51, %v548_v55  ;;  %v542_v47 = vsel %vm539_vm14, 1, %v1950_v3 }
 0x457   :  { %v536_v43 = vadd.s32 %v535_v56, %v534_v52  ;;  %v543_v60 = vadd.s32 %v542_v47, %v541_v59 }
 0x459   :  { %v537_v48 = vadd.s32 %v536_v43, %v515_v51 }
 0x45b   :  { %vm540_vm15 = vcmp.ge.s32.totalorder %v2166_v54, %v537_v48 }
 0x45c   :  { %v550_v61 = vsel %vm540_vm15, %v537_v48, %v549_v45  ;;  %v544_v62 = vsel %vm540_vm15, 1, %v1950_v3 }
 0x45d   :  { %v2206_v0 = vsub.s32 %v2166_v54, %v550_v61  ;;  %v545_v4 = vadd.s32 %v544_v62, %v543_v60 }
 0x45f   :  { %v546_v5 = vshll.u32 %v545_v4, 20 }
 0x461   :  { %v2210_v6 = vor.u32 %v546_v5, %v2170_v57  ;;  %vm552_vm2 = vcmp.eq.s32.totalorder %v2163_v53, %v546_v5 }
 0x462   :  { %vm2216_vm4 = vmand %vm2176_vm8, %vm552_vm2 }
 0x463   :  { %vm558_vm6 = vmand %vm2216_vm4, %vm557_vm1 }
 0x464   :  { %v582_v54 = vsel %vm558_vm6, 1, %v1950_v3  ;;  %vm556_vm7 = vmand %vm2216_vm4, %vm555_vm3 }
 0x465   :  { %v583_v53 = vsel %vm35_vm0, %v582_v54, 0  ;;  %v561_v57 = vsel %vm556_vm7, 1, %v1950_v3  ;;  %vm560_vm8 = vmand %vm2216_vm4, %vm559_vm5 }
 0x466   :  { %v585_v58 = vshrl.u32 %v583_v53, 16  ;;  %v562_v13 = vsel %vm35_vm0, %v561_v57, 0  ;;  %v604_v14 = vsel %vm560_vm8, 1, %v1950_v3  ;;  %v584_v16 = vand.u32 65535, %v583_v53 }
 0x467   :  { %v564_v15 = vshrl.u32 %v562_v13, 16  ;;  %v563_v18 = vand.u32 65535, %v562_v13  ;;  %v605_v19 = vsel %vm35_vm0, %v604_v14, 0 }
 0x468   :  { %v587_v2 = vcvt.s32.f32 %v585_v58  ;;  %v586_v20 = vcvt.s32.f32 %v584_v16  ;;  %v606_v9 = vand.u32 65535, %v605_v19  ;;  %v607_v7 = vshrl.u32 %v605_v19, 16 }
 0x469   :  { %v566_v17 = vcvt.s32.f32 %v564_v15  ;;  %v565_v26 = vcvt.s32.f32 %v563_v18  ;;  %v2243_v16 = vand.u32 196608, %v1981_v1 }
 0x46a   :  { %590 = vadd.xlane.f32.xlu1 %v587_v2  ;;  %v608_v27 = vcvt.s32.f32 %v606_v9  ;;  %v609_v12 = vcvt.s32.f32 %v607_v7 }
 0x46b   :  { %569 = vadd.xlane.f32.xlu0 %v566_v17  ;;  %vm645_vm12 = vcmp.eq.s32.totalorder %v2243_v16, 65536  ;;  %vm643_vm14 = vcmp.eq.s32.totalorder %v2243_v16, 0  ;;  %vm647_vm1 = vcmp.eq.s32.totalorder %v2243_v16, 131072 }
 0x46e   :  { %588 = vadd.xlane.f32.xlu1 %v586_v20 }
 0x46f   :  { %567 = vadd.xlane.f32.xlu0 %v565_v26 }
 0x472   :  { %610 = vadd.xlane.f32.xlu1 %v608_v27 }
 0x473   :  { %612 = vadd.xlane.f32.xlu0 %v609_v12 }
 0x4f3   :  { %v591_v28 = vpop.xlane.xlu1 %590 }
 0x4f4   :  { %v593_v29 = vcvt.f32.s32 %v591_v28  ;;  %v570_v30 = vpop.xlane.xlu0 %569 }
 0x4f5   :  { %v572_v31 = vcvt.f32.s32 %v570_v30 }
 0x4f6   :  { %v594_v33 = vshll.u32 %v593_v29, 16 }
 0x4f7   :  { %v589_v32 = vpop.xlane.xlu1 %588  ;;  %v573_v38 = vshll.u32 %v572_v31, 16 }
 0x4f8   :  { %v592_v34 = vcvt.f32.s32 %v589_v32  ;;  %v568_v36 = vpop.xlane.xlu0 %567 }
 0x4f9   :  { %v571_v39 = vcvt.f32.s32 %v568_v36 }
 0x4fa   :  { %v595_v10 = vadd.s32 %v594_v33, %v592_v34 }
 0x4fb   :  { %v574_v11 = vadd.s32 %v573_v38, %v571_v39  ;;  %v611_v22 = vpop.xlane.xlu1 %610 }
 0x4fc   :  { %v596_v21 = vsel %vm35_vm0, %v595_v10, 0  ;;  %v613_v23 = vpop.xlane.xlu0 %612  ;;  %v614_v37 = vcvt.f32.s32 %v611_v22 }
 0x4fd   :  { %v597_v24 = vrot.slane %v596_v21, 4  ;;  %v575_v25 = vsel %vm35_vm0, %v574_v11, 0  ;;  %v615_v42 = vcvt.f32.s32 %v613_v23 }
 0x4fe   :  { %v576_v44 = vrot.slane %v575_v25, 4 }
 0x4ff   :  { %v598_v46 = vadd.s32 %v597_v24, %v596_v21  ;;  %v616_v35 = vshll.u32 %v615_v42, 16 }
 0x500   :  { %v577_v40 = vadd.s32 %v576_v44, %v575_v25 }
 0x501   :  { %v599_v41 = vrot.slane %v598_v46, 2  ;;  %v617_v49 = vadd.s32 %v616_v35, %v614_v37 }
 0x502   :  { %v578_v50 = vrot.slane %v577_v40, 2 }
 0x503   :  { %v600_v51 = vadd.s32 %v599_v41, %v598_v46  ;;  %v618_v52 = vsel %vm35_vm0, %v617_v49, 0 }
 0x504   :  { %v579_v55 = vadd.s32 %v578_v50, %v577_v40  ;;  %v619_v56 = vrot.slane %v618_v52, 4 }
 0x505   :  { %v601_v45 = vrot.slane %v600_v51, 1 }
 0x506   :  { %v580_v43 = vrot.slane %v579_v55, 1  ;;  %v620_v47 = vadd.s32 %v619_v56, %v618_v52 }
 0x507   :  { %v602_v48 = vadd.s32 %v601_v45, %v600_v51 }
 0x508   :  { %v581_v59 = vadd.s32 %v580_v43, %v579_v55  ;;  %v621_v60 = vrot.slane %v620_v47, 2 }
 0x50a   :  { %v603_v61 = vadd.s32 %v602_v48, %v581_v59  ;;  %vm626_vm9 = vcmp.ge.s32.totalorder %v2206_v0, %v581_v59  ;;  %v622_v62 = vadd.s32 %v621_v60, %v620_v47 }
 0x50b   :  { %v636_v4 = vsel %vm626_vm9, %v581_v59, 0  ;;  %v629_v13 = vsel %vm626_vm9, 1, %v1950_v3 }
 0x50c   :  { %vm627_vm10 = vcmp.ge.s32.totalorder %v2206_v0, %v603_v61  ;;  %v623_v5 = vrot.slane %v622_v62, 1 }
 0x50d   :  { %v637_v54 = vsel %vm627_vm10, %v603_v61, %v636_v4  ;;  %v630_v57 = vsel %vm627_vm10, 1, %v1950_v3 }
 0x50e   :  { %v624_v53 = vadd.s32 %v623_v5, %v622_v62  ;;  %v631_v14 = vadd.s32 %v630_v57, %v629_v13 }
 0x510   :  { %v625_v58 = vadd.s32 %v624_v53, %v603_v61 }
 0x512   :  { %vm628_vm11 = vcmp.ge.s32.totalorder %v2206_v0, %v625_v58 }
 0x513   :  { %v638_v15 = vsel %vm628_vm11, %v625_v58, %v637_v54  ;;  %v632_v2 = vsel %vm628_vm11, 1, %v1950_v3 }
 0x514   :  { %v2246_v17 = vsub.s32 %v2206_v0, %v638_v15  ;;  %v633_v18 = vadd.s32 %v632_v2, %v631_v14 }
 0x516   :  { %v634_v19 = vshll.u32 %v633_v18, 18 }
 0x518   :  { %v2250_v20 = vor.u32 %v634_v19, %v2210_v6  ;;  %vm640_vm13 = vcmp.eq.s32.totalorder %v2203_v63, %v634_v19 }
 0x519   :  { %vm2256_vm15 = vmand %vm2216_vm4, %vm640_vm13 }
 0x51a   :  { %vm646_vm2 = vmand %vm2256_vm15, %vm645_vm12 }
 0x51b   :  { %v670_v0 = vsel %vm646_vm2, 1, %v1950_v3  ;;  %vm644_vm3 = vmand %vm2256_vm15, %vm643_vm14 }
 0x51c   :  { %v671_v63 = vsel %vm35_vm0, %v670_v0, 0  ;;  %v649_v6 = vsel %vm644_vm3, 1, %v1950_v3  ;;  %vm648_vm4 = vmand %vm2256_vm15, %vm647_vm1 }
 0x51d   :  { %v673_v8 = vshrl.u32 %v671_v63, 16  ;;  %v650_v26 = vsel %vm35_vm0, %v649_v6, 0  ;;  %v692_v7 = vsel %vm648_vm4, 1, %v1950_v3  ;;  %v672_v28 = vand.u32 65535, %v671_v63 }
 0x51e   :  { %v652_v27 = vshrl.u32 %v650_v26, 16  ;;  %v651_v30 = vand.u32 65535, %v650_v26  ;;  %v693_v31 = vsel %vm35_vm0, %v692_v7, 0 }
 0x51f   :  { %v675_v12 = vcvt.s32.f32 %v673_v8  ;;  %v674_v32 = vcvt.s32.f32 %v672_v28  ;;  %v694_v33 = vand.u32 65535, %v693_v31  ;;  %v695_v36 = vshrl.u32 %v693_v31, 16 }
 0x520   :  { %v654_v29 = vcvt.s32.f32 %v652_v27  ;;  %v653_v34 = vcvt.s32.f32 %v651_v30  ;;  %v2283_v28 = vand.u32 49152, %v1981_v1 }
 0x521   :  { %678 = vadd.xlane.f32.xlu1 %v675_v12  ;;  %v696_v38 = vcvt.s32.f32 %v694_v33  ;;  %v697_v39 = vcvt.s32.f32 %v695_v36 }
 0x522   :  { %657 = vadd.xlane.f32.xlu0 %v654_v29  ;;  %vm733_vm8 = vcmp.eq.s32.totalorder %v2283_v28, 16384  ;;  %vm731_vm10 = vcmp.eq.s32.totalorder %v2283_v28, 0  ;;  %vm735_vm12 = vcmp.eq.s32.totalorder %v2283_v28, 32768 }
 0x525   :  { %676 = vadd.xlane.f32.xlu1 %v674_v32 }
 0x526   :  { %655 = vadd.xlane.f32.xlu0 %v653_v34 }
 0x529   :  { %698 = vadd.xlane.f32.xlu1 %v696_v38 }
 0x52a   :  { %700 = vadd.xlane.f32.xlu0 %v697_v39 }
 0x5aa   :  { %v679_v10 = vpop.xlane.xlu1 %678 }
 0x5ab   :  { %v681_v11 = vcvt.f32.s32 %v679_v10  ;;  %v658_v21 = vpop.xlane.xlu0 %657 }
 0x5ac   :  { %v660_v22 = vcvt.f32.s32 %v658_v21 }
 0x5ad   :  { %v682_v24 = vshll.u32 %v681_v11, 16 }
 0x5ae   :  { %v677_v23 = vpop.xlane.xlu1 %676  ;;  %v661_v44 = vshll.u32 %v660_v22, 16 }
 0x5af   :  { %v680_v25 = vcvt.f32.s32 %v677_v23  ;;  %v656_v42 = vpop.xlane.xlu0 %655 }
 0x5b0   :  { %v659_v46 = vcvt.f32.s32 %v656_v42 }
 0x5b1   :  { %v683_v37 = vadd.s32 %v682_v24, %v680_v25 }
 0x5b2   :  { %v662_v35 = vadd.s32 %v661_v44, %v659_v46  ;;  %v699_v41 = vpop.xlane.xlu1 %698 }
 0x5b3   :  { %v684_v40 = vsel %vm35_vm0, %v683_v37, 0  ;;  %v701_v49 = vpop.xlane.xlu0 %700  ;;  %v702_v45 = vcvt.f32.s32 %v699_v41 }
 0x5b4   :  { %v685_v50 = vrot.slane %v684_v40, 4  ;;  %v663_v51 = vsel %vm35_vm0, %v662_v35, 0  ;;  %v703_v52 = vcvt.f32.s32 %v701_v49 }
 0x5b5   :  { %v664_v55 = vrot.slane %v663_v51, 4 }
 0x5b6   :  { %v686_v56 = vadd.s32 %v685_v50, %v684_v40  ;;  %v704_v43 = vshll.u32 %v703_v52, 16 }
 0x5b7   :  { %v665_v47 = vadd.s32 %v664_v55, %v663_v51 }
 0x5b8   :  { %v687_v48 = vrot.slane %v686_v56, 2  ;;  %v705_v59 = vadd.s32 %v704_v43, %v702_v45 }
 0x5b9   :  { %v666_v60 = vrot.slane %v665_v47, 2 }
 0x5ba   :  { %v688_v61 = vadd.s32 %v687_v48, %v686_v56  ;;  %v706_v62 = vsel %vm35_vm0, %v705_v59, 0 }
 0x5bb   :  { %v667_v4 = vadd.s32 %v666_v60, %v665_v47  ;;  %v707_v5 = vrot.slane %v706_v62, 4 }
 0x5bc   :  { %v689_v54 = vrot.slane %v688_v61, 1 }
 0x5bd   :  { %v668_v53 = vrot.slane %v667_v4, 1  ;;  %v708_v57 = vadd.s32 %v707_v5, %v706_v62 }
 0x5be   :  { %v690_v58 = vadd.s32 %v689_v54, %v688_v61 }
 0x5bf   :  { %v669_v13 = vadd.s32 %v668_v53, %v667_v4  ;;  %v709_v14 = vrot.slane %v708_v57, 2 }
 0x5c1   :  { %v691_v15 = vadd.s32 %v690_v58, %v669_v13  ;;  %vm714_vm5 = vcmp.ge.s32.totalorder %v2246_v17, %v669_v13  ;;  %v710_v2 = vadd.s32 %v709_v14, %v708_v57 }
 0x5c2   :  { %v724_v18 = vsel %vm714_vm5, %v669_v13, 0  ;;  %v717_v26 = vsel %vm714_vm5, 1, %v1950_v3 }
 0x5c3   :  { %vm715_vm6 = vcmp.ge.s32.totalorder %v2246_v17, %v691_v15  ;;  %v711_v19 = vrot.slane %v710_v2, 1 }
 0x5c4   :  { %v725_v0 = vsel %vm715_vm6, %v691_v15, %v724_v18  ;;  %v718_v6 = vsel %vm715_vm6, 1, %v1950_v3 }
 0x5c5   :  { %v712_v63 = vadd.s32 %v711_v19, %v710_v2  ;;  %v719_v7 = vadd.s32 %v718_v6, %v717_v26 }
 0x5c7   :  { %v713_v8 = vadd.s32 %v712_v63, %v691_v15 }
 0x5c9   :  { %vm716_vm7 = vcmp.ge.s32.totalorder %v2246_v17, %v713_v8 }
 0x5ca   :  { %v726_v27 = vsel %vm716_vm7, %v713_v8, %v725_v0  ;;  %v720_v12 = vsel %vm716_vm7, 1, %v1950_v3 }
 0x5cb   :  { %v2286_v29 = vsub.s32 %v2246_v17, %v726_v27  ;;  %v721_v30 = vadd.s32 %v720_v12, %v719_v7 }
 0x5cd   :  { %v722_v31 = vshll.u32 %v721_v30, 16 }
 0x5cf   :  { %v2290_v32 = vor.u32 %v722_v31, %v2250_v20  ;;  %vm728_vm9 = vcmp.eq.s32.totalorder %v2243_v16, %v722_v31 }
 0x5d0   :  { %vm2296_vm11 = vmand %vm2256_vm15, %vm728_vm9 }
 0x5d1   :  { %vm734_vm13 = vmand %vm2296_vm11, %vm733_vm8 }
 0x5d2   :  { %v758_v17 = vsel %vm734_vm13, 1, %v1950_v3  ;;  %vm732_vm14 = vmand %vm2296_vm11, %vm731_vm10 }
 0x5d3   :  { %v759_v16 = vsel %vm35_vm0, %v758_v17, 0  ;;  %v737_v20 = vsel %vm732_vm14, 1, %v1950_v3  ;;  %vm736_vm15 = vmand %vm2296_vm11, %vm735_vm12 }
 0x5d4   :  { %v761_v9 = vshrl.u32 %v759_v16, 16  ;;  %v738_v34 = vsel %vm35_vm0, %v737_v20, 0  ;;  %v780_v36 = vsel %vm736_vm15, 1, %v1950_v3  ;;  %v760_v10 = vand.u32 65535, %v759_v16 }
 0x5d5   :  { %v740_v38 = vshrl.u32 %v738_v34, 16  ;;  %v739_v21 = vand.u32 65535, %v738_v34  ;;  %v781_v22 = vsel %vm35_vm0, %v780_v36, 0 }
 0x5d6   :  { %v763_v39 = vcvt.s32.f32 %v761_v9  ;;  %v762_v23 = vcvt.s32.f32 %v760_v10  ;;  %v782_v24 = vand.u32 65535, %v781_v22  ;;  %v783_v42 = vshrl.u32 %v781_v22, 16 }
 0x5d7   :  { %v742_v11 = vcvt.s32.f32 %v740_v38  ;;  %v741_v25 = vcvt.s32.f32 %v739_v21  ;;  %v2323_v10 = vand.u32 12288, %v1981_v1 }
 0x5d8   :  { %766 = vadd.xlane.f32.xlu1 %v763_v39  ;;  %v784_v44 = vcvt.s32.f32 %v782_v24  ;;  %v785_v46 = vcvt.s32.f32 %v783_v42 }
 0x5d9   :  { %745 = vadd.xlane.f32.xlu0 %v742_v11  ;;  %vm821_vm4 = vcmp.eq.s32.totalorder %v2323_v10, 4096  ;;  %vm819_vm6 = vcmp.eq.s32.totalorder %v2323_v10, 0  ;;  %vm823_vm8 = vcmp.eq.s32.totalorder %v2323_v10, 8192 }
 0x5dc   :  { %764 = vadd.xlane.f32.xlu1 %v762_v23 }
 0x5dd   :  { %743 = vadd.xlane.f32.xlu0 %v741_v25 }
 0x5e0   :  { %786 = vadd.xlane.f32.xlu1 %v784_v44 }
 0x5e1   :  { %788 = vadd.xlane.f32.xlu0 %v785_v46 }
 0x661   :  { %v767_v37 = vpop.xlane.xlu1 %766 }
 0x662   :  { %v769_v35 = vcvt.f32.s32 %v767_v37  ;;  %v746_v40 = vpop.xlane.xlu0 %745 }
 0x663   :  { %v748_v41 = vcvt.f32.s32 %v746_v40 }
 0x664   :  { %v770_v50 = vshll.u32 %v769_v35, 16 }
 0x665   :  { %v765_v49 = vpop.xlane.xlu1 %764  ;;  %v749_v55 = vshll.u32 %v748_v41, 16 }
 0x666   :  { %v768_v51 = vcvt.f32.s32 %v765_v49  ;;  %v744_v52 = vpop.xlane.xlu0 %743 }
 0x667   :  { %v747_v56 = vcvt.f32.s32 %v744_v52 }
 0x668   :  { %v771_v45 = vadd.s32 %v770_v50, %v768_v51 }
 0x669   :  { %v750_v43 = vadd.s32 %v749_v55, %v747_v56  ;;  %v787_v48 = vpop.xlane.xlu1 %786 }
 0x66a   :  { %v772_v47 = vsel %vm35_vm0, %v771_v45, 0  ;;  %v789_v59 = vpop.xlane.xlu0 %788  ;;  %v790_v54 = vcvt.f32.s32 %v787_v48 }
 0x66b   :  { %v773_v60 = vrot.slane %v772_v47, 4  ;;  %v751_v61 = vsel %vm35_vm0, %v750_v43, 0  ;;  %v791_v62 = vcvt.f32.s32 %v789_v59 }
 0x66c   :  { %v752_v4 = vrot.slane %v751_v61, 4 }
 0x66d   :  { %v774_v5 = vadd.s32 %v773_v60, %v772_v47  ;;  %v792_v53 = vshll.u32 %v791_v62, 16 }
 0x66e   :  { %v753_v57 = vadd.s32 %v752_v4, %v751_v61 }
 0x66f   :  { %v775_v58 = vrot.slane %v774_v5, 2  ;;  %v793_v13 = vadd.s32 %v792_v53, %v790_v54 }
 0x670   :  { %v754_v14 = vrot.slane %v753_v57, 2 }
 0x671   :  { %v776_v15 = vadd.s32 %v775_v58, %v774_v5  ;;  %v794_v2 = vsel %vm35_vm0, %v793_v13, 0 }
 0x672   :  { %v755_v18 = vadd.s32 %v754_v14, %v753_v57  ;;  %v795_v19 = vrot.slane %v794_v2, 4 }
 0x673   :  { %v777_v0 = vrot.slane %v776_v15, 1 }
 0x674   :  { %v756_v63 = vrot.slane %v755_v18, 1  ;;  %v796_v6 = vadd.s32 %v795_v19, %v794_v2 }
 0x675   :  { %v778_v8 = vadd.s32 %v777_v0, %v776_v15 }
 0x676   :  { %v757_v26 = vadd.s32 %v756_v63, %v755_v18  ;;  %v797_v7 = vrot.slane %v796_v6, 2 }
 0x678   :  { %v779_v27 = vadd.s32 %v778_v8, %v757_v26  ;;  %vm802_vm1 = vcmp.ge.s32.totalorder %v2286_v29, %v757_v26  ;;  %v798_v12 = vadd.s32 %v797_v7, %v796_v6 }
 0x679   :  { %v812_v30 = vsel %vm802_vm1, %v757_v26, 0  ;;  %v805_v34 = vsel %vm802_vm1, 1, %v1950_v3 }
 0x67a   :  { %vm803_vm2 = vcmp.ge.s32.totalorder %v2286_v29, %v779_v27  ;;  %v799_v31 = vrot.slane %v798_v12, 1 }
 0x67b   :  { %v813_v17 = vsel %vm803_vm2, %v779_v27, %v812_v30  ;;  %v806_v20 = vsel %vm803_vm2, 1, %v1950_v3 }
 0x67c   :  { %v800_v16 = vadd.s32 %v799_v31, %v798_v12  ;;  %v807_v36 = vadd.s32 %v806_v20, %v805_v34 }
 0x67e   :  { %v801_v9 = vadd.s32 %v800_v16, %v779_v27 }
 0x680   :  { %vm804_vm3 = vcmp.ge.s32.totalorder %v2286_v29, %v801_v9 }
 0x681   :  { %v814_v38 = vsel %vm804_vm3, %v801_v9, %v813_v17  ;;  %v808_v39 = vsel %vm804_vm3, 1, %v1950_v3 }
 0x682   :  { %v2326_v11 = vsub.s32 %v2286_v29, %v814_v38  ;;  %v809_v21 = vadd.s32 %v808_v39, %v807_v36 }
 0x684   :  { %v810_v22 = vshll.u32 %v809_v21, 14 }
 0x686   :  { %v2330_v23 = vor.u32 %v810_v22, %v2290_v32  ;;  %vm816_vm5 = vcmp.eq.s32.totalorder %v2283_v28, %v810_v22 }
 0x687   :  { %vm2336_vm7 = vmand %vm2296_vm11, %vm816_vm5 }
 0x688   :  { %vm822_vm9 = vmand %vm2336_vm7, %vm821_vm4 }
 0x689   :  { %v846_v29 = vsel %vm822_vm9, 1, %v1950_v3  ;;  %vm820_vm10 = vmand %vm2336_vm7, %vm819_vm6 }
 0x68a   :  { %v847_v28 = vsel %vm35_vm0, %v846_v29, 0  ;;  %v825_v32 = vsel %vm820_vm10, 1, %v1950_v3  ;;  %vm824_vm11 = vmand %vm2336_vm7, %vm823_vm8 }
 0x68b   :  { %v849_v33 = vshrl.u32 %v847_v28, 16  ;;  %v826_v25 = vsel %vm35_vm0, %v825_v32, 0  ;;  %v868_v42 = vsel %vm824_vm11, 1, %v1950_v3  ;;  %v848_v37 = vand.u32 65535, %v847_v28 }
 0x68c   :  { %v828_v44 = vshrl.u32 %v826_v25, 16  ;;  %v827_v40 = vand.u32 65535, %v826_v25  ;;  %v869_v41 = vsel %vm35_vm0, %v868_v42, 0 }
 0x68d   :  { %v851_v46 = vcvt.s32.f32 %v849_v33  ;;  %v850_v49 = vcvt.s32.f32 %v848_v37  ;;  %v870_v50 = vand.u32 65535, %v869_v41  ;;  %v871_v52 = vshrl.u32 %v869_v41, 16 }
 0x68e   :  { %v830_v35 = vcvt.s32.f32 %v828_v44  ;;  %v829_v51 = vcvt.s32.f32 %v827_v40  ;;  %v2363_v37 = vand.u32 3072, %v1981_v1 }
 0x68f   :  { %854 = vadd.xlane.f32.xlu1 %v851_v46  ;;  %v872_v55 = vcvt.s32.f32 %v870_v50  ;;  %v873_v56 = vcvt.s32.f32 %v871_v52 }
 0x690   :  { %833 = vadd.xlane.f32.xlu0 %v830_v35  ;;  %vm909_vm15 = vcmp.eq.s32.totalorder %v2363_v37, 1024  ;;  %vm907_vm2 = vcmp.eq.s32.totalorder %v2363_v37, 0  ;;  %vm911_vm4 = vcmp.eq.s32.totalorder %v2363_v37, 2048 }
 0x693   :  { %852 = vadd.xlane.f32.xlu1 %v850_v49 }
 0x694   :  { %831 = vadd.xlane.f32.xlu0 %v829_v51 }
 0x697   :  { %874 = vadd.xlane.f32.xlu1 %v872_v55 }
 0x698   :  { %876 = vadd.xlane.f32.xlu0 %v873_v56 }
 0x718   :  { %v855_v45 = vpop.xlane.xlu1 %854 }
 0x719   :  { %v857_v43 = vcvt.f32.s32 %v855_v45  ;;  %v834_v47 = vpop.xlane.xlu0 %833 }
 0x71a   :  { %v836_v48 = vcvt.f32.s32 %v834_v47 }
 0x71b   :  { %v858_v60 = vshll.u32 %v857_v43, 16 }
 0x71c   :  { %v853_v59 = vpop.xlane.xlu1 %852  ;;  %v837_v4 = vshll.u32 %v836_v48, 16 }
 0x71d   :  { %v856_v61 = vcvt.f32.s32 %v853_v59  ;;  %v832_v62 = vpop.xlane.xlu0 %831 }
 0x71e   :  { %v835_v5 = vcvt.f32.s32 %v832_v62 }
 0x71f   :  { %v859_v54 = vadd.s32 %v858_v60, %v856_v61 }
 0x720   :  { %v838_v53 = vadd.s32 %v837_v4, %v835_v5  ;;  %v875_v58 = vpop.xlane.xlu1 %874 }
 0x721   :  { %v860_v57 = vsel %vm35_vm0, %v859_v54, 0  ;;  %v877_v13 = vpop.xlane.xlu0 %876  ;;  %v878_v0 = vcvt.f32.s32 %v875_v58 }
 0x722   :  { %v861_v14 = vrot.slane %v860_v57, 4  ;;  %v839_v15 = vsel %vm35_vm0, %v838_v53, 0  ;;  %v879_v2 = vcvt.f32.s32 %v877_v13 }
 0x723   :  { %v840_v18 = vrot.slane %v839_v15, 4 }
 0x724   :  { %v862_v19 = vadd.s32 %v861_v14, %v860_v57  ;;  %v880_v63 = vshll.u32 %v879_v2, 16 }
 0x725   :  { %v841_v6 = vadd.s32 %v840_v18, %v839_v15 }
 0x726   :  { %v863_v8 = vrot.slane %v862_v19, 2  ;;  %v881_v26 = vadd.s32 %v880_v63, %v878_v0 }
 0x727   :  { %v842_v7 = vrot.slane %v841_v6, 2 }
 0x728   :  { %v864_v27 = vadd.s32 %v863_v8, %v862_v19  ;;  %v882_v12 = vsel %vm35_vm0, %v881_v26, 0 }
 0x729   :  { %v843_v30 = vadd.s32 %v842_v7, %v841_v6  ;;  %v883_v31 = vrot.slane %v882_v12, 4 }
 0x72a   :  { %v865_v17 = vrot.slane %v864_v27, 1 }
 0x72b   :  { %v844_v16 = vrot.slane %v843_v30, 1  ;;  %v884_v20 = vadd.s32 %v883_v31, %v882_v12 }
 0x72c   :  { %v866_v9 = vadd.s32 %v865_v17, %v864_v27 }
 0x72d   :  { %v845_v34 = vadd.s32 %v844_v16, %v843_v30  ;;  %v885_v36 = vrot.slane %v884_v20, 2 }
 0x72f   :  { %v867_v38 = vadd.s32 %v866_v9, %v845_v34  ;;  %vm890_vm12 = vcmp.ge.s32.totalorder %v2326_v11, %v845_v34  ;;  %v886_v39 = vadd.s32 %v885_v36, %v884_v20 }
 0x730   :  { %v900_v21 = vsel %vm890_vm12, %v845_v34, 0  ;;  %v893_v25 = vsel %vm890_vm12, 1, %v1950_v3 }
 0x731   :  { %vm891_vm13 = vcmp.ge.s32.totalorder %v2326_v11, %v867_v38  ;;  %v887_v22 = vrot.slane %v886_v39, 1 }
 0x732   :  { %v901_v29 = vsel %vm891_vm13, %v867_v38, %v900_v21  ;;  %v894_v32 = vsel %vm891_vm13, 1, %v1950_v3 }
 0x733   :  { %v888_v28 = vadd.s32 %v887_v22, %v886_v39  ;;  %v895_v42 = vadd.s32 %v894_v32, %v893_v25 }
 0x735   :  { %v889_v33 = vadd.s32 %v888_v28, %v867_v38 }
 0x737   :  { %vm892_vm14 = vcmp.ge.s32.totalorder %v2326_v11, %v889_v33 }
 0x738   :  { %v902_v44 = vsel %vm892_vm14, %v889_v33, %v901_v29  ;;  %v896_v46 = vsel %vm892_vm14, 1, %v1950_v3 }
 0x739   :  { %v2366_v35 = vsub.s32 %v2326_v11, %v902_v44  ;;  %v897_v40 = vadd.s32 %v896_v46, %v895_v42 }
 0x73b   :  { %v898_v41 = vshll.u32 %v897_v40, 12 }
 0x73d   :  { %v2370_v49 = vor.u32 %v898_v41, %v2330_v23  ;;  %vm904_vm1 = vcmp.eq.s32.totalorder %v2323_v10, %v898_v41 }
 0x73e   :  { %vm2376_vm3 = vmand %vm2336_vm7, %vm904_vm1 }
 0x73f   :  { %vm910_vm5 = vmand %vm2376_vm3, %vm909_vm15 }
 0x740   :  { %v934_v11 = vsel %vm910_vm5, 1, %v1950_v3  ;;  %vm908_vm6 = vmand %vm2376_vm3, %vm907_vm2 }
 0x741   :  { %v935_v10 = vsel %vm35_vm0, %v934_v11, 0  ;;  %v913_v23 = vsel %vm908_vm6, 1, %v1950_v3  ;;  %vm912_vm7 = vmand %vm2376_vm3, %vm911_vm4 }
 0x742   :  { %v937_v24 = vshrl.u32 %v935_v10, 16  ;;  %v914_v51 = vsel %vm35_vm0, %v913_v23, 0  ;;  %v956_v52 = vsel %vm912_vm7, 1, %v1950_v3  ;;  %v936_v45 = vand.u32 65535, %v935_v10 }
 0x743   :  { %v916_v55 = vshrl.u32 %v914_v51, 16  ;;  %v915_v47 = vand.u32 65535, %v914_v51  ;;  %v957_v48 = vsel %vm35_vm0, %v956_v52, 0 }
 0x744   :  { %v939_v56 = vcvt.s32.f32 %v937_v24  ;;  %v938_v59 = vcvt.s32.f32 %v936_v45  ;;  %v958_v60 = vand.u32 65535, %v957_v48  ;;  %v959_v62 = vshrl.u32 %v957_v48, 16 }
 0x745   :  { %v918_v43 = vcvt.s32.f32 %v916_v55  ;;  %v917_v61 = vcvt.s32.f32 %v915_v47  ;;  %v2403_v45 = vand.u32 768, %v1981_v1 }
 0x746   :  { %942 = vadd.xlane.f32.xlu1 %v939_v56  ;;  %v960_v4 = vcvt.s32.f32 %v958_v60  ;;  %v961_v5 = vcvt.s32.f32 %v959_v62 }
 0x747   :  { %921 = vadd.xlane.f32.xlu0 %v918_v43  ;;  %vm997_vm11 = vcmp.eq.s32.totalorder %v2403_v45, 256  ;;  %vm995_vm13 = vcmp.eq.s32.totalorder %v2403_v45, 0  ;;  %vm999_vm15 = vcmp.eq.s32.totalorder %v2403_v45, 512 }
 0x74a   :  { %940 = vadd.xlane.f32.xlu1 %v938_v59 }
 0x74b   :  { %919 = vadd.xlane.f32.xlu0 %v917_v61 }
 0x74e   :  { %962 = vadd.xlane.f32.xlu1 %v960_v4 }
 0x74f   :  { %964 = vadd.xlane.f32.xlu0 %v961_v5 }
 0x7cf   :  { %v943_v54 = vpop.xlane.xlu1 %942 }
 0x7d0   :  { %v945_v53 = vcvt.f32.s32 %v943_v54  ;;  %v922_v57 = vpop.xlane.xlu0 %921 }
 0x7d1   :  { %v924_v58 = vcvt.f32.s32 %v922_v57 }
 0x7d2   :  { %v946_v14 = vshll.u32 %v945_v53, 16 }
 0x7d3   :  { %v941_v13 = vpop.xlane.xlu1 %940  ;;  %v925_v18 = vshll.u32 %v924_v58, 16 }
 0x7d4   :  { %v944_v15 = vcvt.f32.s32 %v941_v13  ;;  %v920_v2 = vpop.xlane.xlu0 %919 }
 0x7d5   :  { %v923_v19 = vcvt.f32.s32 %v920_v2 }
 0x7d6   :  { %v947_v0 = vadd.s32 %v946_v14, %v944_v15 }
 0x7d7   :  { %v926_v63 = vadd.s32 %v925_v18, %v923_v19  ;;  %v963_v8 = vpop.xlane.xlu1 %962 }
 0x7d8   :  { %v948_v6 = vsel %vm35_vm0, %v947_v0, 0  ;;  %v965_v26 = vpop.xlane.xlu0 %964  ;;  %v966_v17 = vcvt.f32.s32 %v963_v8 }
 0x7d9   :  { %v949_v7 = vrot.slane %v948_v6, 4  ;;  %v927_v27 = vsel %vm35_vm0, %v926_v63, 0  ;;  %v967_v12 = vcvt.f32.s32 %v965_v26 }
 0x7da   :  { %v928_v30 = vrot.slane %v927_v27, 4 }
 0x7db   :  { %v950_v31 = vadd.s32 %v949_v7, %v948_v6  ;;  %v968_v16 = vshll.u32 %v967_v12, 16 }
 0x7dc   :  { %v929_v20 = vadd.s32 %v928_v30, %v927_v27 }
 0x7dd   :  { %v951_v9 = vrot.slane %v950_v31, 2  ;;  %v969_v34 = vadd.s32 %v968_v16, %v966_v17 }
 0x7de   :  { %v930_v36 = vrot.slane %v929_v20, 2 }
 0x7df   :  { %v952_v38 = vadd.s32 %v951_v9, %v950_v31  ;;  %v970_v39 = vsel %vm35_vm0, %v969_v34, 0 }
 0x7e0   :  { %v931_v21 = vadd.s32 %v930_v36, %v929_v20  ;;  %v971_v22 = vrot.slane %v970_v39, 4 }
 0x7e1   :  { %v953_v29 = vrot.slane %v952_v38, 1 }
 0x7e2   :  { %v932_v28 = vrot.slane %v931_v21, 1  ;;  %v972_v32 = vadd.s32 %v971_v22, %v970_v39 }
 0x7e3   :  { %v954_v33 = vadd.s32 %v953_v29, %v952_v38 }
 0x7e4   :  { %v933_v25 = vadd.s32 %v932_v28, %v931_v21  ;;  %v973_v42 = vrot.slane %v972_v32, 2 }
 0x7e6   :  { %v955_v44 = vadd.s32 %v954_v33, %v933_v25  ;;  %vm978_vm8 = vcmp.ge.s32.totalorder %v2366_v35, %v933_v25  ;;  %v974_v46 = vadd.s32 %v973_v42, %v972_v32 }
 0x7e7   :  { %v988_v40 = vsel %vm978_vm8, %v933_v25, 0  ;;  %v981_v51 = vsel %vm978_vm8, 1, %v1950_v3 }
 0x7e8   :  { %vm979_vm9 = vcmp.ge.s32.totalorder %v2366_v35, %v955_v44  ;;  %v975_v41 = vrot.slane %v974_v46, 1 }
 0x7e9   :  { %v989_v11 = vsel %vm979_vm9, %v955_v44, %v988_v40  ;;  %v982_v23 = vsel %vm979_vm9, 1, %v1950_v3 }
 0x7ea   :  { %v976_v10 = vadd.s32 %v975_v41, %v974_v46  ;;  %v983_v52 = vadd.s32 %v982_v23, %v981_v51 }
 0x7ec   :  { %v977_v24 = vadd.s32 %v976_v10, %v955_v44 }
 0x7ee   :  { %vm980_vm10 = vcmp.ge.s32.totalorder %v2366_v35, %v977_v24 }
 0x7ef   :  { %v990_v55 = vsel %vm980_vm10, %v977_v24, %v989_v11  ;;  %v984_v56 = vsel %vm980_vm10, 1, %v1950_v3 }
 0x7f0   :  { %v2406_v43 = vsub.s32 %v2366_v35, %v990_v55  ;;  %v985_v47 = vadd.s32 %v984_v56, %v983_v52 }
 0x7f2   :  { %v986_v48 = vshll.u32 %v985_v47, 10 }
 0x7f4   :  { %v2410_v59 = vor.u32 %v986_v48, %v2370_v49  ;;  %vm992_vm12 = vcmp.eq.s32.totalorder %v2363_v37, %v986_v48 }
 0x7f5   :  { %vm2416_vm14 = vmand %vm2376_vm3, %vm992_vm12 }
 0x7f6   :  { %vm998_vm1 = vmand %vm2416_vm14, %vm997_vm11 }
 0x7f7   :  { %v1022_v35 = vsel %vm998_vm1, 1, %v1950_v3  ;;  %vm996_vm2 = vmand %vm2416_vm14, %vm995_vm13 }
 0x7f8   :  { %v1023_v37 = vsel %vm35_vm0, %v1022_v35, 0  ;;  %v1001_v49 = vsel %vm996_vm2, 1, %v1950_v3  ;;  %vm1000_vm3 = vmand %vm2416_vm14, %vm999_vm15 }
 0x7f9   :  { %v1025_v50 = vshrl.u32 %v1023_v37, 16  ;;  %v1002_v61 = vsel %vm35_vm0, %v1001_v49, 0  ;;  %v1044_v62 = vsel %vm1000_vm3, 1, %v1950_v3  ;;  %v1024_v54 = vand.u32 65535, %v1023_v37 }
 0x7fa   :  { %v1004_v4 = vshrl.u32 %v1002_v61, 16  ;;  %v1003_v57 = vand.u32 65535, %v1002_v61  ;;  %v1045_v58 = vsel %vm35_vm0, %v1044_v62, 0 }
 0x7fb   :  { %v1027_v5 = vcvt.s32.f32 %v1025_v50  ;;  %v1026_v13 = vcvt.s32.f32 %v1024_v54  ;;  %v1046_v14 = vand.u32 65535, %v1045_v58  ;;  %v1047_v2 = vshrl.u32 %v1045_v58, 16 }
 0x7fc   :  { %v1006_v53 = vcvt.s32.f32 %v1004_v4  ;;  %v1005_v15 = vcvt.s32.f32 %v1003_v57  ;;  %v2443_v54 = vand.u32 192, %v1981_v1 }
 0x7fd   :  { %1030 = vadd.xlane.f32.xlu1 %v1027_v5  ;;  %v1048_v18 = vcvt.s32.f32 %v1046_v14  ;;  %v1049_v19 = vcvt.s32.f32 %v1047_v2 }
 0x7fe   :  { %1009 = vadd.xlane.f32.xlu0 %v1006_v53  ;;  %vm1085_vm7 = vcmp.eq.s32.totalorder %v2443_v54, 64  ;;  %vm1083_vm9 = vcmp.eq.s32.totalorder %v2443_v54, 0  ;;  %vm1087_vm11 = vcmp.eq.s32.totalorder %v2443_v54, 128 }
 0x801   :  { %1028 = vadd.xlane.f32.xlu1 %v1026_v13 }
 0x802   :  { %1007 = vadd.xlane.f32.xlu0 %v1005_v15 }
 0x805   :  { %1050 = vadd.xlane.f32.xlu1 %v1048_v18 }
 0x806   :  { %1052 = vadd.xlane.f32.xlu0 %v1049_v19 }
 0x886   :  { %v1031_v0 = vpop.xlane.xlu1 %1030 }
 0x887   :  { %v1033_v63 = vcvt.f32.s32 %v1031_v0  ;;  %v1010_v6 = vpop.xlane.xlu0 %1009 }
 0x888   :  { %v1012_v8 = vcvt.f32.s32 %v1010_v6 }
 0x889   :  { %v1034_v7 = vshll.u32 %v1033_v63, 16 }
 0x88a   :  { %v1029_v26 = vpop.xlane.xlu1 %1028  ;;  %v1013_v30 = vshll.u32 %v1012_v8, 16 }
 0x88b   :  { %v1032_v27 = vcvt.f32.s32 %v1029_v26  ;;  %v1008_v12 = vpop.xlane.xlu0 %1007 }
 0x88c   :  { %v1011_v31 = vcvt.f32.s32 %v1008_v12 }
 0x88d   :  { %v1035_v17 = vadd.s32 %v1034_v7, %v1032_v27 }
 0x88e   :  { %v1014_v16 = vadd.s32 %v1013_v30, %v1011_v31  ;;  %v1051_v9 = vpop.xlane.xlu1 %1050 }
 0x88f   :  { %v1036_v20 = vsel %vm35_vm0, %v1035_v17, 0  ;;  %v1053_v34 = vpop.xlane.xlu0 %1052  ;;  %v1054_v29 = vcvt.f32.s32 %v1051_v9 }
 0x890   :  { %v1037_v36 = vrot.slane %v1036_v20, 4  ;;  %v1015_v38 = vsel %vm35_vm0, %v1014_v16, 0  ;;  %v1055_v39 = vcvt.f32.s32 %v1053_v34 }
 0x891   :  { %v1016_v21 = vrot.slane %v1015_v38, 4 }
 0x892   :  { %v1038_v22 = vadd.s32 %v1037_v36, %v1036_v20  ;;  %v1056_v28 = vshll.u32 %v1055_v39, 16 }
 0x893   :  { %v1017_v32 = vadd.s32 %v1016_v21, %v1015_v38 }
 0x894   :  { %v1039_v33 = vrot.slane %v1038_v22, 2  ;;  %v1057_v25 = vadd.s32 %v1056_v28, %v1054_v29 }
 0x895   :  { %v1018_v42 = vrot.slane %v1017_v32, 2 }
 0x896   :  { %v1040_v44 = vadd.s32 %v1039_v33, %v1038_v22  ;;  %v1058_v46 = vsel %vm35_vm0, %v1057_v25, 0 }
 0x897   :  { %v1019_v40 = vadd.s32 %v1018_v42, %v1017_v32  ;;  %v1059_v41 = vrot.slane %v1058_v46, 4 }
 0x898   :  { %v1041_v11 = vrot.slane %v1040_v44, 1 }
 0x899   :  { %v1020_v10 = vrot.slane %v1019_v40, 1  ;;  %v1060_v23 = vadd.s32 %v1059_v41, %v1058_v46 }
 0x89a   :  { %v1042_v24 = vadd.s32 %v1041_v11, %v1040_v44 }
 0x89b   :  { %v1021_v51 = vadd.s32 %v1020_v10, %v1019_v40  ;;  %v1061_v52 = vrot.slane %v1060_v23, 2 }
 0x89d   :  { %v1043_v55 = vadd.s32 %v1042_v24, %v1021_v51  ;;  %vm1066_vm4 = vcmp.ge.s32.totalorder %v2406_v43, %v1021_v51  ;;  %v1062_v56 = vadd.s32 %v1061_v52, %v1060_v23 }
 0x89e   :  { %v1076_v47 = vsel %vm1066_vm4, %v1021_v51, 0  ;;  %v1069_v61 = vsel %vm1066_vm4, 1, %v1950_v3 }
 0x89f   :  { %vm1067_vm5 = vcmp.ge.s32.totalorder %v2406_v43, %v1043_v55  ;;  %v1063_v48 = vrot.slane %v1062_v56, 1 }
 0x8a0   :  { %v1077_v35 = vsel %vm1067_vm5, %v1043_v55, %v1076_v47  ;;  %v1070_v49 = vsel %vm1067_vm5, 1, %v1950_v3 }
 0x8a1   :  { %v1064_v37 = vadd.s32 %v1063_v48, %v1062_v56  ;;  %v1071_v62 = vadd.s32 %v1070_v49, %v1069_v61 }
 0x8a3   :  { %v1065_v50 = vadd.s32 %v1064_v37, %v1043_v55 }
 0x8a5   :  { %vm1068_vm6 = vcmp.ge.s32.totalorder %v2406_v43, %v1065_v50 }
 0x8a6   :  { %v1078_v4 = vsel %vm1068_vm6, %v1065_v50, %v1077_v35  ;;  %v1072_v5 = vsel %vm1068_vm6, 1, %v1950_v3 }
 0x8a7   :  { %v2446_v53 = vsub.s32 %v2406_v43, %v1078_v4  ;;  %v1073_v57 = vadd.s32 %v1072_v5, %v1071_v62 }
 0x8a9   :  { %v1074_v58 = vshll.u32 %v1073_v57, 8 }
 0x8ab   :  { %v2450_v13 = vor.u32 %v1074_v58, %v2410_v59  ;;  %vm1080_vm8 = vcmp.eq.s32.totalorder %v2403_v45, %v1074_v58 }
 0x8ac   :  { %vm2456_vm10 = vmand %vm2416_vm14, %vm1080_vm8 }
 0x8ad   :  { %vm1086_vm12 = vmand %vm2456_vm10, %vm1085_vm7 }
 0x8ae   :  { %v1110_v43 = vsel %vm1086_vm12, 1, %v1950_v3  ;;  %vm1084_vm13 = vmand %vm2456_vm10, %vm1083_vm9 }
 0x8af   :  { %v1111_v45 = vsel %vm35_vm0, %v1110_v43, 0  ;;  %v1089_v59 = vsel %vm1084_vm13, 1, %v1950_v3  ;;  %vm1088_vm14 = vmand %vm2456_vm10, %vm1087_vm11 }
 0x8b0   :  { %v1113_v60 = vshrl.u32 %v1111_v45, 16  ;;  %v1090_v15 = vsel %vm35_vm0, %v1089_v59, 0  ;;  %v1132_v2 = vsel %vm1088_vm14, 1, %v1950_v3  ;;  %v1112_v0 = vand.u32 65535, %v1111_v45 }
 0x8b1   :  { %v1092_v18 = vshrl.u32 %v1090_v15, 16  ;;  %v1091_v6 = vand.u32 65535, %v1090_v15  ;;  %v1133_v8 = vsel %vm35_vm0, %v1132_v2, 0 }
 0x8b2   :  { %v1115_v19 = vcvt.s32.f32 %v1113_v60  ;;  %v1114_v26 = vcvt.s32.f32 %v1112_v0  ;;  %v1134_v7 = vand.u32 65535, %v1133_v8  ;;  %v1135_v12 = vshrl.u32 %v1133_v8, 16 }
 0x8b3   :  { %v1094_v63 = vcvt.s32.f32 %v1092_v18  ;;  %v1093_v27 = vcvt.s32.f32 %v1091_v6  ;;  %v2483_v0 = vand.u32 48, %v1981_v1 }
 0x8b4   :  { %1118 = vadd.xlane.f32.xlu1 %v1115_v19  ;;  %v1136_v30 = vcvt.s32.f32 %v1134_v7  ;;  %v1137_v31 = vcvt.s32.f32 %v1135_v12 }
 0x8b5   :  { %1097 = vadd.xlane.f32.xlu0 %v1094_v63  ;;  %vm1173_vm3 = vcmp.eq.s32.totalorder %v2483_v0, 16  ;;  %vm1171_vm5 = vcmp.eq.s32.totalorder %v2483_v0, 0  ;;  %vm1175_vm7 = vcmp.eq.s32.totalorder %v2483_v0, 32 }
 0x8b8   :  { %1116 = vadd.xlane.f32.xlu1 %v1114_v26 }
 0x8b9   :  { %1095 = vadd.xlane.f32.xlu0 %v1093_v27 }
 0x8bc   :  { %1138 = vadd.xlane.f32.xlu1 %v1136_v30 }
 0x8bd   :  { %1140 = vadd.xlane.f32.xlu0 %v1137_v31 }
 0x93d   :  { %v1119_v17 = vpop.xlane.xlu1 %1118 }
 0x93e   :  { %v1121_v16 = vcvt.f32.s32 %v1119_v17  ;;  %v1098_v20 = vpop.xlane.xlu0 %1097 }
 0x93f   :  { %v1100_v9 = vcvt.f32.s32 %v1098_v20 }
 0x940   :  { %v1122_v36 = vshll.u32 %v1121_v16, 16 }
 0x941   :  { %v1117_v34 = vpop.xlane.xlu1 %1116  ;;  %v1101_v21 = vshll.u32 %v1100_v9, 16 }
 0x942   :  { %v1120_v38 = vcvt.f32.s32 %v1117_v34  ;;  %v1096_v39 = vpop.xlane.xlu0 %1095 }
 0x943   :  { %v1099_v22 = vcvt.f32.s32 %v1096_v39 }
 0x944   :  { %v1123_v29 = vadd.s32 %v1122_v36, %v1120_v38 }
 0x945   :  { %v1102_v28 = vadd.s32 %v1101_v21, %v1099_v22  ;;  %v1139_v33 = vpop.xlane.xlu1 %1138 }
 0x946   :  { %v1124_v32 = vsel %vm35_vm0, %v1123_v29, 0  ;;  %v1141_v25 = vpop.xlane.xlu0 %1140  ;;  %v1142_v11 = vcvt.f32.s32 %v1139_v33 }
 0x947   :  { %v1125_v42 = vrot.slane %v1124_v32, 4  ;;  %v1103_v44 = vsel %vm35_vm0, %v1102_v28, 0  ;;  %v1143_v46 = vcvt.f32.s32 %v1141_v25 }
 0x948   :  { %v1104_v40 = vrot.slane %v1103_v44, 4 }
 0x949   :  { %v1126_v41 = vadd.s32 %v1125_v42, %v1124_v32  ;;  %v1144_v10 = vshll.u32 %v1143_v46, 16 }
 0x94a   :  { %v1105_v23 = vadd.s32 %v1104_v40, %v1103_v44 }
 0x94b   :  { %v1127_v24 = vrot.slane %v1126_v41, 2  ;;  %v1145_v51 = vadd.s32 %v1144_v10, %v1142_v11 }
 0x94c   :  { %v1106_v52 = vrot.slane %v1105_v23, 2 }
 0x94d   :  { %v1128_v55 = vadd.s32 %v1127_v24, %v1126_v41  ;;  %v1146_v56 = vsel %vm35_vm0, %v1145_v51, 0 }
 0x94e   :  { %v1107_v47 = vadd.s32 %v1106_v52, %v1105_v23  ;;  %v1147_v48 = vrot.slane %v1146_v56, 4 }
 0x94f   :  { %v1129_v35 = vrot.slane %v1128_v55, 1 }
 0x950   :  { %v1108_v37 = vrot.slane %v1107_v47, 1  ;;  %v1148_v49 = vadd.s32 %v1147_v48, %v1146_v56 }
 0x951   :  { %v1130_v50 = vadd.s32 %v1129_v35, %v1128_v55 }
 0x952   :  { %v1109_v61 = vadd.s32 %v1108_v37, %v1107_v47  ;;  %v1149_v62 = vrot.slane %v1148_v49, 2 }
 0x954   :  { %v1131_v4 = vadd.s32 %v1130_v50, %v1109_v61  ;;  %vm1154_vm15 = vcmp.ge.s32.totalorder %v2446_v53, %v1109_v61  ;;  %v1150_v5 = vadd.s32 %v1149_v62, %v1148_v49 }
 0x955   :  { %v1164_v57 = vsel %vm1154_vm15, %v1109_v61, 0  ;;  %v1157_v15 = vsel %vm1154_vm15, 1, %v1950_v3 }
 0x956   :  { %vm1155_vm1 = vcmp.ge.s32.totalorder %v2446_v53, %v1131_v4  ;;  %v1151_v58 = vrot.slane %v1150_v5, 1 }
 0x957   :  { %v1165_v43 = vsel %vm1155_vm1, %v1131_v4, %v1164_v57  ;;  %v1158_v59 = vsel %vm1155_vm1, 1, %v1950_v3 }
 0x958   :  { %v1152_v45 = vadd.s32 %v1151_v58, %v1150_v5  ;;  %v1159_v2 = vadd.s32 %v1158_v59, %v1157_v15 }
 0x95a   :  { %v1153_v60 = vadd.s32 %v1152_v45, %v1131_v4 }
 0x95c   :  { %vm1156_vm2 = vcmp.ge.s32.totalorder %v2446_v53, %v1153_v60 }
 0x95d   :  { %v1166_v18 = vsel %vm1156_vm2, %v1153_v60, %v1165_v43  ;;  %v1160_v19 = vsel %vm1156_vm2, 1, %v1950_v3 }
 0x95e   :  { %v2486_v63 = vsub.s32 %v2446_v53, %v1166_v18  ;;  %v1161_v6 = vadd.s32 %v1160_v19, %v1159_v2 }
 0x960   :  { %v1162_v8 = vshll.u32 %v1161_v6, 6 }
 0x962   :  { %v2490_v26 = vor.u32 %v1162_v8, %v2450_v13  ;;  %vm1168_vm4 = vcmp.eq.s32.totalorder %v2443_v54, %v1162_v8 }
 0x963   :  { %vm2496_vm6 = vmand %vm2456_vm10, %vm1168_vm4 }
 0x964   :  { %vm1174_vm8 = vmand %vm2496_vm6, %vm1173_vm3 }
 0x965   :  { %v1198_v53 = vsel %vm1174_vm8, 1, %v1950_v3  ;;  %vm1172_vm9 = vmand %vm2496_vm6, %vm1171_vm5 }
 0x966   :  { %v1199_v54 = vsel %vm35_vm0, %v1198_v53, 0  ;;  %v1177_v13 = vsel %vm1172_vm9, 1, %v1950_v3  ;;  %vm1176_vm10 = vmand %vm2496_vm6, %vm1175_vm7 }
 0x967   :  { %v1201_v14 = vshrl.u32 %v1199_v54, 16  ;;  %v1178_v27 = vsel %vm35_vm0, %v1177_v13, 0  ;;  %v1220_v12 = vsel %vm1176_vm10, 1, %v1950_v3  ;;  %v1200_v17 = vand.u32 65535, %v1199_v54 }
 0x968   :  { %v1180_v30 = vshrl.u32 %v1178_v27, 16  ;;  %v1179_v20 = vand.u32 65535, %v1178_v27  ;;  %v1221_v9 = vsel %vm35_vm0, %v1220_v12, 0 }
 0x969   :  { %v1203_v31 = vcvt.s32.f32 %v1201_v14  ;;  %v1202_v34 = vcvt.s32.f32 %v1200_v17  ;;  %v1222_v36 = vand.u32 65535, %v1221_v9  ;;  %v1223_v39 = vshrl.u32 %v1221_v9, 16 }
 0x96a   :  { %v1182_v16 = vcvt.s32.f32 %v1180_v30  ;;  %v1181_v38 = vcvt.s32.f32 %v1179_v20  ;;  %v2523_v17 = vand.u32 12, %v1981_v1 }
 0x96b   :  { %1206 = vadd.xlane.f32.xlu1 %v1203_v31  ;;  %v1224_v21 = vcvt.s32.f32 %v1222_v36  ;;  %v1225_v22 = vcvt.s32.f32 %v1223_v39 }
 0x96c   :  { %1185 = vadd.xlane.f32.xlu0 %v1182_v16  ;;  %vm1261_vm14 = vcmp.eq.s32.totalorder %v2523_v17, 4  ;;  %vm1259_vm1 = vcmp.eq.s32.totalorder %v2523_v17, 0  ;;  %vm1263_vm3 = vcmp.eq.s32.totalorder %v2523_v17, 8 }
 0x96f   :  { %1204 = vadd.xlane.f32.xlu1 %v1202_v34 }
 0x970   :  { %1183 = vadd.xlane.f32.xlu0 %v1181_v38 }
 0x973   :  { %1226 = vadd.xlane.f32.xlu1 %v1224_v21 }
 0x974   :  { %1228 = vadd.xlane.f32.xlu0 %v1225_v22 }
 0x9f4   :  { %v1207_v29 = vpop.xlane.xlu1 %1206 }
 0x9f5   :  { %v1209_v28 = vcvt.f32.s32 %v1207_v29  ;;  %v1186_v32 = vpop.xlane.xlu0 %1185 }
 0x9f6   :  { %v1188_v33 = vcvt.f32.s32 %v1186_v32 }
 0x9f7   :  { %v1210_v42 = vshll.u32 %v1209_v28, 16 }
 0x9f8   :  { %v1205_v25 = vpop.xlane.xlu1 %1204  ;;  %v1189_v40 = vshll.u32 %v1188_v33, 16 }
 0x9f9   :  { %v1208_v44 = vcvt.f32.s32 %v1205_v25  ;;  %v1184_v46 = vpop.xlane.xlu0 %1183 }
 0x9fa   :  { %v1187_v41 = vcvt.f32.s32 %v1184_v46 }
 0x9fb   :  { %v1211_v11 = vadd.s32 %v1210_v42, %v1208_v44 }
 0x9fc   :  { %v1190_v10 = vadd.s32 %v1189_v40, %v1187_v41  ;;  %v1227_v24 = vpop.xlane.xlu1 %1226 }
 0x9fd   :  { %v1212_v23 = vsel %vm35_vm0, %v1211_v11, 0  ;;  %v1229_v51 = vpop.xlane.xlu0 %1228  ;;  %v1230_v35 = vcvt.f32.s32 %v1227_v24 }
 0x9fe   :  { %v1213_v52 = vrot.slane %v1212_v23, 4  ;;  %v1191_v55 = vsel %vm35_vm0, %v1190_v10, 0  ;;  %v1231_v56 = vcvt.f32.s32 %v1229_v51 }
 0x9ff   :  { %v1192_v47 = vrot.slane %v1191_v55, 4 }
 0xa00   :  { %v1214_v48 = vadd.s32 %v1213_v52, %v1212_v23  ;;  %v1232_v37 = vshll.u32 %v1231_v56, 16 }
 0xa01   :  { %v1193_v49 = vadd.s32 %v1192_v47, %v1191_v55 }
 0xa02   :  { %v1215_v50 = vrot.slane %v1214_v48, 2  ;;  %v1233_v61 = vadd.s32 %v1232_v37, %v1230_v35 }
 0xa03   :  { %v1194_v62 = vrot.slane %v1193_v49, 2 }
 0xa04   :  { %v1216_v4 = vadd.s32 %v1215_v50, %v1214_v48  ;;  %v1234_v5 = vsel %vm35_vm0, %v1233_v61, 0 }
 0xa05   :  { %v1195_v57 = vadd.s32 %v1194_v62, %v1193_v49  ;;  %v1235_v58 = vrot.slane %v1234_v5, 4 }
 0xa06   :  { %v1217_v43 = vrot.slane %v1216_v4, 1 }
 0xa07   :  { %v1196_v45 = vrot.slane %v1195_v57, 1  ;;  %v1236_v59 = vadd.s32 %v1235_v58, %v1234_v5 }
 0xa08   :  { %v1218_v60 = vadd.s32 %v1217_v43, %v1216_v4 }
 0xa09   :  { %v1197_v15 = vadd.s32 %v1196_v45, %v1195_v57  ;;  %v1237_v2 = vrot.slane %v1236_v59, 2 }
 0xa0b   :  { %v1219_v18 = vadd.s32 %v1218_v60, %v1197_v15  ;;  %vm1242_vm11 = vcmp.ge.s32.totalorder %v2486_v63, %v1197_v15  ;;  %v1238_v19 = vadd.s32 %v1237_v2, %v1236_v59 }
 0xa0c   :  { %v1252_v6 = vsel %vm1242_vm11, %v1197_v15, 0  ;;  %v1245_v27 = vsel %vm1242_vm11, 1, %v1950_v3 }
 0xa0d   :  { %vm1243_vm12 = vcmp.ge.s32.totalorder %v2486_v63, %v1219_v18  ;;  %v1239_v8 = vrot.slane %v1238_v19, 1 }
 0xa0e   :  { %v1253_v53 = vsel %vm1243_vm12, %v1219_v18, %v1252_v6  ;;  %v1246_v13 = vsel %vm1243_vm12, 1, %v1950_v3 }
 0xa0f   :  { %v1240_v54 = vadd.s32 %v1239_v8, %v1238_v19  ;;  %v1247_v12 = vadd.s32 %v1246_v13, %v1245_v27 }
 0xa11   :  { %v1241_v14 = vadd.s32 %v1240_v54, %v1219_v18 }
 0xa13   :  { %vm1244_vm13 = vcmp.ge.s32.totalorder %v2486_v63, %v1241_v14 }
 0xa14   :  { %v1254_v30 = vsel %vm1244_vm13, %v1241_v14, %v1253_v53  ;;  %v1248_v31 = vsel %vm1244_vm13, 1, %v1950_v3 }
 0xa15   :  { %v2526_v16 = vsub.s32 %v2486_v63, %v1254_v30  ;;  %v1249_v20 = vadd.s32 %v1248_v31, %v1247_v12 }
 0xa17   :  { %v1250_v9 = vshll.u32 %v1249_v20, 4 }
 0xa19   :  { %v2530_v34 = vor.u32 %v1250_v9, %v2490_v26  ;;  %vm1256_vm15 = vcmp.eq.s32.totalorder %v2483_v0, %v1250_v9 }
 0xa1a   :  { %vm2536_vm2 = vmand %vm2496_vm6, %vm1256_vm15 }
 0xa1b   :  { %vm1262_vm4 = vmand %vm2536_vm2, %vm1261_vm14 }
 0xa1c   :  { %v1286_v63 = vsel %vm1262_vm4, 1, %v1950_v3  ;;  %vm1260_vm5 = vmand %vm2536_vm2, %vm1259_vm1 }
 0xa1d   :  { %v1287_v0 = vsel %vm35_vm0, %v1286_v63, 0  ;;  %v1265_v26 = vsel %vm1260_vm5, 1, %v1950_v3  ;;  %vm1264_vm6 = vmand %vm2536_vm2, %vm1263_vm3 }
 0xa1e   :  { %v1289_v7 = vshrl.u32 %v1287_v0, 16  ;;  %v1266_v38 = vsel %vm35_vm0, %v1265_v26, 0  ;;  %v1308_v39 = vsel %vm1264_vm6, 1, %v1950_v3  ;;  %v1288_v29 = vand.u32 65535, %v1287_v0 }
 0xa1f   :  { %v1268_v21 = vshrl.u32 %v1266_v38, 16  ;;  %v1267_v32 = vand.u32 65535, %v1266_v38  ;;  %v1309_v33 = vsel %vm35_vm0, %v1308_v39, 0 }
 0xa20   :  { %v1291_v22 = vcvt.s32.f32 %v1289_v7  ;;  %v1290_v25 = vcvt.s32.f32 %v1288_v29  ;;  %v1310_v42 = vand.u32 65535, %v1309_v33  ;;  %v1311_v46 = vshrl.u32 %v1309_v33, 16 }
 0xa21   :  { %v1270_v28 = vcvt.s32.f32 %v1268_v21  ;;  %v1269_v44 = vcvt.s32.f32 %v1267_v32  ;;  %v2563_v29 = vand.u32 3, %v1981_v1 }
 0xa22   :  { %1294 = vadd.xlane.f32.xlu1 %v1291_v22  ;;  %v1312_v40 = vcvt.s32.f32 %v1310_v42  ;;  %v1313_v41 = vcvt.s32.f32 %v1311_v46 }
 0xa23   :  { %1273 = vadd.xlane.f32.xlu0 %v1270_v28  ;;  %vm1349_vm10 = vcmp.eq.s32.totalorder %v2563_v29, 1  ;;  %vm1347_vm12 = vcmp.eq.s32.totalorder %v2563_v29, 0  ;;  %vm1351_vm14 = vcmp.eq.s32.totalorder %v2563_v29, 2 }
 0xa26   :  { %1292 = vadd.xlane.f32.xlu1 %v1290_v25 }
 0xa27   :  { %1271 = vadd.xlane.f32.xlu0 %v1269_v44 }
 0xa2a   :  { %1314 = vadd.xlane.f32.xlu1 %v1312_v40 }
 0xa2b   :  { %1316 = vadd.xlane.f32.xlu0 %v1313_v41 }
 0xaab   :  { %v1295_v11 = vpop.xlane.xlu1 %1294 }
 0xaac   :  { %v1297_v10 = vcvt.f32.s32 %v1295_v11  ;;  %v1274_v23 = vpop.xlane.xlu0 %1273 }
 0xaad   :  { %v1276_v24 = vcvt.f32.s32 %v1274_v23 }
 0xaae   :  { %v1298_v52 = vshll.u32 %v1297_v10, 16 }
 0xaaf   :  { %v1293_v51 = vpop.xlane.xlu1 %1292  ;;  %v1277_v47 = vshll.u32 %v1276_v24, 16 }
 0xab0   :  { %v1296_v55 = vcvt.f32.s32 %v1293_v51  ;;  %v1272_v56 = vpop.xlane.xlu0 %1271 }
 0xab1   :  { %v1275_v48 = vcvt.f32.s32 %v1272_v56 }
 0xab2   :  { %v1299_v35 = vadd.s32 %v1298_v52, %v1296_v55 }
 0xab3   :  { %v1278_v37 = vadd.s32 %v1277_v47, %v1275_v48  ;;  %v1315_v50 = vpop.xlane.xlu1 %1314 }
 0xab4   :  { %v1300_v49 = vsel %vm35_vm0, %v1299_v35, 0  ;;  %v1317_v61 = vpop.xlane.xlu0 %1316  ;;  %v1318_v43 = vcvt.f32.s32 %v1315_v50 }
 0xab5   :  { %v1301_v62 = vrot.slane %v1300_v49, 4  ;;  %v1279_v4 = vsel %vm35_vm0, %v1278_v37, 0  ;;  %v1319_v5 = vcvt.f32.s32 %v1317_v61 }
 0xab6   :  { %v1280_v57 = vrot.slane %v1279_v4, 4 }
 0xab7   :  { %v1302_v58 = vadd.s32 %v1301_v62, %v1300_v49  ;;  %v1320_v45 = vshll.u32 %v1319_v5, 16 }
 0xab8   :  { %v1281_v59 = vadd.s32 %v1280_v57, %v1279_v4 }
 0xab9   :  { %v1303_v60 = vrot.slane %v1302_v58, 2  ;;  %v1321_v15 = vadd.s32 %v1320_v45, %v1318_v43 }
 0xaba   :  { %v1282_v2 = vrot.slane %v1281_v59, 2 }
 0xabb   :  { %v1304_v18 = vadd.s32 %v1303_v60, %v1302_v58  ;;  %v1322_v19 = vsel %vm35_vm0, %v1321_v15, 0 }
 0xabc   :  { %v1283_v6 = vadd.s32 %v1282_v2, %v1281_v59  ;;  %v1323_v8 = vrot.slane %v1322_v19, 4 }
 0xabd   :  { %v1305_v53 = vrot.slane %v1304_v18, 1 }
 0xabe   :  { %v1284_v54 = vrot.slane %v1283_v6, 1  ;;  %v1324_v13 = vadd.s32 %v1323_v8, %v1322_v19 }
 0xabf   :  { %v1306_v14 = vadd.s32 %v1305_v53, %v1304_v18 }
 0xac0   :  { %v1285_v27 = vadd.s32 %v1284_v54, %v1283_v6  ;;  %v1325_v12 = vrot.slane %v1324_v13, 2 }
 0xac2   :  { %v1307_v30 = vadd.s32 %v1306_v14, %v1285_v27  ;;  %vm1330_vm7 = vcmp.ge.s32.totalorder %v2526_v16, %v1285_v27  ;;  %v1326_v31 = vadd.s32 %v1325_v12, %v1324_v13  ;;  %v1433_v12 = vlaneseq }
 0xac3   :  { %v1340_v20 = vsel %vm1330_vm7, %v1285_v27, 0  ;;  %v1333_v38 = vsel %vm1330_vm7, 1, %v1950_v3 }
 0xac4   :  { %vm1331_vm8 = vcmp.ge.s32.totalorder %v2526_v16, %v1307_v30  ;;  %v1327_v9 = vrot.slane %v1326_v31, 1 }
 0xac5   :  { %v1341_v63 = vsel %vm1331_vm8, %v1307_v30, %v1340_v20  ;;  %v1334_v26 = vsel %vm1331_vm8, 1, %v1950_v3 }
 0xac6   :  { %v1328_v0 = vadd.s32 %v1327_v9, %v1326_v31  ;;  %v1335_v39 = vadd.s32 %v1334_v26, %v1333_v38  ;;  %v1434_v26 = vshrl.u32 %v1433_v12, 7 }
 0xac8   :  { %v1329_v7 = vadd.s32 %v1328_v0, %v1307_v30 }
 0xaca   :  { %vm1332_vm9 = vcmp.ge.s32.totalorder %v2526_v16, %v1329_v7 }
 0xacb   :  { %v1342_v21 = vsel %vm1332_vm9, %v1329_v7, %v1341_v63  ;;  %v1336_v22 = vsel %vm1332_vm9, 1, %v1950_v3 }
 0xacc   :  { %v2566_v28 = vsub.s32 %v2526_v16, %v1342_v21  ;;  %v1337_v32 = vadd.s32 %v1336_v22, %v1335_v39 }
 0xace   :  { %v1338_v33 = vshll.u32 %v1337_v32, 2  ;;  %v1436_v32 = vand.u32 127, %v1433_v12 }
 0xad0   :  { %v2570_v25 = vor.u32 %v1338_v33, %v2530_v34  ;;  %vm1344_vm11 = vcmp.eq.s32.totalorder %v2523_v17, %v1338_v33  ;;  %v1437_v33 = vmul.u32 128, %v1434_v26 }
 0xad1   :  { %vm2576_vm13 = vmand %vm2536_vm2, %vm1344_vm11 }
 0xad2   :  { %vm1350_vm15 = vmand %vm2576_vm13, %vm1349_vm10 }
 0xad3   :  { %v1374_v16 = vsel %vm1350_vm15, 1, %v1950_v3  ;;  %vm1348_vm1 = vmand %vm2576_vm13, %vm1347_vm12 }
 0xad4   :  { %v1375_v17 = vsel %vm35_vm0, %v1374_v16, 0  ;;  %v1353_v34 = vsel %vm1348_vm1, 1, %v1950_v3  ;;  %vm1352_vm2 = vmand %vm2576_vm13, %vm1351_vm14 }
 0xad5   :  { %v1377_v36 = vshrl.u32 %v1375_v17, 16  ;;  %v1354_v44 = vsel %vm35_vm0, %v1353_v34, 0  ;;  %v1396_v46 = vsel %vm1352_vm2, 1, %v1950_v3  ;;  %v1376_v11 = vand.u32 65535, %v1375_v17 }
 0xad6   :  { %v1356_v40 = vshrl.u32 %v1354_v44, 16  ;;  %v1355_v23 = vand.u32 65535, %v1354_v44  ;;  %v1397_v24 = vsel %vm35_vm0, %v1396_v46, 0  ;;  %v2598_v46 = vadd.s32 %v1437_v33, %v1436_v32 }
 0xad7   :  { %v1379_v41 = vcvt.s32.f32 %v1377_v36  ;;  %v1378_v51 = vcvt.s32.f32 %v1376_v11  ;;  %v1398_v52 = vand.u32 65535, %v1397_v24  ;;  %v1399_v56 = vshrl.u32 %v1397_v24, 16 }
 0xad8   :  { %v1358_v10 = vcvt.s32.f32 %v1356_v40  ;;  %v1357_v55 = vcvt.s32.f32 %v1355_v23  ;;  %v2603_v23 = vand.u32 768, %v2598_v46 }
 0xad9   :  { %1382 = vadd.xlane.f32.xlu1 %v1379_v41  ;;  %v1400_v47 = vcvt.s32.f32 %v1398_v52  ;;  %v1401_v48 = vcvt.s32.f32 %v1399_v56 }
 0xada   :  { %1361 = vadd.xlane.f32.xlu0 %v1358_v10  ;;  %vm1442_vm6 = vcmp.eq.s32.totalorder %v2603_v23, 256  ;;  %vm1440_vm8 = vcmp.eq.s32.totalorder %v2603_v23, 0  ;;  %vm1444_vm10 = vcmp.eq.s32.totalorder %v2603_v23, 512 }
 0xadd   :  { %1380 = vadd.xlane.f32.xlu1 %v1378_v51 }
 0xade   :  { %1359 = vadd.xlane.f32.xlu0 %v1357_v55 }
 0xae1   :  { %1402 = vadd.xlane.f32.xlu1 %v1400_v47 }
 0xae2   :  { %1404 = vadd.xlane.f32.xlu0 %v1401_v48 }
 0xb62   :  { %v1383_v35 = vpop.xlane.xlu1 %1382 }
 0xb63   :  { %v1385_v37 = vcvt.f32.s32 %v1383_v35  ;;  %v1362_v49 = vpop.xlane.xlu0 %1361 }
 0xb64   :  { %v1364_v50 = vcvt.f32.s32 %v1362_v49 }
 0xb65   :  { %v1386_v62 = vshll.u32 %v1385_v37, 16 }
 0xb66   :  { %v1381_v61 = vpop.xlane.xlu1 %1380  ;;  %v1365_v57 = vshll.u32 %v1364_v50, 16 }
 0xb67   :  { %v1384_v4 = vcvt.f32.s32 %v1381_v61  ;;  %v1360_v5 = vpop.xlane.xlu0 %1359 }
 0xb68   :  { %v1363_v58 = vcvt.f32.s32 %v1360_v5 }
 0xb69   :  { %v1387_v43 = vadd.s32 %v1386_v62, %v1384_v4 }
 0xb6a   :  { %v1366_v45 = vadd.s32 %v1365_v57, %v1363_v58  ;;  %v1403_v60 = vpop.xlane.xlu1 %1402 }
 0xb6b   :  { %v1388_v59 = vsel %vm35_vm0, %v1387_v43, 0  ;;  %v1405_v15 = vpop.xlane.xlu0 %1404  ;;  %v1406_v53 = vcvt.f32.s32 %v1403_v60 }
 0xb6c   :  { %v1389_v2 = vrot.slane %v1388_v59, 4  ;;  %v1367_v18 = vsel %vm35_vm0, %v1366_v45, 0  ;;  %v1407_v19 = vcvt.f32.s32 %v1405_v15 }
 0xb6d   :  { %v1368_v6 = vrot.slane %v1367_v18, 4 }
 0xb6e   :  { %v1390_v8 = vadd.s32 %v1389_v2, %v1388_v59  ;;  %v1408_v54 = vshll.u32 %v1407_v19, 16 }
 0xb6f   :  { %v1369_v13 = vadd.s32 %v1368_v6, %v1367_v18 }
 0xb70   :  { %v1391_v14 = vrot.slane %v1390_v8, 2  ;;  %v1409_v27 = vadd.s32 %v1408_v54, %v1406_v53 }
 0xb71   :  { %v1370_v30 = vrot.slane %v1369_v13, 2 }
 0xb72   :  { %v1392_v31 = vadd.s32 %v1391_v14, %v1390_v8  ;;  %v1410_v20 = vsel %vm35_vm0, %v1409_v27, 0 }
 0xb73   :  { %v1371_v9 = vadd.s32 %v1370_v30, %v1369_v13  ;;  %v1411_v63 = vrot.slane %v1410_v20, 4 }
 0xb74   :  { %v1393_v0 = vrot.slane %v1392_v31, 1 }
 0xb75   :  { %v1372_v7 = vrot.slane %v1371_v9, 1  ;;  %v1412_v38 = vadd.s32 %v1411_v63, %v1410_v20 }
 0xb76   :  { %v1394_v39 = vadd.s32 %v1393_v0, %v1392_v31 }
 0xb77   :  { %v1373_v21 = vadd.s32 %v1372_v7, %v1371_v9  ;;  %v1413_v22 = vrot.slane %v1412_v38, 2 }
 0xb79   :  { %v1395_v16 = vadd.s32 %v1394_v39, %v1373_v21  ;;  %vm1418_vm3 = vcmp.ge.s32.totalorder %v2566_v28, %v1373_v21  ;;  %v1414_v17 = vadd.s32 %v1413_v22, %v1412_v38 }
 0xb7a   :  { %v1427_v34 = vsel %vm1418_vm3, %v1373_v21, 0  ;;  %v1421_v10 = vsel %vm1418_vm3, 1, %v1950_v3 }
 0xb7b   :  { %vm1419_vm4 = vcmp.ge.s32.totalorder %v2566_v28, %v1395_v16  ;;  %v1415_v36 = vrot.slane %v1414_v17, 1 }
 0xb7c   :  { %v1428_v44 = vsel %vm1419_vm4, %v1395_v16, %v1427_v34  ;;  %v1422_v41 = vsel %vm1419_vm4, 1, %v1950_v3 }
 0xb7d   :  { %v1416_v40 = vadd.s32 %v1415_v36, %v1414_v17  ;;  %v1423_v24 = vadd.s32 %v1422_v41, %v1421_v10 }
 0xb7f   :  { %v1417_v11 = vadd.s32 %v1416_v40, %v1395_v16 }
 0xb81   :  { %vm1420_vm5 = vcmp.ge.s32.totalorder %v2566_v28, %v1417_v11 }
 0xb82   :  { %v1424_v51 = vsel %vm1420_vm5, 1, %v1950_v3  ;;  %v1429_v52 = vsel %vm1420_vm5, %v1417_v11, %v1428_v44 }
 0xb83   :  { %v2608_v55 = vsub.s32 %v2566_v28, %v1429_v52  ;;  %v2610_v56 = vadd.s32 %v1424_v51, %v1423_v24 }
 0xb85   :  { %v1426_v47 = vor.u32 %v2610_v56, %v2570_v25  ;;  %vm1431_vm7 = vcmp.eq.s32.totalorder %v2563_v29, %v2610_v56 }
 0xb86   :  { %vm2620_vm9 = vmand %vm2576_vm13, %vm1431_vm7 }
 0xb87   :  { %vm1443_vm11 = vmand %vm2620_vm9, %vm1442_vm6 }
 0xb88   :  { %v1467_v28 = vsel %vm1443_vm11, 1, %v1950_v3  ;;  %vm1441_vm12 = vmand %vm2620_vm9, %vm1440_vm8 }
 0xb89   :  { %v1468_v29 = vsel %vm35_vm0, %v1467_v28, 0  ;;  %v1446_v35 = vsel %vm1441_vm12, 1, %v1950_v3  ;;  %vm1445_vm13 = vmand %vm2620_vm9, %vm1444_vm10 }
 0xb8a   :  { %v1470_v42 = vshrl.u32 %v1468_v29, 16  ;;  %v1447_v37 = vsel %vm35_vm0, %v1446_v35, 0  ;;  %v1489_v49 = vsel %vm1445_vm13, 1, %v1950_v3  ;;  %v1469_v62 = vand.u32 65535, %v1468_v29 }
 0xb8b   :  { %v1449_v50 = vshrl.u32 %v1447_v37, 16  ;;  %v1448_v5 = vand.u32 65535, %v1447_v37  ;;  %v1490_v57 = vsel %vm35_vm0, %v1489_v49, 0 }
 0xb8c   :  { %v1472_v61 = vcvt.s32.f32 %v1470_v42  ;;  %v1471_v58 = vcvt.s32.f32 %v1469_v62  ;;  %v1491_v43 = vand.u32 65535, %v1490_v57  ;;  %v1492_v59 = vshrl.u32 %v1490_v57, 16 }
 0xb8d   :  { %v1451_v4 = vcvt.s32.f32 %v1449_v50  ;;  %v1450_v45 = vcvt.s32.f32 %v1448_v5  ;;  %v2647_v57 = vand.u32 192, %v2598_v46 }
 0xb8e   :  { %1475 = vadd.xlane.f32.xlu1 %v1472_v61  ;;  %v1493_v60 = vcvt.s32.f32 %v1491_v43  ;;  %v1494_v15 = vcvt.s32.f32 %v1492_v59 }
 0xb8f   :  { %1454 = vadd.xlane.f32.xlu0 %v1451_v4  ;;  %vm1529_vm2 = vcmp.eq.s32.totalorder %v2647_v57, 64  ;;  %vm1527_vm4 = vcmp.eq.s32.totalorder %v2647_v57, 0  ;;  %vm1531_vm6 = vcmp.eq.s32.totalorder %v2647_v57, 128 }
 0xb92   :  { %1473 = vadd.xlane.f32.xlu1 %v1471_v58 }
 0xb93   :  { %1452 = vadd.xlane.f32.xlu0 %v1450_v45 }
 0xb96   :  { %1495 = vadd.xlane.f32.xlu1 %v1493_v60 }
 0xb97   :  { %1497 = vadd.xlane.f32.xlu0 %v1494_v15 }
 0xc17   :  { %v1476_v2 = vpop.xlane.xlu1 %1475 }
 0xc18   :  { %v1478_v18 = vcvt.f32.s32 %v1476_v2  ;;  %v1455_v19 = vpop.xlane.xlu0 %1454 }
 0xc19   :  { %v1457_v6 = vcvt.f32.s32 %v1455_v19 }
 0xc1a   :  { %v1479_v53 = vshll.u32 %v1478_v18, 16 }
 0xc1b   :  { %v1474_v8 = vpop.xlane.xlu1 %1473  ;;  %v1458_v14 = vshll.u32 %v1457_v6, 16 }
 0xc1c   :  { %v1477_v54 = vcvt.f32.s32 %v1474_v8  ;;  %v1453_v13 = vpop.xlane.xlu0 %1452 }
 0xc1d   :  { %v1456_v27 = vcvt.f32.s32 %v1453_v13 }
 0xc1e   :  { %v1480_v12 = vadd.s32 %v1479_v53, %v1477_v54 }
 0xc1f   :  { %v1459_v30 = vadd.s32 %v1458_v14, %v1456_v27  ;;  %v1496_v20 = vpop.xlane.xlu1 %1495 }
 0xc20   :  { %v1481_v31 = vsel %vm35_vm0, %v1480_v12, 0  ;;  %v1498_v9 = vpop.xlane.xlu0 %1497  ;;  %v1499_v39 = vcvt.f32.s32 %v1496_v20 }
 0xc21   :  { %v1482_v63 = vrot.slane %v1481_v31, 4  ;;  %v1460_v0 = vsel %vm35_vm0, %v1459_v30, 0  ;;  %v1500_v26 = vcvt.f32.s32 %v1498_v9 }
 0xc22   :  { %v1461_v7 = vrot.slane %v1460_v0, 4 }
 0xc23   :  { %v1483_v38 = vadd.s32 %v1482_v63, %v1481_v31  ;;  %v1501_v21 = vshll.u32 %v1500_v26, 16 }
 0xc24   :  { %v1462_v22 = vadd.s32 %v1461_v7, %v1460_v0 }
 0xc25   :  { %v1484_v32 = vrot.slane %v1483_v38, 2  ;;  %v1502_v33 = vadd.s32 %v1501_v21, %v1499_v39 }
 0xc26   :  { %v1463_v16 = vrot.slane %v1462_v22, 2 }
 0xc27   :  { %v1485_v17 = vadd.s32 %v1484_v32, %v1483_v38  ;;  %v1503_v34 = vsel %vm35_vm0, %v1502_v33, 0 }
 0xc28   :  { %v1464_v36 = vadd.s32 %v1463_v16, %v1462_v22  ;;  %v1504_v44 = vrot.slane %v1503_v34, 4 }
 0xc29   :  { %v1486_v40 = vrot.slane %v1485_v17, 1 }
 0xc2a   :  { %v1465_v41 = vrot.slane %v1464_v36, 1  ;;  %v1505_v11 = vadd.s32 %v1504_v44, %v1503_v34 }
 0xc2b   :  { %v1487_v10 = vadd.s32 %v1486_v40, %v1485_v17 }
 0xc2c   :  { %v1466_v24 = vadd.s32 %v1465_v41, %v1464_v36  ;;  %v1506_v51 = vrot.slane %v1505_v11, 2 }
 0xc2e   :  { %v1488_v52 = vadd.s32 %v1487_v10, %v1466_v24  ;;  %vm1511_vm14 = vcmp.ge.s32.totalorder %v2608_v55, %v1466_v24  ;;  %v1507_v28 = vadd.s32 %v1506_v51, %v1505_v11 }
 0xc2f   :  { %v1520_v29 = vsel %vm1511_vm14, %v1466_v24, 0  ;;  %v1514_v61 = vsel %vm1511_vm14, 1, %v1950_v3 }
 0xc30   :  { %vm1512_vm15 = vcmp.ge.s32.totalorder %v2608_v55, %v1488_v52  ;;  %v1508_v35 = vrot.slane %v1507_v28, 1 }
 0xc31   :  { %v1521_v42 = vsel %vm1512_vm15, %v1488_v52, %v1520_v29  ;;  %v1515_v49 = vsel %vm1512_vm15, 1, %v1950_v3 }
 0xc32   :  { %v1509_v37 = vadd.s32 %v1508_v35, %v1507_v28  ;;  %v1516_v62 = vadd.s32 %v1515_v49, %v1514_v61 }
 0xc34   :  { %v1510_v50 = vadd.s32 %v1509_v37, %v1488_v52 }
 0xc36   :  { %vm1513_vm1 = vcmp.ge.s32.totalorder %v2608_v55, %v1510_v50 }
 0xc37   :  { %v1517_v4 = vsel %vm1513_vm1, 1, %v1950_v3  ;;  %v1522_v5 = vsel %vm1513_vm1, %v1510_v50, %v1521_v42 }
 0xc38   :  { %v2650_v58 = vsub.s32 %v2608_v55, %v1522_v5  ;;  %v2652_v43 = vadd.s32 %v1517_v4, %v1516_v62 }
 0xc3a   :  { %v1519_v45 = vshll.u32 %v2652_v43, 8 }
 0xc3c   :  { %vm1524_vm3 = vcmp.eq.s32.totalorder %v2603_v23, %v1519_v45 }
 0xc3d   :  { %vm2662_vm5 = vmand %vm2620_vm9, %vm1524_vm3 }
 0xc3e   :  { %vm1530_vm7 = vmand %vm2662_vm5, %vm1529_vm2 }
 0xc3f   :  { %v1554_v55 = vsel %vm1530_vm7, 1, %v1950_v3  ;;  %vm1528_vm8 = vmand %vm2662_vm5, %vm1527_vm4 }
 0xc40   :  { %v1555_v23 = vsel %vm35_vm0, %v1554_v55, 0  ;;  %v1533_v60 = vsel %vm1528_vm8, 1, %v1950_v3  ;;  %vm1532_vm10 = vmand %vm2662_vm5, %vm1531_vm6 }
 0xc41   :  { %v1557_v15 = vshrl.u32 %v1555_v23, 16  ;;  %v1534_v2 = vsel %vm35_vm0, %v1533_v60, 0  ;;  %v1576_v18 = vsel %vm1532_vm10, 1, %v1950_v3  ;;  %v1556_v8 = vand.u32 65535, %v1555_v23 }
 0xc42   :  { %v1536_v19 = vshrl.u32 %v1534_v2, 16  ;;  %v1535_v54 = vand.u32 65535, %v1534_v2  ;;  %v1577_v13 = vsel %vm35_vm0, %v1576_v18, 0 }
 0xc43   :  { %v1559_v6 = vcvt.s32.f32 %v1557_v15  ;;  %v1558_v14 = vcvt.s32.f32 %v1556_v8  ;;  %v1578_v27 = vand.u32 65535, %v1577_v13  ;;  %v1579_v30 = vshrl.u32 %v1577_v13, 16 }
 0xc44   :  { %v1538_v53 = vcvt.s32.f32 %v1536_v19  ;;  %v1537_v12 = vcvt.s32.f32 %v1535_v54 }
 0xc45   :  { %1562 = vadd.xlane.f32.xlu1 %v1559_v6  ;;  %v1580_v31 = vcvt.s32.f32 %v1578_v27  ;;  %v1581_v20 = vcvt.s32.f32 %v1579_v30 }
 0xc46   :  { %1541 = vadd.xlane.f32.xlu0 %v1538_v53 }
 0xc49   :  { %1560 = vadd.xlane.f32.xlu1 %v1558_v14 }
 0xc4a   :  { %1539 = vadd.xlane.f32.xlu0 %v1537_v12  ;;  %v2689_v12 = vand.u32 48, %v2598_v46 }
 0xc4c   :  { %vm1617_vm14 = vcmp.eq.s32.totalorder %v2689_v12, 16  ;;  %vm1615_vm1 = vcmp.eq.s32.totalorder %v2689_v12, 0  ;;  %vm1619_vm3 = vcmp.eq.s32.totalorder %v2689_v12, 32 }
 0xc4d   :  { %1582 = vadd.xlane.f32.xlu1 %v1580_v31 }
 0xc4e   :  { %1584 = vadd.xlane.f32.xlu0 %v1581_v20 }
 0xcce   :  { %v1563_v9 = vpop.xlane.xlu1 %1562 }
 0xccf   :  { %v1565_v63 = vcvt.f32.s32 %v1563_v9  ;;  %v1542_v0 = vpop.xlane.xlu0 %1541 }
 0xcd0   :  { %v1544_v26 = vcvt.f32.s32 %v1542_v0 }
 0xcd1   :  { %v1566_v38 = vshll.u32 %v1565_v63, 16 }
 0xcd2   :  { %v1561_v7 = vpop.xlane.xlu1 %1560  ;;  %v1545_v22 = vshll.u32 %v1544_v26, 16 }
 0xcd3   :  { %v1564_v39 = vcvt.f32.s32 %v1561_v7  ;;  %v1540_v21 = vpop.xlane.xlu0 %1539 }
 0xcd4   :  { %v1543_v32 = vcvt.f32.s32 %v1540_v21 }
 0xcd5   :  { %v1567_v33 = vadd.s32 %v1566_v38, %v1564_v39 }
 0xcd6   :  { %v1546_v16 = vadd.s32 %v1545_v22, %v1543_v32  ;;  %v1583_v34 = vpop.xlane.xlu1 %1582 }
 0xcd7   :  { %v1568_v17 = vsel %vm35_vm0, %v1567_v33, 0  ;;  %v1585_v36 = vpop.xlane.xlu0 %1584  ;;  %v1586_v24 = vcvt.f32.s32 %v1583_v34 }
 0xcd8   :  { %v1569_v44 = vrot.slane %v1568_v17, 4  ;;  %v1547_v40 = vsel %vm35_vm0, %v1546_v16, 0  ;;  %v1587_v41 = vcvt.f32.s32 %v1585_v36 }
 0xcd9   :  { %v1548_v11 = vrot.slane %v1547_v40, 4 }
 0xcda   :  { %v1570_v10 = vadd.s32 %v1569_v44, %v1568_v17  ;;  %v1588_v51 = vshll.u32 %v1587_v41, 16 }
 0xcdb   :  { %v1549_v52 = vadd.s32 %v1548_v11, %v1547_v40 }
 0xcdc   :  { %v1571_v28 = vrot.slane %v1570_v10, 2  ;;  %v1589_v29 = vadd.s32 %v1588_v51, %v1586_v24 }
 0xcdd   :  { %v1550_v35 = vrot.slane %v1549_v52, 2 }
 0xcde   :  { %v1572_v42 = vadd.s32 %v1571_v28, %v1570_v10  ;;  %v1590_v37 = vsel %vm35_vm0, %v1589_v29, 0 }
 0xcdf   :  { %v1551_v49 = vadd.s32 %v1550_v35, %v1549_v52  ;;  %v1591_v50 = vrot.slane %v1590_v37, 4 }
 0xce0   :  { %v1573_v61 = vrot.slane %v1572_v42, 1 }
 0xce1   :  { %v1552_v62 = vrot.slane %v1551_v49, 1  ;;  %v1592_v4 = vadd.s32 %v1591_v50, %v1590_v37 }
 0xce2   :  { %v1574_v5 = vadd.s32 %v1573_v61, %v1572_v42 }
 0xce3   :  { %v1553_v55 = vadd.s32 %v1552_v62, %v1551_v49  ;;  %v1593_v23 = vrot.slane %v1592_v4, 2 }
 0xce5   :  { %v1575_v60 = vadd.s32 %v1574_v5, %v1553_v55  ;;  %vm1598_vm11 = vcmp.ge.s32.totalorder %v2650_v58, %v1553_v55  ;;  %v1594_v15 = vadd.s32 %v1593_v23, %v1592_v4 }
 0xce6   :  { %v1608_v2 = vsel %vm1598_vm11, %v1553_v55, 0  ;;  %v1601_v54 = vsel %vm1598_vm11, 1, %v1950_v3 }
 0xce7   :  { %vm1599_vm12 = vcmp.ge.s32.totalorder %v2650_v58, %v1575_v60  ;;  %v1595_v18 = vrot.slane %v1594_v15, 1 }
 0xce8   :  { %v1609_v19 = vsel %vm1599_vm12, %v1575_v60, %v1608_v2  ;;  %v1602_v8 = vsel %vm1599_vm12, 1, %v1950_v3 }
 0xce9   :  { %v1596_v6 = vadd.s32 %v1595_v18, %v1594_v15  ;;  %v1603_v13 = vadd.s32 %v1602_v8, %v1601_v54 }
 0xceb   :  { %v1597_v53 = vadd.s32 %v1596_v6, %v1575_v60 }
 0xced   :  { %vm1600_vm13 = vcmp.ge.s32.totalorder %v2650_v58, %v1597_v53 }
 0xcee   :  { %v1604_v14 = vsel %vm1600_vm13, 1, %v1950_v3  ;;  %v1610_v27 = vsel %vm1600_vm13, %v1597_v53, %v1609_v19 }
 0xcef   :  { %v2692_v30 = vsub.s32 %v2650_v58, %v1610_v27  ;;  %v2694_v31 = vadd.s32 %v1604_v14, %v1603_v13 }
 0xcf1   :  { %v1606_v20 = vshll.u32 %v2694_v31, 6 }
 0xcf3   :  { %vm1612_vm15 = vcmp.eq.s32.totalorder %v2647_v57, %v1606_v20 }
 0xcf4   :  { %vm2704_vm2 = vmand %vm2662_vm5, %vm1612_vm15 }
 0xcf5   :  { %vm1618_vm4 = vmand %vm2704_vm2, %vm1617_vm14 }
 0xcf6   :  { %v1642_v58 = vsel %vm1618_vm4, 1, %v1950_v3  ;;  %vm1616_vm6 = vmand %vm2704_vm2, %vm1615_vm1 }
 0xcf7   :  { %v1643_v57 = vsel %vm35_vm0, %v1642_v58, 0  ;;  %v1621_v63 = vsel %vm1616_vm6, 1, %v1950_v3  ;;  %vm1620_vm5 = vmand %vm2704_vm2, %vm1619_vm3 }
 0xcf8   :  { %v1645_v59 = vshrl.u32 %v1643_v57, 16  ;;  %v1622_v0 = vsel %vm35_vm0, %v1621_v63, 0  ;;  %v1664_v26 = vsel %vm1620_vm5, 1, %v1950_v3  ;;  %v1644_v39 = vand.u32 65535, %v1643_v57 }
 0xcf9   :  { %v1624_v7 = vshrl.u32 %v1622_v0, 16  ;;  %v1623_v22 = vand.u32 65535, %v1622_v0  ;;  %v1665_v32 = vsel %vm35_vm0, %v1664_v26, 0 }
 0xcfa   :  { %v1647_v38 = vcvt.s32.f32 %v1645_v59  ;;  %v1646_v33 = vcvt.s32.f32 %v1644_v39  ;;  %v1666_v16 = vand.u32 65535, %v1665_v32  ;;  %v1667_v34 = vshrl.u32 %v1665_v32, 16 }
 0xcfb   :  { %v1626_v21 = vcvt.s32.f32 %v1624_v7  ;;  %v1625_v17 = vcvt.s32.f32 %v1623_v22 }
 0xcfc   :  { %1650 = vadd.xlane.f32.xlu1 %v1647_v38  ;;  %v1668_v36 = vcvt.s32.f32 %v1666_v16  ;;  %v1669_v44 = vcvt.s32.f32 %v1667_v34 }
 0xcfd   :  { %1629 = vadd.xlane.f32.xlu0 %v1626_v21 }
 0xd00   :  { %1648 = vadd.xlane.f32.xlu1 %v1646_v33 }
 0xd01   :  { %1627 = vadd.xlane.f32.xlu0 %v1625_v17 }
 0xd04   :  { %1670 = vadd.xlane.f32.xlu1 %v1668_v36  ;;  %v2731_v36 = vand.u32 12, %v2598_v46 }
 0xd05   :  { %1672 = vadd.xlane.f32.xlu0 %v1669_v44 }
 0xd06   :  { %vm1705_vm11 = vcmp.eq.s32.totalorder %v2731_v36, 4  ;;  %vm1703_vm13 = vcmp.eq.s32.totalorder %v2731_v36, 0  ;;  %vm1707_vm15 = vcmp.eq.s32.totalorder %v2731_v36, 8 }
 0xd85   :  { %v1651_v40 = vpop.xlane.xlu1 %1650 }
 0xd86   :  { %v1653_v41 = vcvt.f32.s32 %v1651_v40  ;;  %v1630_v11 = vpop.xlane.xlu0 %1629 }
 0xd87   :  { %v1632_v10 = vcvt.f32.s32 %v1630_v11  ;;  %v1607_v11 = vor.u32 %v1606_v20, %v1519_v45 }
 0xd88   :  { %v1654_v51 = vshll.u32 %v1653_v41, 16 }
 0xd89   :  { %v1649_v24 = vpop.xlane.xlu1 %1648  ;;  %v1633_v29 = vshll.u32 %v1632_v10, 16 }
 0xd8a   :  { %v1652_v52 = vcvt.f32.s32 %v1649_v24  ;;  %v1628_v28 = vpop.xlane.xlu0 %1627 }
 0xd8b   :  { %v1631_v35 = vcvt.f32.s32 %v1628_v28 }
 0xd8c   :  { %v1655_v42 = vadd.s32 %v1654_v51, %v1652_v52 }
 0xd8d   :  { %v1634_v37 = vadd.s32 %v1633_v29, %v1631_v35  ;;  %v1671_v50 = vpop.xlane.xlu1 %1670 }
 0xd8e   :  { %v1656_v49 = vsel %vm35_vm0, %v1655_v42, 0  ;;  %v1673_v61 = vpop.xlane.xlu0 %1672  ;;  %v1674_v60 = vcvt.f32.s32 %v1671_v50 }
 0xd8f   :  { %v1657_v62 = vrot.slane %v1656_v49, 4  ;;  %v1635_v4 = vsel %vm35_vm0, %v1634_v37, 0  ;;  %v1675_v5 = vcvt.f32.s32 %v1673_v61 }
 0xd90   :  { %v1636_v55 = vrot.slane %v1635_v4, 4 }
 0xd91   :  { %v1658_v23 = vadd.s32 %v1657_v62, %v1656_v49  ;;  %v1676_v15 = vshll.u32 %v1675_v5, 16 }
 0xd92   :  { %v1637_v2 = vadd.s32 %v1636_v55, %v1635_v4 }
 0xd93   :  { %v1659_v18 = vrot.slane %v1658_v23, 2  ;;  %v1677_v19 = vadd.s32 %v1676_v15, %v1674_v60 }
 0xd94   :  { %v1638_v6 = vrot.slane %v1637_v2, 2 }
 0xd95   :  { %v1660_v8 = vadd.s32 %v1659_v18, %v1658_v23  ;;  %v1678_v53 = vsel %vm35_vm0, %v1677_v19, 0 }
 0xd96   :  { %v1639_v54 = vadd.s32 %v1638_v6, %v1637_v2  ;;  %v1679_v13 = vrot.slane %v1678_v53, 4 }
 0xd97   :  { %v1661_v14 = vrot.slane %v1660_v8, 1 }
 0xd98   :  { %v1640_v27 = vrot.slane %v1639_v54, 1  ;;  %v1680_v58 = vadd.s32 %v1679_v13, %v1678_v53 }
 0xd99   :  { %v1662_v57 = vadd.s32 %v1661_v14, %v1660_v8 }
 0xd9a   :  { %v1641_v63 = vadd.s32 %v1640_v27, %v1639_v54  ;;  %v1681_v59 = vrot.slane %v1680_v58, 2 }
 0xd9c   :  { %v1663_v0 = vadd.s32 %v1662_v57, %v1641_v63  ;;  %vm1686_vm7 = vcmp.ge.s32.totalorder %v2692_v30, %v1641_v63  ;;  %v1682_v26 = vadd.s32 %v1681_v59, %v1680_v58 }
 0xd9d   :  { %v1696_v7 = vsel %vm1686_vm7, %v1641_v63, 0  ;;  %v1689_v33 = vsel %vm1686_vm7, 1, %v1950_v3 }
 0xd9e   :  { %vm1687_vm8 = vcmp.ge.s32.totalorder %v2692_v30, %v1663_v0  ;;  %v1683_v38 = vrot.slane %v1682_v26, 1 }
 0xd9f   :  { %v1697_v39 = vsel %vm1687_vm8, %v1663_v0, %v1696_v7  ;;  %v1690_v22 = vsel %vm1687_vm8, 1, %v1950_v3 }
 0xda0   :  { %v1684_v21 = vadd.s32 %v1683_v38, %v1682_v26  ;;  %v1691_v16 = vadd.s32 %v1690_v22, %v1689_v33 }
 0xda2   :  { %v1685_v32 = vadd.s32 %v1684_v21, %v1663_v0 }
 0xda4   :  { %vm1688_vm10 = vcmp.ge.s32.totalorder %v2692_v30, %v1685_v32 }
 0xda5   :  { %v1692_v17 = vsel %vm1688_vm10, 1, %v1950_v3  ;;  %v1698_v34 = vsel %vm1688_vm10, %v1685_v32, %v1697_v39 }
 0xda6   :  { %v2734_v44 = vsub.s32 %v2692_v30, %v1698_v34  ;;  %v1693_v40 = vadd.s32 %v1692_v17, %v1691_v16 }
 0xda8   :  { %v1694_v41 = vshll.u32 %v1693_v40, 4 }
 0xdaa   :  { %vm1700_vm12 = vcmp.eq.s32.totalorder %v2689_v12, %v1694_v41  ;;  %v2743_v10 = vor.u32 %v1694_v41, %v1607_v11 }
 0xdab   :  { %vm2747_vm14 = vmand %vm2704_vm2, %vm1700_vm12 }
 0xdac   :  { %vm1706_vm1 = vmand %vm2747_vm14, %vm1705_vm11 }
 0xdad   :  { %v1730_v43 = vsel %vm1706_vm1, 1, %v1950_v3  ;;  %vm1704_vm3 = vmand %vm2747_vm14, %vm1703_vm13 }
 0xdae   :  { %v1731_v45 = vsel %vm35_vm0, %v1730_v43, 0  ;;  %v1709_v12 = vsel %vm1704_vm3, 1, %v1950_v3  ;;  %vm1708_vm2 = vmand %vm2747_vm14, %vm1707_vm15 }
 0xdaf   :  { %v1733_v31 = vshrl.u32 %v1731_v45, 16  ;;  %v1710_v20 = vsel %vm35_vm0, %v1709_v12, 0  ;;  %v1752_v9 = vsel %vm1708_vm2, 1, %v1950_v3  ;;  %v1732_v52 = vand.u32 65535, %v1731_v45 }
 0xdb0   :  { %v1712_v24 = vshrl.u32 %v1710_v20, 16  ;;  %v1711_v29 = vand.u32 65535, %v1710_v20  ;;  %v1753_v35 = vsel %vm35_vm0, %v1752_v9, 0 }
 0xdb1   :  { %v1735_v51 = vcvt.s32.f32 %v1733_v31  ;;  %v1734_v42 = vcvt.s32.f32 %v1732_v52  ;;  %v1754_v37 = vand.u32 65535, %v1753_v35  ;;  %v1755_v50 = vshrl.u32 %v1753_v35, 16 }
 0xdb2   :  { %v1714_v28 = vcvt.s32.f32 %v1712_v24  ;;  %v1713_v49 = vcvt.s32.f32 %v1711_v29 }
 0xdb3   :  { %1738 = vadd.xlane.f32.xlu1 %v1735_v51  ;;  %v1756_v61 = vcvt.s32.f32 %v1754_v37  ;;  %v1757_v62 = vcvt.s32.f32 %v1755_v50  ;;  %v1790_v37 = vand.u32 3, %v2598_v46 }
 0xdb4   :  { %1717 = vadd.xlane.f32.xlu0 %v1714_v28 }
 0xdb5   :  { %vm1793_vm7 = vcmp.eq.s32.totalorder %v1790_v37, 1  ;;  %vm1791_vm10 = vcmp.eq.s32.totalorder %v1790_v37, 0  ;;  %vm1795_vm12 = vcmp.eq.s32.totalorder %v1790_v37, 2 }
 0xdb7   :  { %1736 = vadd.xlane.f32.xlu1 %v1734_v42 }
 0xdb8   :  { %1715 = vadd.xlane.f32.xlu0 %v1713_v49 }
 0xdbb   :  { %1758 = vadd.xlane.f32.xlu1 %v1756_v61 }
 0xdbc   :  { %1760 = vadd.xlane.f32.xlu0 %v1757_v62 }
 0xe3c   :  { %v1739_v4 = vpop.xlane.xlu1 %1738 }
 0xe3d   :  { %v1741_v5 = vcvt.f32.s32 %v1739_v4  ;;  %v1718_v55 = vpop.xlane.xlu0 %1717 }
 0xe3e   :  { %v1720_v23 = vcvt.f32.s32 %v1718_v55 }
 0xe3f   :  { %v1742_v15 = vshll.u32 %v1741_v5, 16 }
 0xe40   :  { %v1737_v60 = vpop.xlane.xlu1 %1736  ;;  %v1721_v19 = vshll.u32 %v1720_v23, 16 }
 0xe41   :  { %v1740_v2 = vcvt.f32.s32 %v1737_v60  ;;  %v1716_v18 = vpop.xlane.xlu0 %1715 }
 0xe42   :  { %v1719_v6 = vcvt.f32.s32 %v1716_v18 }
 0xe43   :  { %v1743_v8 = vadd.s32 %v1742_v15, %v1740_v2 }
 0xe44   :  { %v1722_v53 = vadd.s32 %v1721_v19, %v1719_v6  ;;  %v1759_v13 = vpop.xlane.xlu1 %1758 }
 0xe45   :  { %v1744_v54 = vsel %vm35_vm0, %v1743_v8, 0  ;;  %v1761_v14 = vpop.xlane.xlu0 %1760  ;;  %v1762_v0 = vcvt.f32.s32 %v1759_v13 }
 0xe46   :  { %v1745_v27 = vrot.slane %v1744_v54, 4  ;;  %v1723_v58 = vsel %vm35_vm0, %v1722_v53, 0  ;;  %v1763_v57 = vcvt.f32.s32 %v1761_v14 }
 0xe47   :  { %v1724_v63 = vrot.slane %v1723_v58, 4 }
 0xe48   :  { %v1746_v59 = vadd.s32 %v1745_v27, %v1744_v54  ;;  %v1764_v26 = vshll.u32 %v1763_v57, 16 }
 0xe49   :  { %v1725_v7 = vadd.s32 %v1724_v63, %v1723_v58 }
 0xe4a   :  { %v1747_v38 = vrot.slane %v1746_v59, 2  ;;  %v1765_v39 = vadd.s32 %v1764_v26, %v1762_v0 }
 0xe4b   :  { %v1726_v21 = vrot.slane %v1725_v7, 2 }
 0xe4c   :  { %v1748_v22 = vadd.s32 %v1747_v38, %v1746_v59  ;;  %v1766_v32 = vsel %vm35_vm0, %v1765_v39, 0 }
 0xe4d   :  { %v1727_v33 = vadd.s32 %v1726_v21, %v1725_v7  ;;  %v1767_v16 = vrot.slane %v1766_v32, 4 }
 0xe4e   :  { %v1749_v17 = vrot.slane %v1748_v22, 1 }
 0xe4f   :  { %v1728_v34 = vrot.slane %v1727_v33, 1  ;;  %v1768_v40 = vadd.s32 %v1767_v16, %v1766_v32 }
 0xe50   :  { %v1750_v41 = vadd.s32 %v1749_v17, %v1748_v22 }
 0xe51   :  { %v1729_v11 = vadd.s32 %v1728_v34, %v1727_v33  ;;  %v1769_v43 = vrot.slane %v1768_v40, 2 }
 0xe53   :  { %v1751_v45 = vadd.s32 %v1750_v41, %v1729_v11  ;;  %vm1774_vm4 = vcmp.ge.s32.totalorder %v2734_v44, %v1729_v11  ;;  %v1770_v12 = vadd.s32 %v1769_v43, %v1768_v40 }
 0xe54   :  { %v1784_v31 = vsel %vm1774_vm4, %v1729_v11, 0  ;;  %v1777_v28 = vsel %vm1774_vm4, 1, %v1950_v3 }
 0xe55   :  { %vm1775_vm6 = vcmp.ge.s32.totalorder %v2734_v44, %v1751_v45  ;;  %v1771_v20 = vrot.slane %v1770_v12, 1 }
 0xe56   :  { %v1785_v9 = vsel %vm1775_vm6, %v1751_v45, %v1784_v31  ;;  %v1778_v51 = vsel %vm1775_vm6, 1, %v1950_v3  ;;  %vm1873_vm6 = vcmp.ge.s32.totalorder %v1981_v1, %v1426_v47 }
 0xe57   :  { %v1772_v24 = vadd.s32 %v1771_v20, %v1770_v12  ;;  %v1779_v29 = vadd.s32 %v1778_v51, %v1777_v28 }
 0xe59   :  { %v1773_v52 = vadd.s32 %v1772_v24, %v1751_v45 }
 0xe5b   :  { %vm1776_vm5 = vcmp.ge.s32.totalorder %v2734_v44, %v1773_v52 }
 0xe5c   :  { %v1786_v35 = vsel %vm1776_vm5, %v1773_v52, %v1785_v9  ;;  %v1780_v42 = vsel %vm1776_vm5, 1, %v1950_v3  ;;  %vm1952_vm5 = vmmov 1  }
 0xe5d   :  { %v1781_v49 = vadd.s32 %v1780_v42, %v1779_v29  ;;  %v2775_v50 = vsub.s32 %v2734_v44, %v1786_v35 }
 0xe5f   :  { %v1782_v61 = vshll.u32 %v1781_v49, 2 }
 0xe61   :  { %vm1788_vm8 = vcmp.eq.s32.totalorder %v2731_v36, %v1782_v61  ;;  %v2779_v62 = vor.u32 %v1782_v61, %v2743_v10 }
 0xe62   :  { %vm1789_vm11 = vmand %vm2747_vm14, %vm1788_vm8 }
 0xe63   :  { %vm1794_vm13 = vmand %vm1789_vm11, %vm1793_vm7 }
 0xe64   :  { %v1818_v4 = vsel %vm1794_vm13, 1, %v1950_v3  ;;  %vm1792_vm15 = vmand %vm1789_vm11, %vm1791_vm10 }
 0xe65   :  { %v1819_v5 = vsel %vm35_vm0, %v1818_v4, 0  ;;  %v1797_v44 = vsel %vm1792_vm15, 1, %v1950_v3  ;;  %vm1796_vm1 = vmand %vm1789_vm11, %vm1795_vm12 }
 0xe66   :  { %v1821_v55 = vshrl.u32 %v1819_v5, 16  ;;  %v1798_v36 = vsel %vm35_vm0, %v1797_v44, 0  ;;  %v1840_v23 = vsel %vm1796_vm1, 1, %v1950_v3  ;;  %v1820_v15 = vand.u32 65535, %v1819_v5 }
 0xe67   :  { %v1800_v10 = vshrl.u32 %v1798_v36, 16  ;;  %v1799_v2 = vand.u32 65535, %v1798_v36  ;;  %v1841_v18 = vsel %vm35_vm0, %v1840_v23, 0 }
 0xe68   :  { %v1823_v60 = vcvt.s32.f32 %v1821_v55  ;;  %v1822_v19 = vcvt.s32.f32 %v1820_v15  ;;  %v1842_v6 = vand.u32 65535, %v1841_v18  ;;  %v1843_v53 = vshrl.u32 %v1841_v18, 16 }
 0xe69   :  { %v1802_v30 = vcvt.s32.f32 %v1800_v10  ;;  %v1801_v8 = vcvt.s32.f32 %v1799_v2 }
 0xe6a   :  { %1826 = vadd.xlane.f32.xlu1 %v1823_v60  ;;  %v1844_v54 = vcvt.s32.f32 %v1842_v6  ;;  %v1845_v13 = vcvt.s32.f32 %v1843_v53 }
 0xe6b   :  { %1805 = vadd.xlane.f32.xlu0 %v1802_v30 }
 0xe6e   :  { %1824 = vadd.xlane.f32.xlu1 %v1822_v19 }
 0xe6f   :  { %1803 = vadd.xlane.f32.xlu0 %v1801_v8 }
 0xe72   :  { %1846 = vadd.xlane.f32.xlu1 %v1844_v54 }
 0xe73   :  { %1848 = vadd.xlane.f32.xlu0 %v1845_v13 }
 0xef3   :  { %v1827_v14 = vpop.xlane.xlu1 %1826 }
 0xef4   :  { %v1829_v27 = vcvt.f32.s32 %v1827_v14  ;;  %v1806_v58 = vpop.xlane.xlu0 %1805 }
 0xef5   :  { %v1808_v57 = vcvt.f32.s32 %v1806_v58 }
 0xef6   :  { %v1830_v59 = vshll.u32 %v1829_v27, 16 }
 0xef7   :  { %v1825_v63 = vpop.xlane.xlu1 %1824  ;;  %v1809_v7 = vshll.u32 %v1808_v57, 16 }
 0xef8   :  { %v1828_v0 = vcvt.f32.s32 %v1825_v63  ;;  %v1804_v26 = vpop.xlane.xlu0 %1803 }
 0xef9   :  { %v1807_v38 = vcvt.f32.s32 %v1804_v26 }
 0xefa   :  { %v1831_v39 = vadd.s32 %v1830_v59, %v1828_v0 }
 0xefb   :  { %v1810_v21 = vadd.s32 %v1809_v7, %v1807_v38  ;;  %v1847_v32 = vpop.xlane.xlu1 %1846 }
 0xefc   :  { %v1832_v22 = vsel %vm35_vm0, %v1831_v39, 0  ;;  %v1849_v33 = vpop.xlane.xlu0 %1848  ;;  %v1850_v11 = vcvt.f32.s32 %v1847_v32 }
 0xefd   :  { %v1833_v16 = vrot.slane %v1832_v22, 4  ;;  %v1811_v17 = vsel %vm35_vm0, %v1810_v21, 0  ;;  %v1851_v34 = vcvt.f32.s32 %v1849_v33 }
 0xefe   :  { %v1812_v40 = vrot.slane %v1811_v17, 4 }
 0xeff   :  { %v1834_v41 = vadd.s32 %v1833_v16, %v1832_v22  ;;  %v1852_v43 = vshll.u32 %v1851_v34, 16 }
 0xf00   :  { %v1813_v45 = vadd.s32 %v1812_v40, %v1811_v17 }
 0xf01   :  { %v1835_v12 = vrot.slane %v1834_v41, 2  ;;  %v1853_v31 = vadd.s32 %v1852_v43, %v1850_v11 }
 0xf02   :  { %v1814_v20 = vrot.slane %v1813_v45, 2 }
 0xf03   :  { %v1836_v9 = vadd.s32 %v1835_v12, %v1834_v41  ;;  %v1854_v24 = vsel %vm35_vm0, %v1853_v31, 0 }
 0xf04   :  { %v1815_v51 = vadd.s32 %v1814_v20, %v1813_v45  ;;  %v1855_v52 = vrot.slane %v1854_v24, 4 }
 0xf05   :  { %v1837_v28 = vrot.slane %v1836_v9, 1 }
 0xf06   :  { %v1816_v29 = vrot.slane %v1815_v51, 1  ;;  %v1856_v35 = vadd.s32 %v1855_v52, %v1854_v24 }
 0xf07   :  { %v1838_v42 = vadd.s32 %v1837_v28, %v1836_v9 }
 0xf08   :  { %v1817_v37 = vadd.s32 %v1816_v29, %v1815_v51  ;;  %v1857_v49 = vrot.slane %v1856_v35, 2 }
 0xf0a   :  { %v1839_v61 = vadd.s32 %v1838_v42, %v1817_v37  ;;  %v1858_v4 = vadd.s32 %v1857_v49, %v1856_v35  ;;  %vm1862_vm3 = vcmp.ge.s32.totalorder %v2775_v50, %v1817_v37 }
 0xf0b   :  { %v1865_v23 = vsel %vm1862_vm3, 1, %v1950_v3 }
 0xf0c   :  { %vm1863_vm14 = vcmp.ge.s32.totalorder %v2775_v50, %v1839_v61  ;;  %v1859_v5 = vrot.slane %v1858_v4, 1 }
 0xf0d   :  { %v1866_v55 = vsel %vm1863_vm14, 1, %v1950_v3 }
 0xf0e   :  { %v1860_v44 = vadd.s32 %v1859_v5, %v1858_v4  ;;  %v1867_v10 = vadd.s32 %v1866_v55, %v1865_v23 }
 0xf10   :  { %v1861_v36 = vadd.s32 %v1860_v44, %v1839_v61 }
 0xf12   :  { %vm1864_vm0 = vcmp.ge.s32.totalorder %v2775_v50, %v1861_v36 }
 0xf13   :  { %v1868_v60 = vsel %vm1864_vm0, 1, %v1950_v3  ;;  %v1953_v3 = vmov 0.0  }
 0xf14   :  { %v1869_v15 = vadd.s32 %v1868_v60, %v1867_v10 }
 0xf16   :  { %v1870_v30 = vor.u32 %v1869_v15, %v2779_v62 }
 0xf18   :  { %vm1871_vm2 = vcmp.lt.s32.totalorder %v2598_v46, %v1870_v30 }
 0xf19   :  { %vm1872_vm4 = vmand %vm2620_vm9, %vm1871_vm2 }
 0xf1a   :  { %vm1874_vm7 = vmxor %vm1872_vm4, %vm1952_vm5 }
 0xf1b   :  { %vm1875_vm8 = vmand %vm1873_vm6, %vm1874_vm7 }
 0xf1c   :  { %v1897_v50 = vsel %vm1875_vm8, 1.0, %v1953_v3 }
 0xf1d   :  { %1878 = vst [vmem:[#allocation7] sm:$0xf] %v1897_v50 }
 0xf1e   :  { %1936 = shalt.err (!%p1933_p0)
}
 0xf1f   :  { %1888 = dma.vmem_to_hbm [thread:$0]  %s1886_s23, 64, %s2811_s2, [#allocation6]  }
 0xf20   :  { %1947 = dma.done.wait [#allocation6], 64  }
 0xf21   :  { %1948 = vsyncadd [#allocation6], 4294967232 }
 0xf22   :  { %1892 = vsyncpa [#allocation5], 1 }
 0xf23   :  { %1893 = vsyncpa [#allocation6], 1 }

</bundles_post_ra>
